<compile_context>
chip_gen: v7x
topology: tpu7x:2x2x1
jax: 0.10.0
libtpu: 0.0.40
codegen_flags: <defaults>
</compile_context>

<pallas_src>
import functools

import jax
import jax.numpy as jnp
import numpy as np
from jax.experimental import pallas as pl
from jax.experimental.pallas import tpu as pltpu

F32 = jnp.float32
BF16 = jnp.bfloat16
_HI = jax.lax.Precision.HIGHEST

_TILE_N_TARGET = 2048           # ~2 MiB per f32 (TILE_N, 256) activation
_VMEM_LIMIT = 40 * 1024 * 1024  # explicit, with headroom; < 64 MiB (v7x phys)


def _round_up(x, m):
    return (x + m - 1) // m * m


def _leaky_relu(x, slope=0.2):
    return jnp.where(x > 0, x, slope * x)


def _compute_film(z, map_params, hidden_inr, first_omega, hidden_omega):
    """piGAN mapping network in plain JAX (M=1 matmuls -> not worth the MXU).

    Returns (gamma + first_omega, gamma + hidden_omega, beta), each (B, 1, H).
    """
    m0w, m0b, mhw, mhb, mlw, mlb = map_params
    hm = m0w.shape[1]
    h = _leaky_relu(jnp.matmul(z, m0w, precision=_HI) + m0b)
    for i in range(mhw.shape[0]):
        h = _leaky_relu(jnp.matmul(h, mhw[i], precision=_HI) + mhb[i])
    gb = jnp.matmul(h, mlw, precision=_HI) + mlb
    gamma = gb[..., :hm][..., :hidden_inr]
    beta = gb[..., hm:][..., :hidden_inr]
    return gamma + first_omega, gamma + hidden_omega, beta


# --------------------------------------------------------------------------
# Pallas kernel: the FiLM-SIREN INR stack for one (batch row, N-tile) block.
# --------------------------------------------------------------------------
def pigan_inr_kernel(gf_ref, gh_ref, beta_ref, coords_ref,
                     w0_ref, b0_ref, whw_ref, whb_ref, wlw_ref, wlb_ref,
                     out_ref, *, num_inr_hidden, in_features):
    tn = coords_ref.shape[1]
    hidden = gf_ref.shape[-1]

    x = coords_ref[0]                                      # (TN, Din) f32
    # FiLM terms: (gamma+omega) adds were hoisted to the wrapper; hoist the
    # (TN, H) broadcasts out of the unrolled layer loop too (no CSE in JAX).
    be = jnp.broadcast_to(beta_ref[0], (tn, hidden))       # (TN, H)
    gh = jnp.broadcast_to(gh_ref[0], (tn, hidden))         # (TN, H)
    gf = gf_ref[0]                                         # (1, H) single use

    # ---- first layer: K == in_features (tiny) -> VPU broadcast FMAs, f32 ----
    w0 = w0_ref[...]                                       # (Din, H) f32
    pre = x[:, 0:1] * w0[0:1, :] + b0_ref[...]
    for k in range(1, in_features):                        # static unroll
        pre = pre + x[:, k:k + 1] * w0[k:k + 1, :]
    h = jnp.sin(gf * pre + be)

    # ---- hidden FiLM-sine layers: bf16 x bf16 -> f32 on the MXU ----
    for i in range(num_inr_hidden):                        # static unroll
        pre = jnp.dot(h.astype(BF16), whw_ref[i],
                      preferred_element_type=jnp.float32) + whb_ref[i]
        h = jnp.sin(gh * pre + be)

    # ---- final linear (omega_0 = 1, no FiLM); lane-dense padded output ----
    out = jnp.dot(h.astype(BF16), wlw_ref[...],
                  preferred_element_type=jnp.float32) + wlb_ref[...]
    out_ref[0] = out.astype(out_ref.dtype)


def pigan_forward(coords, z, params, *, first_omega, hidden_omega, tile_n=None):
    (m0w, m0b, mhw, mhb, mlw, mlb, w0, b0, whw, whb, wlw, wlb) = params
    B, N, Din = coords.shape
    H = w0.shape[1]
    Hm = m0w.shape[1]
    Dout = wlw.shape[1]
    # FiLM gamma/beta slicing assumes the INR width fits inside the mapping
    # network's gamma half (mirrors the PyTorch gamma[:, :, :out_features]).
    assert H <= Hm, "num_hidden_INR must be <= num_hidden_mapping"

    # Mapping network + (gamma + omega) hoisted out of the kernel.
    gf, gh, beta = _compute_film(
        z, (m0w, m0b, mhw, mhb, mlw, mlb), H, first_omega, hidden_omega)

    # Tile over N; pad N to a tile multiple (padded rows are sliced off).
    if tile_n is None:
        if N >= _TILE_N_TARGET:
            tile_n = _TILE_N_TARGET
            # Keep the per-tile activation footprint bounded for very wide INRs.
            while tile_n > 512 and tile_n * H * 4 > 4 * 1024 * 1024:
                tile_n //= 2
        else:
            tile_n = _round_up(N, 8)
    n_pad = _round_up(N, tile_n)
    if n_pad != N:
        coords = jnp.pad(coords, ((0, 0), (0, n_pad - N), (0, 0)))

    # Lane-dense output: zero-pad the final linear to a 128-wide column block.
    out_w = _round_up(Dout, 128)
    wlw_p = jnp.zeros((H, out_w), wlw.dtype).at[:, :Dout].set(wlw)
    wlb_p = jnp.zeros((1, out_w), wlb.dtype).at[:, :Dout].set(wlb)

    # bf16 weights for the hidden / final matmuls (f32 accumulation).
    whw_bf = whw.astype(BF16)
    wlw_bf = wlw_p.astype(BF16)
    weights = (w0, b0, whw_bf, whb, wlw_bf, wlb_p)

    kernel = functools.partial(pigan_inr_kernel,
                               num_inr_hidden=whw.shape[0],
                               in_features=Din)

    def full_spec(a):                      # resident (untiled) weight arrays
        zeros = (0,) * a.ndim
        return pl.BlockSpec(a.shape, lambda b, n, _z=zeros: _z)

    in_specs = [
        pl.BlockSpec((1, 1, H), lambda b, n: (b, 0, 0)),         # gamma + w_first
        pl.BlockSpec((1, 1, H), lambda b, n: (b, 0, 0)),         # gamma + w_hidden
        pl.BlockSpec((1, 1, H), lambda b, n: (b, 0, 0)),         # beta
        pl.BlockSpec((1, tile_n, Din), lambda b, n: (b, n, 0)),  # coords tile
    ] + [full_spec(a) for a in weights]

    out_spec = pl.BlockSpec((1, tile_n, out_w), lambda b, n: (b, n, 0))

    out_padded = pl.pallas_call(
        kernel,
        out_shape=jax.ShapeDtypeStruct((B, n_pad, out_w), coords.dtype),
        grid_spec=pltpu.PrefetchScalarGridSpec(
            num_scalar_prefetch=0,
            grid=(B, n_pad // tile_n),
            in_specs=in_specs,
            out_specs=out_spec,
        ),
        compiler_params=pltpu.CompilerParams(
            dimension_semantics=("parallel", "parallel"),
            vmem_limit_bytes=_VMEM_LIMIT,
        ),
    )(gf, gh, beta, coords, *weights)

    return out_padded[:, :N, :Dout]


# --------------------------------------------------------------------------
# Pure-JAX reference mirroring the PyTorch forward (and the kernel's intended
# numerics: f32 first layer, bf16 weights/activations with f32 accumulation
# for the hidden and final matmuls).
# --------------------------------------------------------------------------
def pigan_reference(coords, z, params, first_omega, hidden_omega):
    (m0w, m0b, mhw, mhb, mlw, mlb, w0, b0, whw, whb, wlw, wlb) = params
    H = w0.shape[1]
    gf, gh, beta = _compute_film(
        z, (m0w, m0b, mhw, mhb, mlw, mlb), H, first_omega, hidden_omega)

    pre = jnp.matmul(coords, w0, precision=_HI) + b0
    h = jnp.sin(gf * pre + beta)
    for i in range(whw.shape[0]):
        pre = jnp.matmul(h.astype(BF16), whw[i].astype(BF16),
                         preferred_element_type=jnp.float32) + whb[i]
        h = jnp.sin(gh * pre + beta)
    return jnp.matmul(h.astype(BF16), wlw.astype(BF16),
                      preferred_element_type=jnp.float32) + wlb


def init_params(key, *, in_features, out_features, z_size, hidden_map,
                hidden_inr, num_mapping_layers, num_inr_layers):
    """Deterministic init mirroring the PyTorch module's shapes / schemes.
    Weights stored as (in, out)."""
    ks = iter(jax.random.split(key, 64))
    lrelu_gain = float(np.sqrt(2.0 / (1.0 + 0.2 ** 2)))

    def kaiming(k, fan_in, shape):
        return jax.random.normal(k, shape, F32) * (lrelu_gain / np.sqrt(fan_in))

    def lin_bias(k, fan_in, shape):
        bound = 1.0 / np.sqrt(fan_in)
        return jax.random.uniform(k, shape, F32, -bound, bound)

    # mapping net: Linear(z,Hm)+LReLU, (depth-1)x[Linear(Hm,Hm)+LReLU],
    # Linear(Hm, 2*Hm) with final weight *= 0.25
    nmh = num_mapping_layers - 1
    m0w = kaiming(next(ks), z_size, (z_size, hidden_map))
    m0b = lin_bias(next(ks), z_size, (1, hidden_map))
    mhw = kaiming(next(ks), hidden_map, (nmh, hidden_map, hidden_map))
    mhb = lin_bias(next(ks), hidden_map, (nmh, 1, hidden_map))
    mlw = kaiming(next(ks), hidden_map, (hidden_map, 2 * hidden_map)) * 0.25
    mlb = lin_bias(next(ks), hidden_map, (1, 2 * hidden_map))

    # INR stack: first (siren_first + polar bias), hidden (siren + polar bias),
    # last (siren_omega, default bias)
    w0 = jax.random.uniform(next(ks), (in_features, hidden_inr), F32,
                            -1.0 / in_features, 1.0 / in_features)
    b0 = jax.random.uniform(next(ks), (1, hidden_inr), F32, 0.0, 2.0 * np.pi)

    nih = num_inr_layers - 1
    sir = float(np.sqrt(6.0 / hidden_inr) / 30.0)
    whw = jax.random.uniform(next(ks), (nih, hidden_inr, hidden_inr), F32,
                             -sir, sir)
    whb = jax.random.uniform(next(ks), (nih, 1, hidden_inr), F32, 0.0,
                             2.0 * np.pi)
    wlw = jax.random.uniform(next(ks), (hidden_inr, out_features), F32,
                             -sir, sir)
    wlb = lin_bias(next(ks), hidden_inr, (1, out_features))

    return (m0w, m0b, mhw, mhb, mlw, mlb, w0, b0, whw, whb, wlw, wlb)


if __name__ == "__main__":
    # Small shapes consistent with the module's forward.
    B, N = 2, 64
    in_features, out_features = 2, 3
    z_size = 16
    hidden_map = 32          # num_hidden_mapping
    hidden_inr = 32          # num_hidden_INR
    num_mapping_layers = 3
    num_inr_layers = 4       # first + 3 FiLM-sine hidden + final linear
    first_omega, hidden_omega = 600.0, 30.0

    key = jax.random.PRNGKey(0)
    kp, kc, kz = jax.random.split(key, 3)
    params = init_params(kp, in_features=in_features, out_features=out_features,
                         z_size=z_size, hidden_map=hidden_map,
                         hidden_inr=hidden_inr,
                         num_mapping_layers=num_mapping_layers,
                         num_inr_layers=num_inr_layers)

    coords = jax.random.uniform(kc, (B, N, in_features), F32, -1.0, 1.0)
    z = jax.random.normal(kz, (B, 1, z_size), F32)

    out = pigan_forward(coords, z, params,
                        first_omega=first_omega, hidden_omega=hidden_omega)
    out = jax.block_until_ready(out)
    assert out.shape == (B, N, out_features)

    ref = pigan_reference(coords, z, params, first_omega, hidden_omega)
    # Tolerance sized for bf16 hidden matmuls amplified through the sine layers
    # (kernel and reference use matching numerics, so differences stay small).
    np.testing.assert_allclose(np.asarray(out), np.asarray(ref),
                               rtol=3e-3, atol=3e-3)
    print("KERNEL_OK")
</pallas_src>

<mosaic_0001>
module attributes {stable_mosaic.version = 11 : i64} {
  func.func @pigan_inr_kernel(%arg0: i32, %arg1: i32, %arg2: memref<1x1x32xf32, #tpu.memory_space<vmem>>, %arg3: memref<1x1x32xf32, #tpu.memory_space<vmem>>, %arg4: memref<1x1x32xf32, #tpu.memory_space<vmem>>, %arg5: memref<1x64x2xf32, #tpu.memory_space<vmem>>, %arg6: memref<2x32xf32, #tpu.memory_space<vmem>>, %arg7: memref<1x32xf32, #tpu.memory_space<vmem>>, %arg8: memref<3x32x32xbf16, #tpu.memory_space<vmem>>, %arg9: memref<3x1x32xf32, #tpu.memory_space<vmem>>, %arg10: memref<32x128xbf16, #tpu.memory_space<vmem>>, %arg11: memref<1x128xf32, #tpu.memory_space<vmem>>, %arg12: memref<1x64x128xf32, #tpu.memory_space<vmem>>) attributes {dimension_semantics = [#tpu.dimension_semantics<parallel>, #tpu.dimension_semantics<parallel>], iteration_bounds = array<i64: 2, 1>, scalar_prefetch = 0 : i64, scratch_operands = 0 : i64, tpu.core_type = #tpu.core_type<tc>, window_params = [{transform_indices = @transform_0, window_bounds = array<i64: 1, 1, 32>}, {transform_indices = @transform_1, window_bounds = array<i64: 1, 1, 32>}, {transform_indices = @transform_2, window_bounds = array<i64: 1, 1, 32>}, {transform_indices = @transform_3, window_bounds = array<i64: 1, 64, 2>}, {pipeline_mode = #tpu.pipeline_mode<synchronous>, transform_indices = @transform_4, window_bounds = array<i64: 2, 32>}, {pipeline_mode = #tpu.pipeline_mode<synchronous>, transform_indices = @transform_5, window_bounds = array<i64: 1, 32>}, {pipeline_mode = #tpu.pipeline_mode<synchronous>, transform_indices = @transform_6, window_bounds = array<i64: 3, 32, 32>}, {pipeline_mode = #tpu.pipeline_mode<synchronous>, transform_indices = @transform_7, window_bounds = array<i64: 3, 1, 32>}, {pipeline_mode = #tpu.pipeline_mode<synchronous>, transform_indices = @transform_8, window_bounds = array<i64: 32, 128>}, {pipeline_mode = #tpu.pipeline_mode<synchronous>, transform_indices = @transform_9, window_bounds = array<i64: 1, 128>}, {transform_indices = @transform_10, window_bounds = array<i64: 1, 64, 128>}]} {
    %c0 = arith.constant 0 : index
    %c0_0 = arith.constant 0 : index
    %c0_1 = arith.constant 0 : index
    %0 = vector.load %arg5[%c0, %c0_0, %c0_1] : memref<1x64x2xf32, #tpu.memory_space<vmem>>, vector<1x64x2xf32>
    %1 = vector.shape_cast %0 : vector<1x64x2xf32> to vector<64x2xf32>
    %c0_2 = arith.constant 0 : index
    %c0_3 = arith.constant 0 : index
    %c0_4 = arith.constant 0 : index
    %2 = vector.load %arg4[%c0_2, %c0_3, %c0_4] : memref<1x1x32xf32, #tpu.memory_space<vmem>>, vector<1x1x32xf32>
    %3 = vector.shape_cast %2 : vector<1x1x32xf32> to vector<1x32xf32>
    %4 = vector.shape_cast %3 : vector<1x32xf32> to vector<1x32xf32>
    %5 = vector.broadcast %4 : vector<1x32xf32> to vector<64x32xf32>
    %c0_5 = arith.constant 0 : index
    %c0_6 = arith.constant 0 : index
    %c0_7 = arith.constant 0 : index
    %6 = vector.load %arg3[%c0_5, %c0_6, %c0_7] : memref<1x1x32xf32, #tpu.memory_space<vmem>>, vector<1x1x32xf32>
    %7 = vector.shape_cast %6 : vector<1x1x32xf32> to vector<1x32xf32>
    %8 = vector.shape_cast %7 : vector<1x32xf32> to vector<1x32xf32>
    %9 = vector.broadcast %8 : vector<1x32xf32> to vector<64x32xf32>
    %c0_8 = arith.constant 0 : index
    %c0_9 = arith.constant 0 : index
    %c0_10 = arith.constant 0 : index
    %10 = vector.load %arg2[%c0_8, %c0_9, %c0_10] : memref<1x1x32xf32, #tpu.memory_space<vmem>>, vector<1x1x32xf32>
    %11 = vector.shape_cast %10 : vector<1x1x32xf32> to vector<1x32xf32>
    %c0_11 = arith.constant 0 : index
    %c0_12 = arith.constant 0 : index
    %12 = vector.load %arg6[%c0_11, %c0_12] : memref<2x32xf32, #tpu.memory_space<vmem>>, vector<2x32xf32>
    %13 = vector.extract_strided_slice %1 {offsets = [0, 0], sizes = [64, 1], strides = [1, 1]} : vector<64x2xf32> to vector<64x1xf32>
    %14 = vector.extract_strided_slice %12 {offsets = [0, 0], sizes = [1, 32], strides = [1, 1]} : vector<2x32xf32> to vector<1x32xf32>
    %15 = vector.broadcast %13 : vector<64x1xf32> to vector<64x32xf32>
    %16 = vector.broadcast %14 : vector<1x32xf32> to vector<64x32xf32>
    %17 = arith.mulf %15, %16 : vector<64x32xf32>
    %c0_13 = arith.constant 0 : index
    %c0_14 = arith.constant 0 : index
    %18 = vector.load %arg7[%c0_13, %c0_14] : memref<1x32xf32, #tpu.memory_space<vmem>>, vector<1x32xf32>
    %19 = vector.broadcast %18 : vector<1x32xf32> to vector<64x32xf32>
    %20 = arith.addf %17, %19 : vector<64x32xf32>
    %21 = vector.extract_strided_slice %1 {offsets = [0, 1], sizes = [64, 1], strides = [1, 1]} : vector<64x2xf32> to vector<64x1xf32>
    %22 = vector.extract_strided_slice %12 {offsets = [1, 0], sizes = [1, 32], strides = [1, 1]} : vector<2x32xf32> to vector<1x32xf32>
    %23 = vector.broadcast %21 : vector<64x1xf32> to vector<64x32xf32>
    %24 = vector.broadcast %22 : vector<1x32xf32> to vector<64x32xf32>
    %25 = arith.mulf %23, %24 : vector<64x32xf32>
    %26 = arith.addf %20, %25 : vector<64x32xf32>
    %27 = vector.broadcast %11 : vector<1x32xf32> to vector<64x32xf32>
    %28 = arith.mulf %27, %26 : vector<64x32xf32>
    %29 = arith.addf %28, %5 : vector<64x32xf32>
    %30 = math.sin %29 : vector<64x32xf32>
    %31 = arith.truncf %30 : vector<64x32xf32> to vector<64x32xbf16>
    %c0_15 = arith.constant 0 : index
    %c0_16 = arith.constant 0 : index
    %c0_17 = arith.constant 0 : index
    %32 = vector.load %arg8[%c0_15, %c0_16, %c0_17] : memref<3x32x32xbf16, #tpu.memory_space<vmem>>, vector<1x32x32xbf16>
    %33 = vector.shape_cast %32 : vector<1x32x32xbf16> to vector<32x32xbf16>
    %cst = arith.constant dense<0.000000e+00> : vector<64x32xf32>
    %34 = tpu.matmul %31, %33, %cst {dimension_numbers = #tpu.dot_dimension_numbers<[1], [0], [0], [1], [0, 0, 1, 1], [], []>} : vector<64x32xbf16>, vector<32x32xbf16>, vector<64x32xf32> -> vector<64x32xf32>
    %c0_18 = arith.constant 0 : index
    %c0_19 = arith.constant 0 : index
    %c0_20 = arith.constant 0 : index
    %35 = vector.load %arg9[%c0_18, %c0_19, %c0_20] : memref<3x1x32xf32, #tpu.memory_space<vmem>>, vector<1x1x32xf32>
    %36 = vector.shape_cast %35 : vector<1x1x32xf32> to vector<1x32xf32>
    %37 = vector.broadcast %36 : vector<1x32xf32> to vector<64x32xf32>
    %38 = arith.addf %34, %37 : vector<64x32xf32>
    %39 = arith.mulf %9, %38 : vector<64x32xf32>
    %40 = arith.addf %39, %5 : vector<64x32xf32>
    %41 = math.sin %40 : vector<64x32xf32>
    %42 = arith.truncf %41 : vector<64x32xf32> to vector<64x32xbf16>
    %c1 = arith.constant 1 : index
    %c0_21 = arith.constant 0 : index
    %c0_22 = arith.constant 0 : index
    %43 = vector.load %arg8[%c1, %c0_21, %c0_22] : memref<3x32x32xbf16, #tpu.memory_space<vmem>>, vector<1x32x32xbf16>
    %44 = vector.shape_cast %43 : vector<1x32x32xbf16> to vector<32x32xbf16>
    %cst_23 = arith.constant dense<0.000000e+00> : vector<64x32xf32>
    %45 = tpu.matmul %42, %44, %cst_23 {dimension_numbers = #tpu.dot_dimension_numbers<[1], [0], [0], [1], [0, 0, 1, 1], [], []>} : vector<64x32xbf16>, vector<32x32xbf16>, vector<64x32xf32> -> vector<64x32xf32>
    %c1_24 = arith.constant 1 : index
    %c0_25 = arith.constant 0 : index
    %c0_26 = arith.constant 0 : index
    %46 = vector.load %arg9[%c1_24, %c0_25, %c0_26] : memref<3x1x32xf32, #tpu.memory_space<vmem>>, vector<1x1x32xf32>
    %47 = vector.shape_cast %46 : vector<1x1x32xf32> to vector<1x32xf32>
    %48 = vector.broadcast %47 : vector<1x32xf32> to vector<64x32xf32>
    %49 = arith.addf %45, %48 : vector<64x32xf32>
    %50 = arith.mulf %9, %49 : vector<64x32xf32>
    %51 = arith.addf %50, %5 : vector<64x32xf32>
    %52 = math.sin %51 : vector<64x32xf32>
    %53 = arith.truncf %52 : vector<64x32xf32> to vector<64x32xbf16>
    %c2 = arith.constant 2 : index
    %c0_27 = arith.constant 0 : index
    %c0_28 = arith.constant 0 : index
    %54 = vector.load %arg8[%c2, %c0_27, %c0_28] : memref<3x32x32xbf16, #tpu.memory_space<vmem>>, vector<1x32x32xbf16>
    %55 = vector.shape_cast %54 : vector<1x32x32xbf16> to vector<32x32xbf16>
    %cst_29 = arith.constant dense<0.000000e+00> : vector<64x32xf32>
    %56 = tpu.matmul %53, %55, %cst_29 {dimension_numbers = #tpu.dot_dimension_numbers<[1], [0], [0], [1], [0, 0, 1, 1], [], []>} : vector<64x32xbf16>, vector<32x32xbf16>, vector<64x32xf32> -> vector<64x32xf32>
    %c2_30 = arith.constant 2 : index
    %c0_31 = arith.constant 0 : index
    %c0_32 = arith.constant 0 : index
    %57 = vector.load %arg9[%c2_30, %c0_31, %c0_32] : memref<3x1x32xf32, #tpu.memory_space<vmem>>, vector<1x1x32xf32>
    %58 = vector.shape_cast %57 : vector<1x1x32xf32> to vector<1x32xf32>
    %59 = vector.broadcast %58 : vector<1x32xf32> to vector<64x32xf32>
    %60 = arith.addf %56, %59 : vector<64x32xf32>
    %61 = arith.mulf %9, %60 : vector<64x32xf32>
    %62 = arith.addf %61, %5 : vector<64x32xf32>
    %63 = math.sin %62 : vector<64x32xf32>
    %64 = arith.truncf %63 : vector<64x32xf32> to vector<64x32xbf16>
    %c0_33 = arith.constant 0 : index
    %c0_34 = arith.constant 0 : index
    %65 = vector.load %arg10[%c0_33, %c0_34] : memref<32x128xbf16, #tpu.memory_space<vmem>>, vector<32x128xbf16>
    %cst_35 = arith.constant dense<0.000000e+00> : vector<64x128xf32>
    %66 = tpu.matmul %64, %65, %cst_35 {dimension_numbers = #tpu.dot_dimension_numbers<[1], [0], [0], [1], [0, 0, 1, 1], [], []>} : vector<64x32xbf16>, vector<32x128xbf16>, vector<64x128xf32> -> vector<64x128xf32>
    %c0_36 = arith.constant 0 : index
    %c0_37 = arith.constant 0 : index
    %67 = vector.load %arg11[%c0_36, %c0_37] : memref<1x128xf32, #tpu.memory_space<vmem>>, vector<1x128xf32>
    %68 = vector.broadcast %67 : vector<1x128xf32> to vector<64x128xf32>
    %69 = arith.addf %66, %68 : vector<64x128xf32>
    %c0_38 = arith.constant 0 : index
    %c0_39 = arith.constant 0 : index
    %c0_40 = arith.constant 0 : index
    %70 = vector.load %arg12[%c0_38, %c0_39, %c0_40] : memref<1x64x128xf32, #tpu.memory_space<vmem>>, vector<1x64x128xf32>
    %71 = vector.shape_cast %70 : vector<1x64x128xf32> to vector<64x128xf32>
    %72 = vector.shape_cast %69 : vector<64x128xf32> to vector<1x64x128xf32>
    tpu.vector_store %arg12[%c0_38, %c0_39, %c0_40], %72 {strides = array<i32>} : memref<1x64x128xf32, #tpu.memory_space<vmem>>, vector<1x64x128xf32>,
    return
  }
  func.func @transform_0(%arg0: i32, %arg1: i32) -> (i32, i32, i32) {
    %c0_i32 = arith.constant 0 : i32
    %c0_i32_0 = arith.constant 0 : i32
    %c0_i32_1 = arith.constant 0 : i32
    return %arg0, %c0_i32, %c0_i32_0 : i32, i32, i32
  }
  func.func @transform_1(%arg0: i32, %arg1: i32) -> (i32, i32, i32) {
    %c0_i32 = arith.constant 0 : i32
    %c0_i32_0 = arith.constant 0 : i32
    %c0_i32_1 = arith.constant 0 : i32
    return %arg0, %c0_i32, %c0_i32_0 : i32, i32, i32
  }
  func.func @transform_2(%arg0: i32, %arg1: i32) -> (i32, i32, i32) {
    %c0_i32 = arith.constant 0 : i32
    %c0_i32_0 = arith.constant 0 : i32
    %c0_i32_1 = arith.constant 0 : i32
    return %arg0, %c0_i32, %c0_i32_0 : i32, i32, i32
  }
  func.func @transform_3(%arg0: i32, %arg1: i32) -> (i32, i32, i32) {
    %c0_i32 = arith.constant 0 : i32
    %c0_i32_0 = arith.constant 0 : i32
    return %arg0, %arg1, %c0_i32 : i32, i32, i32
  }
  func.func @transform_4(%arg0: i32, %arg1: i32) -> (i32, i32) {
    %c0_i32 = arith.constant 0 : i32
    %c0_i32_0 = arith.constant 0 : i32
    %c0_i32_1 = arith.constant 0 : i32
    return %c0_i32, %c0_i32_0 : i32, i32
  }
  func.func @transform_5(%arg0: i32, %arg1: i32) -> (i32, i32) {
    %c0_i32 = arith.constant 0 : i32
    %c0_i32_0 = arith.constant 0 : i32
    %c0_i32_1 = arith.constant 0 : i32
    return %c0_i32, %c0_i32_0 : i32, i32
  }
  func.func @transform_6(%arg0: i32, %arg1: i32) -> (i32, i32, i32) {
    %c0_i32 = arith.constant 0 : i32
    %c0_i32_0 = arith.constant 0 : i32
    %c0_i32_1 = arith.constant 0 : i32
    %c0_i32_2 = arith.constant 0 : i32
    return %c0_i32, %c0_i32_0, %c0_i32_1 : i32, i32, i32
  }
  func.func @transform_7(%arg0: i32, %arg1: i32) -> (i32, i32, i32) {
    %c0_i32 = arith.constant 0 : i32
    %c0_i32_0 = arith.constant 0 : i32
    %c0_i32_1 = arith.constant 0 : i32
    %c0_i32_2 = arith.constant 0 : i32
    return %c0_i32, %c0_i32_0, %c0_i32_1 : i32, i32, i32
  }
  func.func @transform_8(%arg0: i32, %arg1: i32) -> (i32, i32) {
    %c0_i32 = arith.constant 0 : i32
    %c0_i32_0 = arith.constant 0 : i32
    %c0_i32_1 = arith.constant 0 : i32
    return %c0_i32, %c0_i32_0 : i32, i32
  }
  func.func @transform_9(%arg0: i32, %arg1: i32) -> (i32, i32) {
    %c0_i32 = arith.constant 0 : i32
    %c0_i32_0 = arith.constant 0 : i32
    %c0_i32_1 = arith.constant 0 : i32
    return %c0_i32, %c0_i32_0 : i32, i32
  }
  func.func @transform_10(%arg0: i32, %arg1: i32) -> (i32, i32, i32) {
    %c0_i32 = arith.constant 0 : i32
    %c0_i32_0 = arith.constant 0 : i32
    return %arg0, %arg1, %c0_i32 : i32, i32, i32
  }
}

</mosaic_0001>

<bundles_post_ra>
// kernel: tpu_custom_call.1
= control target key start
LH: loop header
LB: loop body
LE: loop exit
PB: predicated region body
PF: predicated region fallthrough
CT: control target
= control target key end

     0   :  { %15 = vsyncpa [#allocation3], 0  ;;  %s8504_s0 = inlined_call_operand.vmem [shape: f32[2,1,32], index: 0, kind: input, shape index: {}]   ;;  %s8505_s1 = inlined_call_operand.vmem [shape: f32[2,1,32], index: 1, kind: input, shape index: {}]   ;;  %s8506_s2 = inlined_call_operand.vmem [shape: f32[2,1,32], index: 2, kind: input, shape index: {}]   ;;  %s8507_s3 = inlined_call_operand.vmem [shape: f32[2,64,2], index: 3, kind: input, shape index: {}]   ;;  %s8508_s4 = inlined_call_operand.vmem [shape: f32[2,32], index: 4, kind: input, shape index: {}]   ;;  %s8509_s5 = inlined_call_operand.vmem [shape: f32[1,32], index: 5, kind: input, shape index: {}]   ;;  %s8510_s6 = inlined_call_operand.vmem [shape: bf16[3,32,32], index: 6, kind: input, shape index: {}]   ;;  %s8511_s7 = inlined_call_operand.vmem [shape: f32[3,1,32], index: 7, kind: input, shape index: {}]   ;;  %s8512_s8 = inlined_call_operand.vmem [shape: bf16[32,128], index: 8, kind: input, shape index: {}]   ;;  %s8513_s9 = inlined_call_operand.vmem [shape: f32[1,128], index: 9, kind: input, shape index: {}]   ;;  %s8514_s10 = inlined_call_operand.hbm [shape: f32[2,64,128], index: 10, kind: output, shape index: {}]  }
   0x1   :  { %17 = vsyncpa [#allocation3 + $0x1], 0  ;;  %s5268_s13 = smov 0   ;;  %s5270_s14 = smov 0  }
   0x2   :  { %s5272_s15 = smov 0   ;;  %s5274_s16 = smov 0  }
   0x3   :  { %s5276_s17 = smov 0   ;;  %s5278_s18 = smov 0  }
   0x4 LB: > { %s4524_s19 = sadd.s32 4294967295, %s5200_s18   ;;  %s4525_s20 = sadd.s32 4294967294, %s5200_s18   ;;  %s5200_s18 = sphi %s5278_s18, %s23_s18   ;;  %s5196_s17 = sphi %s5276_s17, %s8666_s17   ;;  %s5192_s16 = sphi %s5274_s16, %s8665_s16   ;;  %s5188_s15 = sphi %s5272_s15, %s8664_s15   ;;  %s5184_s14 = sphi %s5270_s14, %s8663_s14   ;;  %s5180_s13 = sphi %s5268_s13, %s8662_s13  }
   0x5   : > { %s35_s21 = sadd.s32 1, %s5196_s17  ;;  %s276_s22 = sadd.s32 1, %s5188_s15 }
   0x6   : > { %p37_p0 = scmp.ge.s32.totalorder %s35_s21, 2  ;;  %p286_p1 = scmp.ne.s32.totalorder %s5188_s15, %s5184_s14 }
   0x7   : > { %p287_p2 = scmp.eq.s32.totalorder %s4524_s19, 1  ;;  %p292_p3 = scmp.ne.s32.totalorder %s5184_s14, %s5180_s13 }
   0x8   : > { %s8668_s21 = smov (%p37_p0, %s35_s21), 0  ;;  %p293_p5 = scmp.eq.s32.totalorder %s4525_s20, 1 }
   0x9   : > { %p5308_p4 = por %p287_p2, %p286_p1  ;;  %s271_s24 = ssub.s32 %s5196_s17, %s8668_s21 }
   0xa   : > { %p4528_p6 = scmp.ge.s32.totalorder %s5200_s18, 1  ;;  %p274_p7 = scmp.eq.s32.totalorder %s271_s24, 0 }
   0xb   : > { %p5315_p8 = por %p293_p5, %p292_p3  ;;  %p360_p9 = scmp.lt.s32.totalorder %s5200_s18, 3 }
   0xc   : > { %s5321_s26 = scalar_select %p274_p7, %s5188_s15, %s276_s22  }
   0xd   : > { %p361_p10 = pnand %p4528_p6, %p360_p9 }
   0xf   : > { %364 = sbr.rel (%p361_p10) target bundleno = 1878 (0x756), region = 60 }
  0x16   : > { %p411_p11 = scmp.lt.s32.totalorder %s5192_s16, 1  ;;  %v5202_v0 = vmov 0   ;;  %v5203_v6 = vmov 1   ;;  %v496_v10 = vlaneseq  ;;  %v455_v15 = vld [vmem:[%s8508_s4] sm:$0x3]  ;;  %s4708_s24 = sshll.u32 %s5192_s16, 10 }
  0x17   : > { %4975 = vset.pattern.permute.xlu1 %v5202_v0  ;;  %4974 = vset.pattern.permute.xlu0 %v5202_v0  ;;  %v5342_v23 = vld [vmem:[%s8509_s5] ss:$0 sm:$0xff] }
  0x18   : > { %s5325_s27 = scalar_select %p411_p11, %s5192_s16, 1  ;;  %v497_v11 = vshrl.u32 %v496_v10, 7  ;;  %v8521_v10 = vmov 2475754826  }
  0x1a   : > { %s4707_s28 = sshll.u32 %s5325_s27, 6  ;;  %v498_v14 = vsub.s32 0, %v497_v11  ;;  %v557_v19 = vsub.s32 1, %v497_v11  ;;  %s413_s29 = scalar_lea.vmem %s8504_s0, %s5325_s27 }
  0x1b   : > { %s428_s11 = scalar_lea.vmem %s8507_s3, %s4707_s28  ;;  %s5357_s12 = scalar_lea.vmem %s8506_s2, %s5325_s27  ;;  %v5359_v31 = vld [vmem:[%s413_s29] ss:$0 sm:$0xff] }
  0x1c   : > { %v434_v1 = vld [vmem:[%s428_s11 + $0x10] sm:$0xff]  ;;  %v432_v2 = vld [vmem:[%s428_s11] sm:$0xff]  ;;  %v435_v3 = vld [vmem:[%s428_s11 + $0x18] sm:$0xff]  ;;  %v5334_v18 = vrot.slane %v455_v15, %v498_v14  ;;  %v5344_v24 = vrot.slane %v455_v15, %v557_v19  ;;  %v8528_v14 = vmov 2102212464   ;;  %s6218_s30 = scalar_lea.vmem %s8505_s1, %s5325_s27  ;;  %s8452_s29 = scalar_lea.hbm %s8514_s10, %s4708_s24 }
  0x1d   : > { %468 = vperm.xlu1 %4975, %v434_v1   ;;  %458 = vperm.xlu0 %4974, %v432_v2   ;;  %v433_v4 = vld [vmem:[%s428_s11 + $0x8] sm:$0xff]  ;;  %v436_v7 = vld [vmem:[%s428_s11 + $0x20] sm:$0xff]  ;;  %v438_v8 = vld [vmem:[%s428_s11 + $0x30] sm:$0xff]  ;;  %s5210_s27 = smov [#allocation2]  }
  0x1e   : > { %v437_v5 = vld [vmem:[%s428_s11 + $0x28] sm:$0xff]  ;;  %v439_v9 = vld [vmem:[%s428_s11 + $0x38] sm:$0xff]  ;;  %v5365_v36 = vld [vmem:[%s5357_s12] ss:$0 sm:$0xff]  ;;  %s408_s11 = sand.u32 1, %s5184_s14   ;;  %s5126_s20 = sshll.u32 %s5210_s27, 4  ;;  %s5127_s20 = int_to_ptr.vmem [resolvable:$false] %s5126_s20 }
  0x1f   : > { %s4529_s19 = sshll.u32 %s408_s11, 6  ;;  %s8458_s16 = scalar_lea.sflag [#allocation3], %s408_s11 }
  0x20   : > { %s410_s22 = scalar_lea.vmem [#allocation2], %s4529_s19  ;;  %s5128_s24 = scalar_lea.vmem %s5127_s20, 2048 }
  0x21   : > { %473 = vperm.xlu1 %4975, %v435_v3   ;;  %463 = vperm.xlu0 %4974, %v433_v4  }
  0x25   : > { %4976 = vset.pattern.permute.xlu1 %v5203_v6  ;;  %483 = vperm.xlu0 %4974, %v437_v5  }
  0x26   : > { %528 = vperm.xlu1 %4976, %v433_v4  }
  0x29   : > { %4978 = vset.pattern.permute.xlu0 %v5203_v6 }
  0x2a   : > { %532 = vperm.xlu1 %4976, %v434_v1   ;;  %524 = vperm.xlu0 %4978, %v432_v2  }
  0x2e   : > { %4977 = vset.pattern.permute.xlu1 %v5202_v0  ;;  %536 = vperm.xlu0 %4978, %v435_v3  }
  0x2f   : > { %478 = vperm.xlu1 %4977, %v436_v7  }
  0x32   : > { %540 = vperm.xlu0 %4978, %v436_v7  }
  0x33   : > { %488 = vperm.xlu1 %4977, %v438_v8  }
  0x36   : > { %552 = vperm.xlu0 %4978, %v439_v9  }
  0x37   : > { %493 = vperm.xlu1 %4977, %v439_v9  }
  0x3b   : > { %4979 = vset.pattern.permute.xlu1 %v5203_v6 }
  0x3c   : > { %544 = vperm.xlu1 %4979, %v437_v5  }
  0x40   : > { %548 = vperm.xlu1 %4979, %v438_v8   ;;  %v8535_v8 = vmov 683565275  }
  0x9c   : > { %v469_v12 = vpop.permute.xlu1 %468  ;;  %v459_v13 = vpop.permute.xlu0 %458 }
  0x9d   : > { %v502_v22 = vmul.f32 %v5334_v18, %v469_v12  ;;  %v500_v40 = vmul.f32 %v5334_v18, %v459_v13  ;;  %v8523_v12 = vmov 2131351028  }
  0x9f   : > { %v517_v27 = vadd.f32 %v5342_v23, %v502_v22  ;;  %v515_v47 = vadd.f32 %v5342_v23, %v500_v40 }
  0xa0   : > { %v474_v16 = vpop.permute.xlu1 %473  ;;  %v464_v17 = vpop.permute.xlu0 %463 }
  0xa1   : > { %v503_v28 = vmul.f32 %v5334_v18, %v474_v16  ;;  %v501_v54 = vmul.f32 %v5334_v18, %v464_v17 }
  0xa3   : > { %v518_v33 = vadd.f32 %v5342_v23, %v503_v28  ;;  %v516_v62 = vadd.f32 %v5342_v23, %v501_v54 }
  0xa4   : > { %v5336_v20 = vpop.permute.xlu0 %483 }
  0xa5   : > { %v529_v21 = vpop.permute.xlu1 %528 }
  0xa6   : > { %v560_v0 = vmul.f32 %v5344_v24, %v529_v21  ;;  %v8543_v21 = vmov 920167782  }
  0xa9   : > { %v533_v25 = vpop.permute.xlu1 %532  ;;  %v525_v26 = vpop.permute.xlu0 %524 }
  0xaa   : > { %v561_v29 = vmul.f32 %v5344_v24, %v533_v25  ;;  %v559_v48 = vmul.f32 %v5344_v24, %v525_v26 }
  0xac   : > { %v569_v30 = vadd.f32 %v561_v29, %v517_v27  ;;  %v567_v56 = vadd.f32 %v559_v48, %v515_v47  ;;  %v8525_v27 = vmov 1326507024   ;;  %v4980_v29 = vld [vmem:[%s8510_s6] sm:$0xff]  }
  0xad   : > { %v537_v32 = vpop.permute.xlu0 %536  ;;  %4733 = vmatprep.subr.bf16.mxu0 %v4980_v29 }
  0xae   : > { %v583_v34 = vmul.f32 %v5359_v31, %v569_v30  ;;  %v562_v35 = vmul.f32 %v5344_v24, %v537_v32  ;;  %v479_v37 = vpop.permute.xlu1 %478  ;;  %v581_v2 = vmul.f32 %v5359_v31, %v567_v56  ;;  %4734 = vmatpush3.bf16.msra.mxu0 %v4980_v29 }
  0xaf   : > { %v504_v43 = vmul.f32 %v5334_v18, %v479_v37 }
  0xb0   : > { %v5368_v38 = vadd.f32 %v5365_v36, %v583_v34  ;;  %v570_v39 = vadd.f32 %v562_v35, %v518_v33 }
  0xb1   : > { %v541_v45 = vpop.permute.xlu0 %540  ;;  %v519_v52 = vadd.f32 %v5342_v23, %v504_v43 }
  0xb2   : > { %v8519_v41 = vand.u32 2147483647, %v5368_v38  ;;  %v808_v42 = vand.u32 2139095040, %v5368_v38  ;;  %v584_v44 = vmul.f32 %v5359_v31, %v570_v39  ;;  %v563_v53 = vmul.f32 %v5344_v24, %v541_v45 }
  0xb4   : > { %v809_v46 = vshrl.u32 %v808_v42, 23  ;;  %v5378_v49 = vadd.f32 %v5365_v36, %v584_v44  ;;  %v812_v51 = vand.u32 8388607, %v8519_v41  ;;  %v571_v59 = vadd.f32 %v563_v53, %v519_v52  ;;  %v4981_v44 = vld [vmem:[%s8510_s6 + $0x8] sm:$0xff]  }
  0xb5   : > { %4735 = vmatprep.subr.bf16.mxu0 %v4981_v44 }
  0xb6   : > { %v4544_v50 = vadd.s32 4294967169, %v809_v46  ;;  %v912_v57 = vand.u32 2139095040, %v5378_v49  ;;  %v813_v58 = vor.u32 8388608, %v812_v51  ;;  %v8517_v3 = vand.u32 2147483647, %v5378_v49  ;;  %4736 = vmatpush3.bf16.msra.mxu0 %v4981_v44 }
  0xb7   : > { %v585_v7 = vmul.f32 %v5359_v31, %v571_v59 }
  0xb8   : > { %v815_v55 = vadd.s32 1, %v4544_v50  ;;  %v913_v61 = vshrl.u32 %v912_v57, 23  ;;  %v5390_v5 = vshll.u32 %v813_v58, 8 }
  0xba   : > { %vm816_vm0 = vcmp.gt.s32.totalorder %v815_v55, 0  ;;  %v4548_v6 = vadd.s32 4294967169, %v913_v61  ;;  %v568_v61 = vadd.f32 %v560_v0, %v516_v62 }
  0xbb   : > { %v817_v60 = vsel %vm816_vm0, %v815_v55, 0  ;;  %v5414_v55 = vadd.f32 %v5365_v36, %v585_v7 }
  0xbc   : > { %v819_v63 = vand.u32 31, %v817_v60  ;;  %v818_v1 = vshrl.u32 %v817_v60, 5  ;;  %v919_v37 = vadd.s32 1, %v4548_v6 }
  0xbe   : > { %v820_v4 = vsub.s32 32, %v819_v63  ;;  %v822_v9 = vshll.u32 %v8535_v8, %v819_v63  ;;  %v825_v11 = vshll.u32 %v8521_v10, %v819_v63  ;;  %v828_v13 = vshll.u32 %v8523_v12, %v819_v63 }
  0xbf   : > { %v831_v15 = vshll.u32 %v8528_v14, %v819_v63  ;;  %v834_v22 = vshll.u32 %v8543_v21, %v819_v63  ;;  %vm837_vm1 = vcmp.lt.s32.totalorder %v818_v1, 1  ;;  %vm839_vm2 = vcmp.lt.s32.totalorder %v818_v1, 3 }
  0xc0   : > { %v823_v16 = vshrl.u32 %v8521_v10, %v820_v4  ;;  %v826_v17 = vshrl.u32 %v8523_v12, %v820_v4  ;;  %v829_v19 = vshrl.u32 %v8528_v14, %v820_v4  ;;  %v821_v25 = vshrl.u32 %v8535_v8, %v820_v4 }
  0xc1   : > { %v832_v26 = vshrl.u32 %v8543_v21, %v820_v4  ;;  %v835_v28 = vshrl.u32 %v8525_v27, %v820_v4  ;;  %vm840_vm3 = vcmp.lt.s32.totalorder %v818_v1, 4  ;;  %vm920_vm4 = vcmp.gt.s32.totalorder %v919_v37, 0 }
  0xc2   : > { %v824_v30 = vor.u32 %v823_v16, %v822_v9  ;;  %v827_v32 = vor.u32 %v826_v17, %v825_v11  ;;  %v830_v33 = vor.u32 %v829_v19, %v828_v13  ;;  %vm838_vm5 = vcmp.lt.s32.totalorder %v818_v1, 2 }
  0xc3   : > { %v833_v34 = vor.u32 %v832_v26, %v831_v15  ;;  %v836_v35 = vor.u32 %v835_v28, %v834_v22  ;;  %v921_v51 = vsel %vm920_vm4, %v919_v37, 0  ;;  %v5427_v1 = vadd.f32 %v5365_v36, %v581_v2 }
  0xc4   : > { %v841_v39 = vsel %vm837_vm1, %v821_v25, %v824_v30  ;;  %v842_v40 = vsel %vm840_vm3, %v830_v33, 2102212464  ;;  %v845_v42 = vsel %vm837_vm1, %v824_v30, %v827_v32  ;;  %v849_v43 = vsel %vm837_vm1, %v827_v32, %v830_v33 }
  0xc5   : > { %v843_v45 = vsel %vm839_vm2, %v827_v32, %v842_v40  ;;  %v846_v46 = vsel %vm840_vm3, %v833_v34, 920167782  ;;  %v850_v47 = vsel %vm840_vm3, %v836_v35, 1326507024  ;;  %v923_v60 = vand.u32 31, %v921_v51 }
  0xc6   : > { %v847_v48 = vsel %vm839_vm2, %v830_v33, %v846_v46  ;;  %v851_v50 = vsel %vm839_vm2, %v833_v34, %v850_v47  ;;  %v844_v52 = vsel %vm838_vm5, %v841_v39, %v843_v45  ;;  %v916_v4 = vand.u32 8388607, %v8517_v3 }
  0xc7   : > { %v848_v53 = vsel %vm838_vm5, %v845_v42, %v847_v48  ;;  %v852_v54 = vsel %vm838_vm5, %v849_v43, %v851_v50  ;;  %v860_v63 = vmul.u32 %v5390_v5, %v844_v52  ;;  %v5431_v6 = vshrl.u32 %v921_v51, 5 }
  0xc8   : > { %v5417_v56 = vmul.u32.u64.low %v5390_v5, %v852_v54  ;;  %v5418_v57 = vmul.u32.u64.high %v5390_v5, %v852_v54, %v5417_v56  ;;  %v5421_v58 = vmul.u32.u64.low %v5390_v5, %v848_v53  ;;  %v5422_v59 = vmul.u32.u64.high %v5390_v5, %v848_v53, %v5421_v58  ;;  %v5472_v53 = vpop.permute.xlu1 %488 }
  0xc9   : > { %v924_v7 = vsub.s32 32, %v923_v60  ;;  %v926_v9 = vshll.u32 %v8535_v8, %v923_v60  ;;  %v1016_v11 = vand.u32 2139095040, %v5414_v55  ;;  %v929_v0 = vshll.u32 %v8521_v10, %v923_v60 }
  0xca   : > { %vm862_vm6 = vc.u32 %v5418_v57, %v5421_v58  ;;  %v863_v62 = vadd.s32 1, %v5422_v59  ;;  %v932_v2 = vshll.u32 %v8523_v12, %v923_v60  ;;  %v935_v16 = vshll.u32 %v8528_v14, %v923_v60 }
  0xcb   : > { %v927_v5 = vshrl.u32 %v8521_v10, %v924_v7  ;;  %v930_v13 = vshrl.u32 %v8523_v12, %v924_v7  ;;  %v933_v15 = vshrl.u32 %v8528_v14, %v924_v7  ;;  %v936_v19 = vshrl.u32 %v8543_v21, %v924_v7 }
  0xcc   : > { %v864_v17 = vsel %vm862_vm6, %v863_v62, %v5422_v59  ;;  %v938_v22 = vshll.u32 %v8543_v21, %v923_v60  ;;  %v939_v25 = vshrl.u32 %v8525_v27, %v924_v7  ;;  %v917_v32 = vor.u32 8388608, %v916_v4 }
  0xcd   : > { %v865_v26 = vadd.s32 %v864_v17, %v860_v63  ;;  %v928_v28 = vor.u32 %v927_v5, %v926_v9  ;;  %v931_v29 = vor.u32 %v930_v13, %v929_v0  ;;  %v934_v30 = vor.u32 %v933_v15, %v932_v2  ;;  %v494_v17 = vpop.permute.xlu1 %493 }
  0xce   : > { %v937_v33 = vor.u32 %v936_v19, %v935_v16  ;;  %v940_v34 = vor.u32 %v939_v25, %v938_v22  ;;  %v1017_v35 = vshrl.u32 %v1016_v11, 23  ;;  %vm941_vm7 = vcmp.lt.s32.totalorder %v5431_v6, 1 }
  0xcf   : > { %v866_v37 = vadd.s32 536870912, %v865_v26  ;;  %vm942_vm8 = vcmp.lt.s32.totalorder %v5431_v6, 2  ;;  %vm944_vm9 = vcmp.lt.s32.totalorder %v5431_v6, 4  ;;  %vm943_vm10 = vcmp.lt.s32.totalorder %v5431_v6, 3 }
  0xd0   : > { %v950_v39 = vsel %vm944_vm9, %v937_v33, 920167782  ;;  %v953_v40 = vsel %vm941_vm7, %v931_v29, %v934_v30  ;;  %v954_v42 = vsel %vm944_vm9, %v940_v34, 1326507024  ;;  %v949_v44 = vsel %vm941_vm7, %v928_v28, %v931_v29 }
  0xd1   : > { %v5458_v43 = vshrl.u32 %v866_v37, 30  ;;  %v951_v45 = vsel %vm943_vm10, %v934_v30, %v950_v39  ;;  %v955_v46 = vsel %vm943_vm10, %v937_v33, %v954_v42  ;;  %v600_v47 = vand.u32 2139095040, %v5427_v1 }
  0xd2   : > { %v956_v48 = vsel %vm942_vm8, %v953_v40, %v955_v46  ;;  %v4552_v50 = vadd.s32 4294967169, %v1017_v35  ;;  %v5470_v52 = vshll.u32 %v917_v32, 8  ;;  %v952_v54 = vsel %vm942_vm8, %v949_v44, %v951_v45 }
  0xd3   : > { %v868_v51 = vshll.u32 %v5458_v43, 30  ;;  %v8516_v56 = vand.u32 2147483647, %v5414_v55  ;;  %v582_v60 = vmul.f32 %v5359_v31, %v568_v61  ;;  %v601_v9 = vshrl.u32 %v600_v47, 23  ;;  %v545_v47 = vpop.permute.xlu1 %544 }
  0xd4   : > { %v1023_v59 = vadd.s32 1, %v4552_v50  ;;  %v5479_v63 = vmul.u32.u64.low %v5470_v52, %v956_v48  ;;  %v5480_v4 = vmul.u32.u64.high %v5470_v52, %v956_v48, %v5479_v63  ;;  %v925_v11 = vshrl.u32 %v8535_v8, %v924_v7 }
  0xd5   : > { %v946_v62 = vsel %vm944_vm9, %v934_v30, 2102212464  ;;  %v5485_v0 = vsub.s32 %v865_v26, %v868_v51  ;;  %v5488_v2 = vmul.u32.u64.low %v5470_v52, %v952_v54  ;;  %v5489_v5 = vmul.u32.u64.high %v5470_v52, %v952_v54, %v5488_v2 }
  0xd6   : > { %vm1024_vm11 = vcmp.gt.s32.totalorder %v1023_v59, 0  ;;  %v1020_v61 = vand.u32 8388607, %v8516_v56  ;;  %v945_v16 = vsel %vm941_vm7, %v925_v11, %v928_v28  ;;  %v947_v7 = vsel %vm943_vm10, %v931_v29, %v946_v62 }
  0xd7   : > { %v1025_v13 = vsel %vm1024_vm11, %v1023_v59, 0  ;;  %v5499_v22 = vadd.f32 %v5365_v36, %v582_v60  ;;  %v505_v25 = vmul.f32 %v5334_v18, %v5336_v20  ;;  %v871_v26 = vsub.s32 0, %v5485_v0 }
  0xd8   : > { %v1027_v15 = vand.u32 31, %v1025_v13  ;;  %v4536_v30 = vadd.s32 4294967169, %v601_v9  ;;  %v948_v32 = vsel %vm942_vm8, %v945_v16, %v947_v7  ;;  %v1021_v33 = vor.u32 8388608, %v1020_v61 }
  0xd9   : > { %vm966_vm12 = vc.u32 %v5480_v4, %v5488_v2  ;;  %v4545_v42 = vmin.u32 %v871_v26, %v5485_v0  ;;  %v967_v44 = vadd.s32 1, %v5489_v5  ;;  %v1026_v45 = vshrl.u32 %v1025_v13, 5 }
  0xda   : > { %v1028_v19 = vsub.s32 32, %v1027_v15  ;;  %v1030_v29 = vshll.u32 %v8535_v8, %v1027_v15  ;;  %v1033_v37 = vshll.u32 %v8521_v10, %v1027_v15  ;;  %v1039_v39 = vshll.u32 %v8528_v14, %v1027_v15 }
  0xdb   : > { %v1042_v6 = vshll.u32 %v8543_v21, %v1027_v15  ;;  %v1036_v46 = vshll.u32 %v8523_v12, %v1027_v15  ;;  %v520_v59 = vadd.f32 %v5342_v23, %v505_v25  ;;  %v704_v63 = vand.u32 2139095040, %v5499_v22 }
  0xdc   : > { %v1031_v28 = vshrl.u32 %v8521_v10, %v1028_v19  ;;  %v1034_v34 = vshrl.u32 %v8523_v12, %v1028_v19  ;;  %v1037_v35 = vshrl.u32 %v8528_v14, %v1028_v19  ;;  %v1040_v20 = vshrl.u32 %v8543_v21, %v1028_v19 }
  0xdd   : > { %v1043_v40 = vshrl.u32 %v8525_v27, %v1028_v19  ;;  %v607_v9 = vadd.s32 1, %v4536_v30  ;;  %v964_v11 = vmul.u32 %v5470_v52, %v948_v32  ;;  %v564_v62 = vmul.f32 %v5344_v24, %v545_v47 }
  0xde   : > { %v1032_v48 = vor.u32 %v1031_v28, %v1030_v29  ;;  %v1035_v50 = vor.u32 %v1034_v34, %v1033_v37  ;;  %v1041_v51 = vor.u32 %v1040_v20, %v1039_v39  ;;  %v1038_v60 = vor.u32 %v1037_v35, %v1036_v46 }
  0xdf   : > { %v1044_v54 = vor.u32 %v1043_v40, %v1042_v6  ;;  %v968_v13 = vsel %vm966_vm12, %v967_v44, %v5489_v5  ;;  %vm1045_vm13 = vcmp.lt.s32.totalorder %v1026_v45, 1  ;;  %vm1048_vm14 = vcmp.lt.s32.totalorder %v1026_v45, 4  ;;  %v549_v44 = vpop.permute.xlu1 %548 }
  0xe0   : > { %v1061_v61 = vshll.u32 %v1021_v33, 8  ;;  %v873_v15 = vclz %v4545_v42  ;;  %v1053_v16 = vsel %vm1045_vm13, %v1032_v48, %v1035_v50  ;;  %v1054_v7 = vsel %vm1048_vm14, %v1041_v51, 920167782 }
  0xe1   : > { %v1058_v25 = vsel %vm1048_vm14, %v1044_v54, 1326507024  ;;  %v1029_v26 = vshrl.u32 %v8535_v8, %v1028_v19  ;;  %vm1047_vm15 = vcmp.lt.s32.totalorder %v1026_v45, 3  ;;  %v1050_v30 = vsel %vm1048_vm14, %v1038_v60, 2102212464 }
  0xe2   : > { %v1057_v52 = vsel %vm1045_vm13, %v1035_v50, %v1038_v60  ;;  %vm1046_vm0 = vcmp.lt.s32.totalorder %v1026_v45, 2  ;;  %v1055_v32 = vsel %vm1047_vm15, %v1038_v60, %v1054_v7  ;;  %v1059_v28 = vsel %vm1047_vm15, %v1041_v51, %v1058_v25 }
  0xe3   : > { %v572_v34 = vadd.f32 %v564_v62, %v520_v59  ;;  %v969_v29 = vadd.s32 %v968_v13, %v964_v11  ;;  %v1049_v5 = vsel %vm1045_vm13, %v1029_v26, %v1032_v48  ;;  %v1056_v33 = vsel %vm1046_vm0, %v1053_v16, %v1055_v32  ;;  %v553_v48 = vpop.permute.xlu0 %552 }
  0xe4   : > { %v507_v35 = vmul.f32 %v5334_v18, %v494_v17  ;;  %v1051_v20 = vsel %vm1047_vm15, %v1035_v50, %v1050_v30  ;;  %v1060_v37 = vsel %vm1046_vm0, %v1057_v52, %v1059_v28  ;;  %v4546_v6 = vadd.s32 4294967294, %v873_v15 }
  0xe5   : > { %v5535_v39 = vmul.u32.u64.low %v1061_v61, %v1056_v33  ;;  %v5536_v19 = vmul.u32.u64.high %v1061_v61, %v1056_v33, %v5535_v39  ;;  %v5539_v40 = vmul.u32.u64.low %v1061_v61, %v1060_v37  ;;  %v5540_v42 = vmul.u32.u64.high %v1061_v61, %v1060_v37, %v5539_v40 }
  0xe6   : > { %v705_v46 = vshrl.u32 %v704_v63, 23  ;;  %v506_v47 = vmul.f32 %v5334_v18, %v5472_v53  ;;  %v586_v51 = vmul.f32 %v5359_v31, %v572_v34  ;;  %v970_v17 = vadd.s32 536870912, %v969_v29 }
  0xe7   : > { %v1052_v50 = vsel %vm1046_vm0, %v1049_v5, %v1051_v20  ;;  %v522_v54 = vadd.f32 %v5342_v23, %v507_v35  ;;  %vm608_vm1 = vcmp.gt.s32.totalorder %v607_v9, 0  ;;  %v1071_v59 = vadd.s32 1, %v5536_v19 }
  0xe8   : > { %v5549_v60 = vadd.f32 %v5365_v36, %v586_v51  ;;  %v565_v11 = vmul.f32 %v5344_v24, %v549_v44  ;;  %vm4547_vm2 = vcmp.lt.s32.totalorder %v4546_v6, 0  ;;  %vm1070_vm3 = vc.u32 %v5540_v42, %v5535_v39 }
  0xe9   : > { %v566_v18 = vmul.f32 %v5344_v24, %v553_v48  ;;  %v4540_v53 = vadd.s32 4294967169, %v705_v46  ;;  %v1068_v63 = vmul.u32 %v1061_v61, %v1052_v50  ;;  %v1072_v45 = vsel %vm1070_vm3, %v1071_v59, %v5536_v19 }
  0xea   : > { %v521_v62 = vadd.f32 %v5342_v23, %v506_v47  ;;  %v609_v13 = vsel %vm608_vm1, %v607_v9, 0  ;;  %v5557_v15 = vshrl.u32 %v970_v17, 30  ;;  %v876_v7 = vsel %vm4547_vm2, 0, %v4546_v6 }
  0xeb   : > { %v574_v16 = vadd.f32 %v566_v18, %v522_v54  ;;  %v1073_v25 = vadd.s32 %v1072_v45, %v1068_v63  ;;  %v1120_v26 = vand.u32 2139095040, %v5549_v60  ;;  %v711_v52 = vadd.s32 1, %v4540_v53 }
  0xec   : > { %v573_v30 = vadd.f32 %v565_v11, %v521_v62  ;;  %v5560_v32 = vand.u32 31, %v609_v13  ;;  %v877_v24 = vsub.s32 32, %v876_v7  ;;  %v881_v34 = vsub.s32 4294967266, %v876_v7 }
  0xed   : > { %v1121_v28 = vshrl.u32 %v1120_v26, 23  ;;  %v972_v61 = vshll.u32 %v5557_v15, 30  ;;  %v588_v5 = vmul.f32 %v5359_v31, %v574_v16  ;;  %v1074_v23 = vadd.s32 536870912, %v1073_v25 }
  0xee   : > { %v8515_v9 = vand.u32 2147483647, %v5549_v60  ;;  %v587_v35 = vmul.f32 %v5359_v31, %v573_v30  ;;  %v861_v20 = vadd.s32 %v5421_v58, %v5418_v57  ;;  %vm712_vm4 = vcmp.gt.s32.totalorder %v711_v52, 0 }
  0xef   : > { %v4556_v33 = vadd.s32 4294967169, %v1121_v28  ;;  %v5569_v37 = vsub.s32 32, %v5560_v32  ;;  %v8520_v6 = vand.u32 2147483647, %v5427_v1  ;;  %v882_v44 = vadd.s32 127, %v881_v34 }
  0xf0   : > { %v879_v40 = vshrl.u32 %v861_v20, %v877_v24  ;;  %v5572_v46 = vsub.s32 %v969_v29, %v972_v61  ;;  %v5575_v47 = vadd.f32 %v5365_v36, %v588_v5  ;;  %v5577_v48 = vshrl.u32 %v1074_v23, 30 }
  0xf1   : > { %v1127_v19 = vadd.s32 1, %v4556_v33  ;;  %v1124_v31 = vand.u32 8388607, %v8515_v9  ;;  %v5582_v57 = vadd.f32 %v5365_v36, %v587_v35  ;;  %v5584_v58 = vsel %vm712_vm4, %v711_v52, 0 }
  0xf2   : > { %v878_v51 = vshll.u32 %v5485_v0, %v876_v7  ;;  %v5587_v50 = vshrl.u32 %v609_v13, 5  ;;  %v5591_v54 = vand.u32 8388607, %v8520_v6  ;;  %v5595_v59 = vshrl.u32 %v8535_v8, %v5569_v37 }
  0xf3   : > { %vm1128_vm5 = vcmp.gt.s32.totalorder %v1127_v19, 0  ;;  %v883_v36 = vshll.u32 %v882_v44, 23  ;;  %v975_v18 = vsub.s32 0, %v5572_v46  ;;  %v1328_v53 = vand.u32 2139095040, %v5575_v47 }
  0xf4   : > { %v1129_v17 = vsel %vm1128_vm5, %v1127_v19, 0  ;;  %v5597_v11 = vor.u32 %v879_v40, %v878_v51  ;;  %v1076_v0 = vshll.u32 %v5577_v48, 30  ;;  %v1125_v63 = vor.u32 8388608, %v1124_v31 }
  0xf5   : > { %v1131_v29 = vand.u32 31, %v1129_v17  ;;  %v8518_v62 = vand.u32 2147483647, %v5582_v57  ;;  %v1130_v13 = vshrl.u32 %v1129_v17, 5  ;;  %v1224_v26 = vand.u32 2139095040, %v5582_v57 }
  0xf6   : > { %v5614_v33 = vor.u32 4788187, %v883_v36  ;;  %v5616_v35 = vsub.s32 %v1073_v25, %v1076_v0  ;;  %v4549_v17 = vmin.u32 %v975_v18, %v5572_v46  ;;  %v1165_v9 = vshll.u32 %v1125_v63, 8 }
  0xf7   : > { %v1132_v45 = vsub.s32 32, %v1131_v29  ;;  %v1134_v16 = vshll.u32 %v8535_v8, %v1131_v29  ;;  %v1137_v7 = vshll.u32 %v8521_v10, %v1131_v29  ;;  %v1140_v28 = vshll.u32 %v8523_v12, %v1131_v29 }
  0xf8   : > { %v1143_v24 = vshll.u32 %v8528_v14, %v1131_v29  ;;  %v1146_v5 = vshll.u32 %v8543_v21, %v1131_v29  ;;  %v1225_v51 = vshrl.u32 %v1224_v26, 23  ;;  %vm1149_vm6 = vcmp.lt.s32.totalorder %v1130_v13, 1 }
  0xf9   : > { %v1135_v30 = vshrl.u32 %v8521_v10, %v1132_v45  ;;  %v1138_v52 = vshrl.u32 %v8523_v12, %v1132_v45  ;;  %v1141_v34 = vshrl.u32 %v8528_v14, %v1132_v45  ;;  %v1144_v61 = vshrl.u32 %v8543_v21, %v1132_v45 }
  0xfa   : > { %v1147_v23 = vshrl.u32 %v8525_v27, %v1132_v45  ;;  %vm1152_vm7 = vcmp.lt.s32.totalorder %v1130_v13, 4  ;;  %v1228_v36 = vand.u32 8388607, %v8518_v62  ;;  %v1079_v25 = vsub.s32 0, %v5616_v35 }
  0xfb   : > { %v1136_v20 = vor.u32 %v1135_v30, %v1134_v16  ;;  %v1139_v19 = vor.u32 %v1138_v52, %v1137_v7  ;;  %v1142_v40 = vor.u32 %v1141_v34, %v1140_v28  ;;  %v1145_v44 = vor.u32 %v1144_v61, %v1143_v24 }
  0xfc   : > { %v1148_v31 = vor.u32 %v1147_v23, %v1146_v5  ;;  %v1133_v0 = vshrl.u32 %v8535_v8, %v1132_v45  ;;  %vm1151_vm8 = vcmp.lt.s32.totalorder %v1130_v13, 3  ;;  %vm1150_vm9 = vcmp.lt.s32.totalorder %v1130_v13, 2 }
  0xfd   : > { %v1154_v56 = vsel %vm1152_vm7, %v1142_v40, 2102212464  ;;  %v1157_v3 = vsel %vm1149_vm6, %v1136_v20, %v1139_v19  ;;  %v1158_v29 = vsel %vm1152_vm7, %v1145_v44, 920167782  ;;  %v1161_v16 = vsel %vm1149_vm6, %v1139_v19, %v1142_v40 }
  0xfe   : > { %v1159_v7 = vsel %vm1151_vm8, %v1142_v40, %v1158_v29  ;;  %v1162_v26 = vsel %vm1152_vm7, %v1148_v31, 1326507024  ;;  %v4560_v30 = vadd.s32 4294967169, %v1225_v51  ;;  %v1153_v18 = vsel %vm1149_vm6, %v1133_v0, %v1136_v20 }
  0xff   : > { %v1155_v52 = vsel %vm1151_vm8, %v1139_v19, %v1154_v56  ;;  %v1160_v28 = vsel %vm1150_vm9, %v1157_v3, %v1159_v7  ;;  %v1163_v63 = vsel %vm1151_vm8, %v1145_v44, %v1162_v26  ;;  %v977_v24 = vclz %v4549_v17 }
 0x100   : > { %v1164_v34 = vsel %vm1150_vm9, %v1161_v16, %v1163_v63  ;;  %v5623_v61 = vmul.u32.u64.low %v1165_v9, %v1160_v28  ;;  %v5624_v5 = vmul.u32.u64.high %v1165_v9, %v1160_v28, %v5623_v61  ;;  %v605_v13 = vor.u32 8388608, %v5591_v54 }
 0x101   : > { %v5628_v62 = vmul.u32.u64.low %v1165_v9, %v1164_v34  ;;  %v5629_v45 = vmul.u32.u64.high %v1165_v9, %v1164_v34, %v5628_v62  ;;  %v1329_v40 = vshrl.u32 %v1328_v53, 23  ;;  %v1156_v31 = vsel %vm1150_vm9, %v1153_v18, %v1155_v52 }
 0x102   : > { %v1231_v51 = vadd.s32 1, %v4560_v30  ;;  %v615_v3 = vshrl.u32 %v8521_v10, %v5569_v37  ;;  %v885_v56 = vand.u32 2147483647, %v5614_v33  ;;  %v5636_v20 = vmin.u32 %v1079_v25, %v5616_v35 }
 0x103   : > { %v1229_v19 = vor.u32 8388608, %v1228_v36  ;;  %v618_v44 = vshrl.u32 %v8523_v12, %v5569_v37  ;;  %v4550_v17 = vadd.s32 4294967294, %v977_v24  ;;  %v1175_v62 = vadd.s32 1, %v5624_v5 }
 0x104   : > { %vm1232_vm10 = vcmp.gt.s32.totalorder %v1231_v51, 0  ;;  %v614_v53 = vshll.u32 %v8535_v8, %v5560_v32  ;;  %v1172_v29 = vmul.u32 %v1165_v9, %v1156_v31  ;;  %vm1174_vm11 = vc.u32 %v5629_v45, %v5623_v61 }
 0x105   : > { %v1233_v0 = vsel %vm1232_vm10, %v1231_v51, 0  ;;  %v617_v25 = vshll.u32 %v8521_v10, %v5560_v32  ;;  %v5647_v16 = vadd.s32 4294967169, %v1329_v40  ;;  %v1176_v36 = vsel %vm1174_vm11, %v1175_v62, %v5624_v5 }
 0x106   : > { %v1235_v7 = vand.u32 31, %v1233_v0  ;;  %v5650_v26 = vor.u32 %v615_v3, %v614_v53  ;;  %v1081_v30 = vclz %v5636_v20  ;;  %v1177_v18 = vadd.s32 %v1176_v36, %v1172_v29 }
 0x107   : > { %v5653_v52 = vshll.u32 %v1229_v19, 8  ;;  %v5655_v9 = vor.u32 %v618_v44, %v617_v25  ;;  %vm4551_vm12 = vcmp.lt.s32.totalorder %v4550_v17, 0  ;;  %v5657_v28 = vshrl.u32 %v1233_v0, 5 }
 0x108   : > { %v1236_v63 = vsub.s32 32, %v1235_v7  ;;  %v620_v24 = vshll.u32 %v8523_v12, %v5560_v32  ;;  %v621_v34 = vshrl.u32 %v8528_v14, %v5569_v37  ;;  %v1178_v5 = vadd.s32 536870912, %v1177_v18 }
 0x109   : > { %v1238_v40 = vshll.u32 %v8535_v8, %v1235_v7  ;;  %v1241_v31 = vshll.u32 %v8521_v10, %v1235_v7  ;;  %v1244_v51 = vshll.u32 %v8523_v12, %v1235_v7  ;;  %v1247_v44 = vshll.u32 %v8528_v14, %v1235_v7 }
 0x10a   : > { %v1239_v3 = vshrl.u32 %v8521_v10, %v1236_v63  ;;  %v1242_v20 = vshrl.u32 %v8523_v12, %v1236_v63  ;;  %v1245_v19 = vshrl.u32 %v8528_v14, %v1236_v63  ;;  %v5670_v62 = vshrl.u32 %v1178_v5, 30 }
 0x10b   : > { %v1248_v53 = vshrl.u32 %v8543_v21, %v1236_v63  ;;  %v1250_v29 = vshll.u32 %v8543_v21, %v1235_v7  ;;  %v1251_v0 = vshrl.u32 %v8525_v27, %v1236_v63  ;;  %v624_v6 = vshrl.u32 %v8543_v21, %v5569_v37 }
 0x10c   : > { %v1240_v25 = vor.u32 %v1239_v3, %v1238_v40  ;;  %v1243_v36 = vor.u32 %v1242_v20, %v1241_v31  ;;  %v1246_v41 = vor.u32 %v1245_v19, %v1244_v51  ;;  %v1180_v10 = vshll.u32 %v5670_v62, 30 }
 0x10d   : > { %v1249_v12 = vor.u32 %v1248_v53, %v1247_v44  ;;  %v1252_v23 = vor.u32 %v1251_v0, %v1250_v29  ;;  %vm1253_vm13 = vcmp.lt.s32.totalorder %v5657_v28, 1  ;;  %vm1256_vm14 = vcmp.lt.s32.totalorder %v5657_v28, 4 }
 0x10e   : > { %v1261_v5 = vsel %vm1253_vm13, %v1240_v25, %v1243_v36  ;;  %v623_v7 = vshll.u32 %v8528_v14, %v5560_v32  ;;  %v626_v40 = vshll.u32 %v8543_v21, %v5560_v32  ;;  %v5686_v31 = vsub.s32 %v1177_v18, %v1180_v10 }
 0x10f   : > { %vm1255_vm15 = vcmp.lt.s32.totalorder %v5657_v28, 3  ;;  %v1262_v51 = vsel %vm1256_vm14, %v1249_v12, 920167782  ;;  %v1265_v3 = vsel %vm1253_vm13, %v1243_v36, %v1246_v41  ;;  %vm1254_vm0 = vcmp.lt.s32.totalorder %v5657_v28, 2 }
 0x110   : > { %v1263_v20 = vsel %vm1255_vm15, %v1246_v41, %v1262_v51  ;;  %v1266_v19 = vsel %vm1256_vm14, %v1252_v23, 1326507024  ;;  %v627_v10 = vshrl.u32 %v8525_v27, %v5569_v37  ;;  %v1183_v32 = vsub.s32 0, %v5686_v31 }
 0x111   : > { %v1264_v18 = vsel %vm1254_vm0, %v1261_v5, %v1263_v20  ;;  %v1267_v44 = vsel %vm1255_vm15, %v1249_v12, %v1266_v19  ;;  %v625_v53 = vor.u32 %v624_v6, %v623_v7  ;;  %v622_v23 = vor.u32 %v621_v34, %v620_v24 }
 0x112   : > { %v1268_v29 = vsel %vm1254_vm0, %v1265_v3, %v1267_v44  ;;  %v5708_v0 = vmul.u32.u64.low %v5653_v52, %v1264_v18  ;;  %v5709_v51 = vmul.u32.u64.high %v5653_v52, %v1264_v18, %v5708_v0  ;;  %v5713_v37 = vsel %vm4551_vm12, 0, %v4550_v17 }
 0x113   : > { %v1258_v27 = vsel %vm1256_vm14, %v1246_v41, 2102212464  ;;  %v5718_v5 = vmul.u32.u64.low %v5653_v52, %v1268_v29  ;;  %v5719_v20 = vmul.u32.u64.high %v5653_v52, %v1268_v29, %v5718_v5  ;;  %v1237_v12 = vshrl.u32 %v8535_v8, %v1236_v63 }
 0x114   : > { %v628_v6 = vor.u32 %v627_v10, %v626_v40  ;;  %vm629_vm1 = vcmp.lt.s32.totalorder %v5587_v50, 1  ;;  %vm632_vm2 = vcmp.lt.s32.totalorder %v5587_v50, 4  ;;  %v4557_v7 = vmin.u32 %v1183_v32, %v5686_v31 }
 0x115   : > { %vm631_vm3 = vcmp.lt.s32.totalorder %v5587_v50, 3  ;;  %v637_v41 = vsel %vm629_vm1, %v5650_v26, %v5655_v9  ;;  %v638_v17 = vsel %vm632_vm2, %v625_v53, 920167782  ;;  %v4554_v24 = vadd.s32 4294967294, %v1081_v30 }
 0x116   : > { %v1257_v63 = vsel %vm1253_vm13, %v1237_v12, %v1240_v25  ;;  %v1259_v34 = vsel %vm1255_vm15, %v1243_v36, %v1258_v27  ;;  %v639_v40 = vsel %vm631_vm3, %v622_v23, %v638_v17  ;;  %v1279_v3 = vadd.s32 1, %v5709_v51 }
 0x117   : > { %vm630_vm4 = vcmp.lt.s32.totalorder %v5587_v50, 2  ;;  %v634_v19 = vsel %vm632_vm2, %v622_v23, 2102212464  ;;  %v641_v30 = vsel %vm629_vm1, %v5655_v9, %v622_v23  ;;  %vm1278_vm5 = vc.u32 %v5719_v20, %v5708_v0 }
 0x118   : > { %v640_v27 = vsel %vm630_vm4, %v637_v41, %v639_v40  ;;  %v642_v25 = vsel %vm632_vm2, %v628_v6, 1326507024  ;;  %v645_v36 = vshll.u32 %v605_v13, 8  ;;  %v1185_v10 = vclz %v4557_v7 }
 0x119   : > { %v1260_v32 = vsel %vm1254_vm0, %v1257_v63, %v1259_v34  ;;  %v633_v18 = vsel %vm629_vm1, %v5595_v59, %v5650_v26  ;;  %v643_v44 = vsel %vm631_vm3, %v625_v53, %v642_v25  ;;  %v635_v29 = vsel %vm631_vm3, %v5655_v9, %v634_v19 }
 0x11a   : > { %v644_v54 = vsel %vm630_vm4, %v641_v30, %v643_v44  ;;  %v5766_v13 = vmul.u32.u64.low %v645_v36, %v640_v27  ;;  %v5767_v23 = vmul.u32.u64.high %v645_v36, %v640_v27, %v5766_v13  ;;  %v715_v28 = vand.u32 31, %v5584_v58 }
 0x11b   : > { %v1280_v5 = vsel %vm1278_vm5, %v1279_v3, %v5709_v51  ;;  %v8527_v59 = vand.u32 2147483647, %v5499_v22  ;;  %v8552_v26 = vcvt.s32.f32 %v5597_v11  ;;  %v1276_v9 = vmul.u32 %v5653_v52, %v1260_v32 }
 0x11c   : > { %v5780_v12 = vmul.u32.u64.low %v645_v36, %v644_v54  ;;  %v5781_v6 = vmul.u32.u64.high %v645_v36, %v644_v54, %v5780_v12  ;;  %v985_v7 = vsub.s32 4294967266, %v5713_v37  ;;  %v1335_v41 = vadd.s32 1, %v5647_v16 }
 0x11d   : > { %v5777_v53 = vmul.f32 %v8552_v26, %v885_v56  ;;  %v636_v51 = vsel %vm630_vm4, %v633_v18, %v635_v29  ;;  %vm4555_vm6 = vcmp.lt.s32.totalorder %v4554_v24, 0  ;;  %v4558_v17 = vadd.s32 4294967294, %v1185_v10 }
 0x11e   : > { %v5787_v63 = vadd.s32 %v1280_v5, %v1276_v9  ;;  %v655_v11 = vadd.s32 1, %v5767_v23  ;;  %v5791_v33 = vshrl.u32 %v5584_v58, 5  ;;  %v5793_v56 = vsub.s32 32, %v715_v28 }
 0x11f   : > { %v965_v52 = vadd.s32 %v5488_v2, %v5480_v4  ;;  %v5799_v16 = vand.u32 8388607, %v8527_v59  ;;  %v889_v50 = vxor.u32 2147483648, %v5777_v53  ;;  %v5804_v34 = vadd.s32 %v5535_v39, %v5540_v42 }
 0x120   : > { %v652_v40 = vmul.u32 %v645_v36, %v636_v51  ;;  %vm654_vm7 = vc.u32 %v5781_v6, %v5766_v13  ;;  %v981_v58 = vsub.s32 32, %v5713_v37  ;;  %v5809_v3 = vsel %vm4555_vm6, 0, %v4554_v24 }
 0x121   : > { %vm1336_vm8 = vcmp.gt.s32.totalorder %v1335_v41, 0  ;;  %v656_v4 = vsel %vm654_vm7, %v655_v11, %v5767_v23  ;;  %v986_v2 = vadd.s32 127, %v985_v7  ;;  %vm4559_vm9 = vcmp.lt.s32.totalorder %v4558_v17, 0 }
 0x122   : > { %v1282_v19 = vadd.s32 536870912, %v5787_v63  ;;  %v657_v30 = vadd.s32 %v656_v4, %v652_v40  ;;  %v8553_v27 = vmov 2131351028   ;;  %v725_v42 = vshrl.u32 %v8528_v14, %v5793_v56 }
 0x123   : > { %v722_v39 = vshrl.u32 %v8553_v27, %v5793_v56  ;;  %v727_v25 = vshll.u32 %v8528_v14, %v715_v28  ;;  %v728_v24 = vshrl.u32 %v8543_v21, %v5793_v56  ;;  %v1089_v36 = vsub.s32 4294967266, %v5809_v3 }
 0x124   : > { %v658_v10 = vadd.s32 536870912, %v657_v30  ;;  %v8554_v32 = vmov 2475754826   ;;  %v8555_v44 = vmov 1326507024   ;;  %v724_v23 = vshll.u32 %v8553_v27, %v715_v28 }
 0x125   : > { %v719_v18 = vshrl.u32 %v8554_v32, %v5793_v56  ;;  %v731_v29 = vshrl.u32 %v8555_v44, %v5793_v56  ;;  %v721_v54 = vshll.u32 %v8554_v32, %v715_v28  ;;  %v729_v5 = vor.u32 %v728_v24, %v727_v25 }
 0x126   : > { %v730_v26 = vshll.u32 %v8543_v21, %v715_v28  ;;  %v982_v9 = vshll.u32 %v5572_v46, %v5713_v37  ;;  %v5831_v12 = vsel %vm4559_vm9, 0, %v4558_v17  ;;  %v5833_v7 = vshrl.u32 %v658_v10, 30 }
 0x127   : > { %v718_v51 = vshll.u32 %v8535_v8, %v715_v28  ;;  %v5836_v11 = vshrl.u32 %v1282_v19, 30  ;;  %v723_v40 = vor.u32 %v722_v39, %v721_v54  ;;  %v726_v4 = vor.u32 %v725_v42, %v724_v23 }
 0x128   : > { %v732_v59 = vor.u32 %v731_v29, %v730_v26  ;;  %v5839_v14 = vsel %vm1336_vm8, %v1335_v41, 0  ;;  %v660_v25 = vshll.u32 %v5833_v7, 30  ;;  %vm736_vm10 = vcmp.lt.s32.totalorder %v5791_v33, 4 }
 0x129   : > { %v720_v24 = vor.u32 %v719_v18, %v718_v51  ;;  %v983_v46 = vshrl.u32 %v965_v52, %v981_v58  ;;  %v987_v37 = vshll.u32 %v986_v2, 23  ;;  %v1090_v17 = vadd.s32 127, %v1089_v36 }
 0x12a   : > { %v742_v10 = vsel %vm736_vm10, %v729_v5, 920167782  ;;  %v1193_v28 = vsub.s32 4294967266, %v5831_v12  ;;  %v5846_v19 = vsub.s32 %v657_v30, %v660_v25  ;;  %v709_v39 = vor.u32 8388608, %v5799_v16 }
 0x12b   : > { %vm733_vm11 = vcmp.lt.s32.totalorder %v5791_v33, 1  ;;  %v1284_v41 = vshll.u32 %v5836_v11, 30  ;;  %vm735_vm12 = vcmp.lt.s32.totalorder %v5791_v33, 3  ;;  %v746_v58 = vsel %vm736_vm10, %v732_v59, 1326507024 }
 0x12c   : > { %v745_v52 = vsel %vm733_vm11, %v723_v40, %v726_v4  ;;  %v663_v2 = vsub.s32 0, %v5846_v19  ;;  %v741_v30 = vsel %vm733_vm11, %v720_v24, %v723_v40  ;;  %v743_v16 = vsel %vm735_vm12, %v726_v4, %v742_v10 }
 0x12d   : > { %v747_v42 = vsel %vm735_vm12, %v729_v5, %v746_v58  ;;  %v984_v36 = vor.u32 %v983_v46, %v982_v9  ;;  %v988_v18 = vor.u32 4788187, %v987_v37  ;;  %v5864_v29 = vand.u32 31, %v5839_v14 }
 0x12e   : > { %vm734_vm13 = vcmp.lt.s32.totalorder %v5791_v33, 2  ;;  %v1194_v54 = vadd.s32 127, %v1193_v28  ;;  %v4537_v59 = vmin.u32 %v663_v2, %v5846_v19  ;;  %v738_v23 = vsel %vm736_vm10, %v726_v4, 2102212464 }
 0x12f   : > { %v748_v26 = vsel %vm734_vm13, %v745_v52, %v747_v42  ;;  %v5873_v51 = vsub.s32 %v5787_v63, %v1284_v41  ;;  %v717_v5 = vshrl.u32 %v8535_v8, %v5793_v56  ;;  %v744_v9 = vsel %vm734_vm13, %v741_v30, %v743_v16 }
 0x130   : > { %v749_v25 = vshll.u32 %v709_v39, 8  ;;  %v1085_v46 = vsub.s32 32, %v5809_v3  ;;  %v1091_v37 = vshll.u32 %v1090_v17, 23  ;;  %v1189_v10 = vsub.s32 32, %v5831_v12 }
 0x131   : > { %v665_v28 = vclz %v4537_v59  ;;  %vm807_vm14 = vcmp.lt.s32.totalorder %v5368_v38, 0  ;;  %v737_v4 = vsel %vm733_vm11, %v717_v5, %v720_v24  ;;  %v739_v63 = vsel %vm735_vm12, %v723_v40, %v738_v23 }
 0x132   : > { %v5886_v41 = vmul.u32.u64.low %v749_v25, %v748_v26  ;;  %v5887_v56 = vmul.u32.u64.high %v749_v25, %v748_v26, %v5886_v41  ;;  %v991_v52 = vcvt.s32.f32 %v984_v36  ;;  %v989_v17 = vand.u32 2147483647, %v988_v18 }
 0x133   : > { %v4538_v58 = vadd.s32 4294967294, %v665_v28  ;;  %v5889_v39 = vmul.u32.u64.low %v749_v25, %v744_v9  ;;  %v5890_v2 = vmul.u32.u64.high %v749_v25, %v744_v9, %v5889_v39  ;;  %v1173_v30 = vadd.s32 %v5623_v61, %v5629_v45 }
 0x134   : > { %v1195_v16 = vshll.u32 %v1194_v54, 23  ;;  %v1287_v42 = vsub.s32 0, %v5873_v51  ;;  %v1086_v24 = vshll.u32 %v5616_v35, %v5809_v3  ;;  %v1087_v40 = vshrl.u32 %v5804_v34, %v1085_v46 }
 0x135   : > { %vm4539_vm15 = vcmp.lt.s32.totalorder %v4538_v58, 0  ;;  %v740_v36 = vsel %vm734_vm13, %v737_v4, %v739_v63  ;;  %v1092_v59 = vor.u32 4788187, %v1091_v37  ;;  %v1191_v23 = vshrl.u32 %v1173_v30, %v1189_v10 }
 0x136   : > { %v668_v26 = vsel %vm4539_vm15, 0, %v4538_v58  ;;  %vm758_vm0 = vc.u32 %v5887_v56, %v5889_v39  ;;  %v653_v61 = vadd.s32 %v5766_v13, %v5781_v6  ;;  %v759_v54 = vadd.s32 1, %v5890_v2 }
 0x137   : > { %v669_v45 = vsub.s32 32, %v668_v26  ;;  %v673_v18 = vsub.s32 4294967266, %v668_v26  ;;  %v1190_v35 = vshll.u32 %v5686_v31, %v5831_v12  ;;  %v1196_v34 = vor.u32 4788187, %v1195_v16 }
 0x138   : > { %v4561_v33 = vmin.u32 %v1287_v42, %v5873_v51  ;;  %v756_v3 = vmul.u32 %v749_v25, %v740_v36  ;;  %v670_v5 = vshll.u32 %v5846_v19, %v668_v26  ;;  %v760_v37 = vsel %vm758_vm0, %v759_v54, %v5890_v2 }
 0x139   : > { %v671_v9 = vshrl.u32 %v653_v61, %v669_v45  ;;  %v674_v46 = vadd.s32 127, %v673_v18  ;;  %vm911_vm1 = vcmp.lt.s32.totalorder %v5378_v49, 0  ;;  %v1088_v13 = vor.u32 %v1087_v40, %v1086_v24 }
 0x13a   : > { %v5913_v6 = vsub.s32 32, %v5864_v29  ;;  %v1192_v10 = vor.u32 %v1191_v23, %v1190_v35  ;;  %v761_v28 = vadd.s32 %v760_v37, %v756_v3  ;;  %v890_v31 = vsel %vm807_vm14, %v889_v50, %v5777_v53 }
 0x13b   : > { %v992_v12 = vmul.f32 %v991_v52, %v989_v17  ;;  %v672_v19 = vor.u32 %v671_v9, %v670_v5  ;;  %v675_v25 = vshll.u32 %v674_v46, 23  ;;  %v1093_v4 = vand.u32 2147483647, %v1092_v59 }
 0x13c   : > { %v5921_v63 = vshrl.u32 %v5839_v14, 5  ;;  %v1197_v41 = vand.u32 2147483647, %v1196_v34  ;;  %v762_v58 = vadd.s32 536870912, %v761_v28  ;;  %v8556_v2 = vmov 2102212464  }
 0x13d   : > { %v1351_v30 = vshll.u32 %v8556_v2, %v5864_v29  ;;  %v1354_v16 = vshll.u32 %v8543_v21, %v5864_v29  ;;  %v1289_v42 = vclz %v4561_v33  ;;  %v676_v24 = vor.u32 4788187, %v675_v25 }
 0x13e   : > { %v1095_v40 = vcvt.s32.f32 %v1088_v13  ;;  %v1352_v53 = vshrl.u32 %v8543_v21, %v5913_v6  ;;  %v1199_v50 = vcvt.s32.f32 %v1192_v10  ;;  %v8557_v52 = vand.u32 2147483647, %v5427_v1 }
 0x13f   : > { %v5935_v17 = vshrl.u32 %v762_v58, 30  ;;  %v993_v36 = vxor.u32 2147483648, %v992_v12  ;;  %v1355_v59 = vshrl.u32 %v8555_v44, %v5913_v6  ;;  %v677_v23 = vand.u32 2147483647, %v676_v24 }
 0x140   : > { %vm5931_vm2 = vcmp.le.f32.partialorder %v8557_v52, 0.7853982  ;;  %v679_v26 = vcvt.s32.f32 %v672_v19  ;;  %v1096_v61 = vmul.f32 %v1095_v40, %v1093_v4  ;;  %v1200_v45 = vmul.f32 %v1199_v50, %v1197_v41 }
 0x141   : > { %v683_v18 = vsub.s32 4, %v5833_v7  ;;  %v764_v54 = vshll.u32 %v5935_v17, 30  ;;  %v4562_v35 = vadd.s32 4294967294, %v1289_v42  ;;  %v8560_v33 = vand.u32 2147483647, %v5368_v38 }
 0x142   : > { %v680_v34 = vmul.f32 %v679_v26, %v677_v23  ;;  %v891_v5 = vsub.s32 4, %v5458_v43  ;;  %vm1015_vm4 = vcmp.lt.s32.totalorder %v5414_v55, 0  ;;  %vm599_vm5 = vcmp.lt.s32.totalorder %v5427_v1, 0 }
 0x143   : > { %vm5943_vm3 = vcmp.le.f32.partialorder %v8560_v33, 0.7853982  ;;  %v5950_v9 = vsub.s32 %v761_v28, %v764_v54  ;;  %v994_v37 = vsel %vm911_vm1, %v993_v36, %v992_v12  ;;  %v5957_v13 = vor.u32 %v1352_v53, %v1351_v30 }
 0x144   : > { %v893_v46 = vsel %vm5943_vm3, %v5368_v38, %v890_v31  ;;  %v1356_v10 = vor.u32 %v1355_v59, %v1354_v16  ;;  %vm1360_vm6 = vcmp.lt.s32.totalorder %v5921_v63, 4  ;;  %v1097_v19 = vxor.u32 2147483648, %v1096_v61 }
 0x145   : > { %v681_v25 = vxor.u32 2147483648, %v680_v34  ;;  %v684_v4 = vsel %vm599_vm5, %v683_v18, %v5833_v7  ;;  %v767_v28 = vsub.s32 0, %v5950_v9  ;;  %v1201_v41 = vxor.u32 2147483648, %v1200_v45 }
 0x146   : > { %vm4563_vm7 = vcmp.lt.s32.totalorder %v4562_v35, 0  ;;  %v892_v31 = vsel %vm807_vm14, %v891_v5, %v5458_v43  ;;  %4988 = vcosq.f32 %v893_v46  ;;  %vm703_vm8 = vcmp.lt.s32.totalorder %v5499_v22, 0 }
 0x147   : > { %v4541_v12 = vmin.u32 %v767_v28, %v5950_v9  ;;  %4990 = vsinq.f32 %v893_v46  ;;  %v8563_v58 = vand.u32 2147483647, %v5378_v49  ;;  %v995_v7 = vsub.s32 4, %v5557_v15 }
 0x148   : > { %v5979_v16 = vsel %vm1360_vm6, %v5957_v13, 920167782  ;;  %vm1119_vm10 = vcmp.lt.s32.totalorder %v5549_v60, 0  ;;  %v686_v43 = vsel %vm5931_vm2, 0, %v684_v4  ;;  %v5989_v24 = vsel %vm1360_vm6, %v1356_v10, 1326507024 }
 0x149   : > { %vm5971_vm9 = vcmp.le.f32.partialorder %v8563_v58, 0.7853982  ;;  %v5991_v40 = vsel %vm4563_vm7, 0, %v4562_v35  ;;  %v682_v53 = vsel %vm599_vm5, %v681_v25, %v680_v34  ;;  %v769_v50 = vclz %v4541_v12 }
 0x14a   : > { %v997_v42 = vsel %vm5971_vm9, %v5378_v49, %v994_v37  ;;  %v1098_v52 = vsel %vm1015_vm4, %v1097_v19, %v1096_v61  ;;  %v1202_v36 = vsel %vm1119_vm10, %v1201_v41, %v1200_v45  ;;  %v6001_v59 = vadd.s32 %v5708_v0, %v5719_v20 }
 0x14b   : > { %v8566_v23 = vand.u32 2147483647, %v5499_v22  ;;  %v894_v18 = vsel %vm5943_vm3, 0, %v892_v31  ;;  %v690_v54 = vadd.s32 3, %v686_v43  ;;  %v4542_v35 = vadd.s32 4294967294, %v769_v50 }
 0x14c   : > { %v996_v61 = vsel %vm911_vm1, %v995_v7, %v5557_v15  ;;  %4992 = vcosq.f32 %v997_v42  ;;  %v1297_v45 = vsub.s32 4294967266, %v5991_v40  ;;  %v685_v0 = vsel %vm5931_vm2, %v5427_v1, %v682_v53 }
 0x14d   : > { %vm6005_vm11 = vcmp.le.f32.partialorder %v8566_v23, 0.7853982  ;;  %v787_v20 = vsub.s32 4, %v5935_v17  ;;  %4994 = vsinq.f32 %v997_v42  ;;  %v1293_v34 = vsub.s32 32, %v5991_v40 }
 0x14e   : > { %v757_v33 = vadd.s32 %v5889_v39, %v5887_v56  ;;  %vm4543_vm12 = vcmp.lt.s32.totalorder %v4542_v35, 0  ;;  %v898_v3 = vadd.s32 3, %v894_v18  ;;  %v998_v15 = vsel %vm5971_vm9, 0, %v996_v61 }
 0x14f   : > { %v772_v5 = vsel %vm4543_vm12, 0, %v4542_v35  ;;  %v8569_v46 = vand.u32 2147483647, %v5414_v55  ;;  %v1099_v14 = vsub.s32 4, %v5577_v48  ;;  %4996 = vcosq.f32 %v685_v0 }
 0x150   : > { %v773_v10 = vsub.s32 32, %v772_v5  ;;  %v777_v19 = vsub.s32 4294967266, %v772_v5  ;;  %v4989_v39 = vpop.eup %4988  ;;  %v6034_v25 = vadd.s32 127, %v1297_v45  ;;  %4998 = vsinq.f32 %v685_v0 }
 0x151   : > { %vm6026_vm13 = vcmp.le.f32.partialorder %v8569_v46, 0.7853982  ;;  %v788_v4 = vsel %vm703_vm8, %v787_v20, %v5935_v17  ;;  %v8572_v28 = vand.u32 2147483647, %v5549_v60  ;;  %v4991_v31 = vpop.eup %4990  ;;  %v774_v12 = vshll.u32 %v5950_v9, %v772_v5 }
 0x152   : > { %v1101_v56 = vsel %vm6026_vm13, %v5414_v55, %v1098_v52  ;;  %v775_v58 = vshrl.u32 %v757_v33, %v773_v10  ;;  %v778_v30 = vadd.s32 127, %v777_v19  ;;  %v1203_v7 = vsub.s32 4, %v5670_v62 }
 0x153   : > { %vm6041_vm14 = vcmp.le.f32.partialorder %v8572_v28, 0.7853982  ;;  %v1002_v43 = vadd.s32 3, %v998_v15  ;;  %v1100_v42 = vsel %vm1015_vm4, %v1099_v14, %v5577_v48  ;;  %5000 = vcosq.f32 %v1101_v56 }
 0x154   : > { %v1205_v17 = vsel %vm6041_vm14, %v5549_v60, %v1202_v36  ;;  %v776_v53 = vor.u32 %v775_v58, %v774_v12  ;;  %v779_v50 = vshll.u32 %v778_v30, 23  ;;  %v790_v52 = vsel %vm6005_vm11, 0, %v788_v4 }
 0x155   : > { %v899_v9 = vand.u32 3, %v898_v3  ;;  %v6055_v23 = vand.u32 3, %v690_v54  ;;  %v902_v18 = vxor.u32 2147483648, %v4991_v31  ;;  %v905_v35 = vxor.u32 2147483648, %v4989_v39 }
 0x156   : > { %5002 = vsinq.f32 %v1101_v56  ;;  %v4993_v61 = vpop.eup %4992  ;;  %v780_v45 = vor.u32 4788187, %v779_v50  ;;  %v1102_v48 = vsel %vm6026_vm13, 0, %v1100_v42  ;;  %v1204_v36 = vsel %vm1119_vm10, %v1203_v7, %v5670_v62 }
 0x157   : > { %5004 = vcosq.f32 %v1205_v17  ;;  %v4995_v0 = vpop.eup %4994  ;;  %v1299_v20 = vshll.u32 %v6034_v25, 23  ;;  %v794_v33 = vadd.s32 3, %v790_v52  ;;  %v6063_v3 = vand.u32 3, %v1002_v43 }
 0x158   : > { %5006 = vsinq.f32 %v1205_v17  ;;  %v781_v54 = vand.u32 2147483647, %v780_v45  ;;  %v783_v5 = vcvt.s32.f32 %v776_v53  ;;  %vm901_vm15 = vcmp.eq.s32.totalorder %v899_v9, 0 }
 0x159   : > { %v1325_v15 = vand.u32 2147483647, %v5575_v47  ;;  %vm696_vm0 = vcmp.eq.s32.totalorder %v6055_v23, 2  ;;  %vm904_vm1 = vcmp.eq.s32.totalorder %v899_v9, 2  ;;  %v1009_v46 = vxor.u32 2147483648, %v4993_v61  ;;  %v4997_v14 = vpop.eup %4996 }
 0x15a   : > { %v1106_v37 = vadd.s32 3, %v1102_v48  ;;  %v1206_v62 = vsel %vm6041_vm14, 0, %v1204_v36  ;;  %vm693_vm2 = vcmp.eq.s32.totalorder %v6055_v23, 0  ;;  %v784_v10 = vmul.f32 %v783_v5, %v781_v54  ;;  %v4999_v28 = vpop.eup %4998 }
 0x15b   : > { %v903_v19 = vsel %vm901_vm15, %v4989_v39, %v902_v18  ;;  %v906_v56 = vsel %vm904_vm1, %v905_v35, %v4991_v31  ;;  %v1006_v4 = vxor.u32 2147483648, %v4995_v0  ;;  %v6070_v12 = vand.u32 3, %v794_v33 }
 0x15c   : > { %vm900_vm3 = vcmp.lt.s32.totalorder %v899_v9, 2  ;;  %vm1005_vm4 = vcmp.eq.s32.totalorder %v6063_v3, 0  ;;  %vm1008_vm5 = vcmp.eq.s32.totalorder %v6063_v3, 2  ;;  %v785_v58 = vxor.u32 2147483648, %v784_v10 }
 0x15d   : > { %v1210_v30 = vadd.s32 3, %v1206_v62  ;;  %v1332_v41 = vand.u32 8388607, %v1325_v15  ;;  %v1343_v7 = vshrl.u32 %v8554_v32, %v5913_v6  ;;  %v6078_v43 = vpop.eup %5000  ;;  %v6080_v39 = vsel %vm900_vm3, %v903_v19, %v906_v56 }
 0x15e   : > { %v1010_v31 = vsel %vm1008_vm5, %v1009_v46, %v4995_v0  ;;  %v6082_v42 = vand.u32 3, %v1106_v37  ;;  %v1342_v17 = vshll.u32 %v8535_v8, %v5864_v29  ;;  %v694_v53 = vxor.u32 2147483648, %v4999_v28 }
 0x15f   : > { %v697_v50 = vxor.u32 2147483648, %v4997_v14  ;;  %v786_v52 = vsel %vm703_vm8, %v785_v58, %v784_v10  ;;  %v1007_v9 = vsel %vm1005_vm4, %v4993_v61, %v1006_v4  ;;  %v1345_v48 = vshll.u32 %v8554_v32, %v5864_v29 }
 0x160   : > { %v5003_v18 = vpop.eup %5002  ;;  %v789_v35 = vsel %vm6005_vm11, %v5499_v22, %v786_v52  ;;  %v1344_v45 = vor.u32 %v1343_v7, %v1342_v17  ;;  %v1346_v36 = vshrl.u32 %v8553_v27, %v5913_v6  ;;  %vm1004_vm7 = vcmp.lt.s32.totalorder %v6063_v3, 2 }
 0x161   : > { %v5005_v0 = vpop.eup %5004  ;;  %5008 = vcosq.f32 %v789_v35  ;;  %v1113_v33 = vxor.u32 2147483648, %v6078_v43  ;;  %v1211_v54 = vand.u32 3, %v1210_v30  ;;  %v1333_v61 = vor.u32 8388608, %v1332_v41 }
 0x162   : > { %v5007_v5 = vpop.eup %5006  ;;  %5010 = vsinq.f32 %v789_v35  ;;  %v1347_v46 = vor.u32 %v1346_v36, %v1345_v48  ;;  %v1348_v26 = vshll.u32 %v8553_v27, %v5864_v29  ;;  %v1349_v37 = vshrl.u32 %v8556_v2, %v5913_v6 }
 0x163   : > { %vm692_vm8 = vcmp.lt.s32.totalorder %v6055_v23, 2  ;;  %v698_v62 = vsel %vm696_vm0, %v697_v50, %v4999_v28  ;;  %v1110_v10 = vxor.u32 2147483648, %v5003_v18  ;;  %vm1357_vm9 = vcmp.lt.s32.totalorder %v5921_v63, 1 }
 0x164   : > { %vm1359_vm10 = vcmp.lt.s32.totalorder %v5921_v63, 3  ;;  %v695_v19 = vsel %vm693_vm2, %v4997_v14, %v694_v53  ;;  %v1350_v56 = vor.u32 %v1349_v37, %v1348_v26  ;;  %v1365_v29 = vsel %vm1357_vm9, %v1344_v45, %v1347_v46 }
 0x165   : > { %v1371_v4 = vsel %vm1359_vm10, %v5957_v13, %v5989_v24  ;;  %vm1001_vm11 = vweird.f32 %v5378_v49  ;;  %v1214_v28 = vxor.u32 2147483648, %v5007_v5  ;;  %v1217_v58 = vxor.u32 2147483648, %v5005_v0 }
 0x166   : > { %v1341_v30 = vshrl.u32 %v8535_v8, %v5913_v6  ;;  %vm1358_vm12 = vcmp.lt.s32.totalorder %v5921_v63, 2  ;;  %vm689_vm13 = vweird.f32 %v5427_v1  ;;  %vm797_vm14 = vcmp.eq.s32.totalorder %v6070_v12, 0 }
 0x167   : > { %v1362_v14 = vsel %vm1360_vm6, %v1350_v56, 2102212464  ;;  %v1367_v13 = vsel %vm1359_vm10, %v1350_v56, %v5979_v16  ;;  %v1369_v24 = vsel %vm1357_vm9, %v1347_v46, %v1350_v56  ;;  %v1373_v41 = vshll.u32 %v1333_v61, 8 }
 0x168   : > { %vm796_vm15 = vcmp.lt.s32.totalorder %v6070_v12, 2  ;;  %vm897_vm0 = vweird.f32 %v5368_v38  ;;  %vm1213_vm1 = vcmp.eq.s32.totalorder %v1211_v54, 0  ;;  %vm1216_vm2 = vcmp.eq.s32.totalorder %v1211_v54, 2 }
 0x169   : > { %v1368_v6 = vsel %vm1358_vm12, %v1365_v29, %v1367_v13  ;;  %v1372_v7 = vsel %vm1358_vm12, %v1369_v24, %v1371_v4  ;;  %vm793_vm6 = vweird.f32 %v5499_v22  ;;  %v1361_v16 = vsel %vm1357_vm9, %v1341_v30, %v1344_v45 }
 0x16a   : > { %v1363_v17 = vsel %vm1359_vm10, %v1347_v46, %v1362_v14  ;;  %v6138_v53 = vmul.u32.u64.low %v1373_v41, %v1372_v7  ;;  %v6139_v50 = vmul.u32.u64.high %v1373_v41, %v1372_v7, %v6138_v53  ;;  %v1215_v52 = vsel %vm1213_vm1, %v5005_v0, %v1214_v28 }
 0x16b   : > { %v1218_v35 = vsel %vm1216_vm2, %v1217_v58, %v5007_v5  ;;  %v6141_v48 = vmul.u32.u64.low %v1373_v41, %v1368_v6  ;;  %v6142_v36 = vmul.u32.u64.high %v1373_v41, %v1368_v6, %v6141_v48  ;;  %vm800_vm3 = vcmp.eq.s32.totalorder %v6070_v12, 2  ;;  %v5009_v45 = vpop.eup %5008 }
 0x16c   : > { %v1011_v61 = vsel %vm1004_vm7, %v1007_v9, %v1010_v31  ;;  %vm1109_vm4 = vcmp.eq.s32.totalorder %v6082_v42, 0  ;;  %vm1112_vm5 = vcmp.eq.s32.totalorder %v6082_v42, 2  ;;  %vm1212_vm9 = vcmp.lt.s32.totalorder %v1211_v54, 2  ;;  %v5011_v5 = vpop.eup %5010 }
 0x16d   : > { %v1111_v46 = vsel %vm1109_vm4, %v6078_v43, %v1110_v10  ;;  %v1114_v26 = vsel %vm1112_vm5, %v1113_v33, %v5003_v18  ;;  %v1364_v0 = vsel %vm1358_vm12, %v1361_v16, %v1363_v17  ;;  %v699_v37 = vsel %vm692_vm8, %v695_v19, %v698_v62 }
 0x16e   : > { %v801_v56 = vxor.u32 2147483648, %v5009_v45  ;;  %v1219_v29 = vsel %vm1212_vm9, %v1215_v52, %v1218_v35  ;;  %vm1382_vm7 = vc.u32 %v6139_v50, %v6141_v48  ;;  %v798_v3 = vxor.u32 2147483648, %v5011_v5 }
 0x16f   : > { %vm1108_vm10 = vcmp.lt.s32.totalorder %v6082_v42, 2  ;;  %vm1209_vm1 = vweird.f32 %v5549_v60  ;;  %v1383_v43 = vadd.s32 1, %v6142_v36  ;;  %v1012_v31 = vsel %vm1001_vm11, nan, %v1011_v61 }
 0x170   : > { %v802_v63 = vsel %vm800_vm3, %v801_v56, %v5011_v5  ;;  %v1115_v23 = vsel %vm1108_vm10, %v1111_v46, %v1114_v26  ;;  %v1380_v9 = vmul.u32 %v1373_v41, %v1364_v0  ;;  %v700_v18 = vsel %vm689_vm13, nan, %v699_v37 }
 0x171   : > { %v799_v33 = vsel %vm797_vm14, %v5009_v45, %v798_v3  ;;  %v1220_v54 = vsel %vm1209_vm1, nan, %v1219_v29  ;;  %v1384_v42 = vsel %vm1382_vm7, %v1383_v43, %v6142_v36  ;;  %v908_v62 = vsel %vm897_vm0, nan, %v6080_v39 }
 0x172   : > { %v803_v60 = vsel %vm796_vm15, %v799_v33, %v802_v63  ;;  %vm1105_vm8 = vweird.f32 %v5414_v55  ;;  %v1385_v49 = vadd.s32 %v1384_v42, %v1380_v9  ;;  %vm8546_vm11 = vcmask 261120  }
 0x173   : > { %v804_v1 = vsel %vm793_vm6, nan, %v803_v60  ;;  %v1430_v10 = vpack.c.bf16 %v1012_v31, %v908_v62  ;;  %v1116_v19 = vsel %vm1105_vm8, nan, %v1115_v23  ;;  %v1295_v4 = vshrl.u32 %v6001_v59, %v1293_v34 }
 0x174   : > { %v1429_v28 = vpack.c.bf16 %v804_v1, %v700_v18  ;;  %v1431_v12 = vpack.c.bf16 %v1220_v54, %v1116_v19  ;;  %v1386_v58 = vadd.s32 536870912, %v1385_v49  ;;  %v1294_v38 = vshll.u32 %v5873_v51, %v5991_v40 }
 0x175   : > { %v1300_v55 = vor.u32 4788187, %v1299_v20  ;;  %vm1223_vm13 = vcmp.lt.s32.totalorder %v5582_v57, 0  ;;  %v1381_v7 = vadd.s32 %v6141_v48, %v6139_v50  ;;  %v8575_v53 = vand.u32 2147483647, %v5582_v57 }
 0x176   : > { %4737 = vmatprep.mubr.msk.bf16.mxu0 %vm8546_vm11, %v1429_v28  ;;  %v1387_v22 = vshrl.u32 %v1386_v58, 30  ;;  %v1296_v39 = vor.u32 %v1295_v4, %v1294_v38  ;;  %v1307_v0 = vsub.s32 4, %v5836_v11  ;;  %vm1327_vm15 = vcmp.lt.s32.totalorder %v5575_v47, 0 }
 0x177   : > { %4738 = vmatmul.mubr.msk.bf16.vlgmr.msra.gmra.mrb[0].mxu0 %vm8546_vm11, %v1430_v10  ;;  %v1301_v14 = vand.u32 2147483647, %v1300_v55  ;;  %vm6194_vm14 = vcmp.le.f32.partialorder %v8575_v53, 0.7853982  ;;  %vm1326_vm0 = vcmp.le.f32.partialorder %v1325_v15, 0.7853982  ;;  %vm1313_vm5 = vweird.f32 %v5582_v57 }
 0x178   : > { %4741 = vmatprep.mubr.msk.bf16.mxu0 %vm8546_vm11, %v1431_v12  ;;  %v1388_v30 = vshll.u32 %v1387_v22, 30  ;;  %v1303_v34 = vcvt.s32.f32 %v1296_v39  ;;  %v1308_v37 = vsel %vm1223_vm13, %v1307_v0, %v5836_v11  ;;  %v1411_v29 = vsub.s32 4, %v1387_v22 }
 0x179   : > { %v1310_v3 = vsel %vm6194_vm14, 0, %v1308_v37  ;;  %vm1417_vm10 = vweird.f32 %v5575_v47 }
 0x17a   : > { %v1389_v59 = vsub.s32 %v1385_v49, %v1388_v30  ;;  %v1304_v24 = vmul.f32 %v1303_v34, %v1301_v14  ;;  %v1412_v31 = vsel %vm1327_vm15, %v1411_v29, %v1387_v22  ;;  %v1314_v23 = vadd.s32 3, %v1310_v3  ;;  %v6226_v14 = vld [vmem:[%s6218_s30] ss:$0 sm:$0xff] }
 0x17b   : > { %v1414_v11 = vsel %vm1326_vm0, 0, %v1412_v31 }
 0x17c   : > { %v1391_v13 = vsub.s32 0, %v1389_v59  ;;  %v1305_v51 = vxor.u32 2147483648, %v1304_v24  ;;  %v1315_v54 = vand.u32 3, %v1314_v23  ;;  %v1418_v62 = vadd.s32 3, %v1414_v11 }
 0x17e   : > { %v4565_v41 = vmin.u32 %v1391_v13, %v1389_v59  ;;  %v1306_v20 = vsel %vm1223_vm13, %v1305_v51, %v1304_v24  ;;  %vm1317_vm2 = vcmp.eq.s32.totalorder %v1315_v54, 0  ;;  %vm1320_vm6 = vcmp.eq.s32.totalorder %v1315_v54, 2  ;;  %v6232_v51 = vld [vmem:[%s5357_s12] ss:$0 sm:$0xff] }
 0x17f   : > { %v1309_v45 = vsel %vm6194_vm14, %v5582_v57, %v1306_v20  ;;  %v1419_v10 = vand.u32 3, %v1418_v62  ;;  %vm1316_vm3 = vcmp.lt.s32.totalorder %v1315_v54, 2  ;;  %v6223_v57 = vld [vmem:[%s8511_s7] ss:$0 sm:$0xff] }
 0x180   : > { %v1393_v6 = vclz %v4565_v41  ;;  %5012 = vcosq.f32 %v1309_v45 }
 0x181   : > { %5014 = vsinq.f32 %v1309_v45  ;;  %vm1424_vm4 = vcmp.eq.s32.totalorder %v1419_v10, 2  ;;  %vm1421_vm9 = vcmp.eq.s32.totalorder %v1419_v10, 0  ;;  %vm1420_vm7 = vcmp.lt.s32.totalorder %v1419_v10, 2 }
 0x182   : > { %v4566_v40 = vadd.s32 4294967294, %v1393_v6 }
 0x184   : > { %vm4567_vm12 = vcmp.lt.s32.totalorder %v4566_v40, 0 }
 0x185   : > { %v1396_v25 = vsel %vm4567_vm12, 0, %v4566_v40 }
 0x186   : > { %v1397_v16 = vsub.s32 32, %v1396_v25  ;;  %v1401_v17 = vsub.s32 4294967266, %v1396_v25  ;;  %v1398_v35 = vshll.u32 %v1389_v59, %v1396_v25 }
 0x188   : > { %v1399_v36 = vshrl.u32 %v1381_v7, %v1397_v16  ;;  %v1402_v61 = vadd.s32 127, %v1401_v17 }
 0x18a   : > { %v1400_v46 = vor.u32 %v1399_v36, %v1398_v35  ;;  %v1403_v26 = vshll.u32 %v1402_v61, 23  ;;  %v5013_v18 = vpop.eup %5012 }
 0x18b   : > { %v5015_v33 = vpop.eup %5014  ;;  %v1321_v60 = vxor.u32 2147483648, %v5013_v18 }
 0x18c   : > { %v1404_v50 = vor.u32 4788187, %v1403_v26  ;;  %v1407_v5 = vcvt.s32.f32 %v1400_v46  ;;  %v1318_v42 = vxor.u32 2147483648, %v5015_v33 }
 0x18d   : > { %v1322_v1 = vsel %vm1320_vm6, %v1321_v60, %v5015_v33 }
 0x18e   : > { %v1405_v48 = vand.u32 2147483647, %v1404_v50  ;;  %v1319_v49 = vsel %vm1317_vm2, %v5013_v18, %v1318_v42 }
 0x18f   : > { %v1323_v4 = vsel %vm1316_vm3, %v1319_v49, %v1322_v1 }
 0x190   : > { %v1408_v56 = vmul.f32 %v1407_v5, %v1405_v48  ;;  %v1324_v38 = vsel %vm1313_vm5, nan, %v1323_v4 }
 0x192   : > { %v1409_v43 = vxor.u32 2147483648, %v1408_v56 }
 0x194   : > { %v1410_v63 = vsel %vm1327_vm15, %v1409_v43, %v1408_v56 }
 0x195   : > { %v1413_v9 = vsel %vm1326_vm0, %v5575_v47, %v1410_v63 }
 0x196   : > { %5016 = vcosq.f32 %v1413_v9 }
 0x197   : > { %5018 = vsinq.f32 %v1413_v9 }
 0x1a0   : > { %v5017_v15 = vpop.eup %5016 }
 0x1a1   : > { %v5019_v19 = vpop.eup %5018  ;;  %v1425_v28 = vxor.u32 2147483648, %v5017_v15 }
 0x1a2   : > { %v1422_v12 = vxor.u32 2147483648, %v5019_v19 }
 0x1a3   : > { %v1426_v58 = vsel %vm1424_vm4, %v1425_v28, %v5019_v19 }
 0x1a4   : > { %v1423_v55 = vsel %vm1421_vm9, %v5017_v15, %v1422_v12 }
 0x1a5   : > { %v1427_v22 = vsel %vm1420_vm7, %v1423_v55, %v1426_v58 }
 0x1a6   : > { %v1428_v39 = vsel %vm1417_vm10, nan, %v1427_v22 }
 0x1a7   : > { %v1432_v30 = vpack.c.bf16 %v1428_v39, %v1324_v38 }
 0x1a9   : > { %4742 = vmatmul.mubr.msk.bf16.gmra.mrb[4].mxu0 %vm8546_vm11, %v1432_v30 }
 0x24a   : > { %v4739_v59 = vpop.f32.mrb[0].mxu0 }
 0x24b   : > { %v1512_v47 = vadd.f32 %v4739_v59, %v6223_v57  ;;  %v1503_v34 = vpop.f32.mrb[1].mxu0 }
 0x24c   : > { %v4740_v13 = vpop.f32.mrb[2].mxu0  ;;  %v1504_v61 = vadd.f32 %v6223_v57, %v1503_v34 }
 0x24d   : > { %v1536_v24 = vmul.f32 %v6226_v14, %v1512_v47  ;;  %v1515_v41 = vadd.f32 %v4740_v13, %v6223_v57  ;;  %v1506_v6 = vpop.f32.mrb[3].mxu0 }
 0x24e   : > { %v1534_v5 = vmul.f32 %v6226_v14, %v1504_v61  ;;  %v6250_v3 = vadd.f32 %v6223_v57, %v1506_v6 }
 0x24f   : > { %v6235_v40 = vadd.f32 %v6232_v51, %v1536_v24  ;;  %v1537_v25 = vmul.f32 %v6226_v14, %v1515_v41 }
 0x251   : > { %v1761_v20 = vand.u32 2139095040, %v6235_v40  ;;  %v6240_v7 = vadd.f32 %v6232_v51, %v1537_v25  ;;  %v8534_v53 = vand.u32 2147483647, %v6235_v40 }
 0x253   : > { %v1762_v16 = vshrl.u32 %v1761_v20, 23  ;;  %v1865_v17 = vand.u32 2139095040, %v6240_v7  ;;  %v1765_v46 = vand.u32 8388607, %v8534_v53  ;;  %v8533_v0 = vand.u32 2147483647, %v6240_v7 }
 0x255   : > { %v4583_v52 = vadd.s32 4294967169, %v1762_v16  ;;  %v1866_v35 = vshrl.u32 %v1865_v17, 23  ;;  %v1766_v37 = vor.u32 8388608, %v1765_v46  ;;  %v1869_v31 = vand.u32 8388607, %v8533_v0 }
 0x256   : > { %v6277_v16 = vadd.f32 %v6232_v51, %v1534_v5 }
 0x257   : > { %v1768_v36 = vadd.s32 1, %v4583_v52  ;;  %v4587_v45 = vadd.s32 4294967169, %v1866_v35  ;;  %v1806_v58 = vshll.u32 %v1766_v37, 8  ;;  %v1870_v17 = vor.u32 8388608, %v1869_v31 }
 0x259   : > { %vm1769_vm1 = vcmp.gt.s32.totalorder %v1768_v36, 0  ;;  %v1872_v50 = vadd.s32 1, %v4587_v45 }
 0x25a   : > { %v1770_v26 = vsel %vm1769_vm1, %v1768_v36, 0 }
 0x25b   : > { %v1772_v48 = vand.u32 31, %v1770_v26  ;;  %v1771_v56 = vshrl.u32 %v1770_v26, 5  ;;  %vm1873_vm8 = vcmp.gt.s32.totalorder %v1872_v50, 0 }
 0x25c   : > { %v1874_v19 = vsel %vm1873_vm8, %v1872_v50, 0 }
 0x25d   : > { %v1773_v29 = vsub.s32 32, %v1772_v48  ;;  %v1775_v43 = vshll.u32 %v8535_v8, %v1772_v48  ;;  %v1778_v63 = vshll.u32 %v8554_v32, %v1772_v48  ;;  %v1781_v18 = vshll.u32 %v8553_v27, %v1772_v48 }
 0x25e   : > { %v1784_v11 = vshll.u32 %v8556_v2, %v1772_v48  ;;  %v1787_v42 = vshll.u32 %v8543_v21, %v1772_v48  ;;  %vm1790_vm12 = vcmp.lt.s32.totalorder %v1771_v56, 1  ;;  %vm1793_vm13 = vcmp.lt.s32.totalorder %v1771_v56, 4 }
 0x25f   : > { %v1776_v23 = vshrl.u32 %v8554_v32, %v1773_v29  ;;  %v1779_v9 = vshrl.u32 %v8553_v27, %v1773_v29  ;;  %v1782_v33 = vshrl.u32 %v8556_v2, %v1773_v29  ;;  %v1785_v54 = vshrl.u32 %v8543_v21, %v1773_v29 }
 0x260   : > { %v1788_v60 = vshrl.u32 %v8555_v44, %v1773_v29  ;;  %v1774_v38 = vshrl.u32 %v8535_v8, %v1773_v29  ;;  %vm1792_vm14 = vcmp.lt.s32.totalorder %v1771_v56, 3  ;;  %vm1791_vm15 = vcmp.lt.s32.totalorder %v1771_v56, 2 }
 0x261   : > { %v1777_v62 = vor.u32 %v1776_v23, %v1775_v43  ;;  %v1780_v49 = vor.u32 %v1779_v9, %v1778_v63  ;;  %v1783_v1 = vor.u32 %v1782_v33, %v1781_v18  ;;  %v1786_v10 = vor.u32 %v1785_v54, %v1784_v11 }
 0x262   : > { %v1789_v15 = vor.u32 %v1788_v60, %v1787_v42  ;;  %v1876_v59 = vand.u32 31, %v1874_v19  ;;  %v1875_v52 = vshrl.u32 %v1874_v19, 5  ;;  %v1553_v18 = vand.u32 2139095040, %v6277_v16 }
 0x263   : > { %v1795_v4 = vsel %vm1793_vm13, %v1783_v1, 2102212464  ;;  %v1798_v28 = vsel %vm1790_vm12, %v1777_v62, %v1780_v49  ;;  %v1802_v12 = vsel %vm1790_vm12, %v1780_v49, %v1783_v1  ;;  %v1799_v55 = vsel %vm1793_vm13, %v1786_v10, 920167782 }
 0x264   : > { %v1803_v22 = vsel %vm1793_vm13, %v1789_v15, 1326507024  ;;  %v1800_v39 = vsel %vm1792_vm14, %v1783_v1, %v1799_v55  ;;  %v1794_v47 = vsel %vm1790_vm12, %v1774_v38, %v1777_v62  ;;  %v1796_v34 = vsel %vm1792_vm14, %v1780_v49, %v1795_v4 }
 0x265   : > { %v1804_v30 = vsel %vm1792_vm14, %v1786_v10, %v1803_v22  ;;  %v1801_v13 = vsel %vm1791_vm15, %v1798_v28, %v1800_v39  ;;  %v1877_v35 = vsub.s32 32, %v1876_v59  ;;  %v1797_v36 = vsel %vm1791_vm15, %v1794_v47, %v1796_v34 }
 0x266   : > { %v1805_v24 = vsel %vm1791_vm15, %v1802_v12, %v1804_v30  ;;  %v6272_v25 = vmul.u32.u64.low %v1806_v58, %v1801_v13  ;;  %v6273_v20 = vmul.u32.u64.high %v1806_v58, %v1801_v13, %v6272_v25  ;;  %v1879_v61 = vshll.u32 %v8535_v8, %v1876_v59 }
 0x267   : > { %v6269_v41 = vmul.u32.u64.low %v1806_v58, %v1805_v24  ;;  %v6270_v6 = vmul.u32.u64.high %v1806_v58, %v1805_v24, %v6269_v41  ;;  %v1882_v45 = vshll.u32 %v8554_v32, %v1876_v59  ;;  %v1885_v46 = vshll.u32 %v8553_v27, %v1876_v59 }
 0x268   : > { %v1880_v26 = vshrl.u32 %v8554_v32, %v1877_v35  ;;  %v1883_v50 = vshrl.u32 %v8553_v27, %v1877_v35  ;;  %v1886_v48 = vshrl.u32 %v8556_v2, %v1877_v35  ;;  %v1888_v37 = vshll.u32 %v8556_v2, %v1876_v59 }
 0x269   : > { %vm1815_vm0 = vc.u32 %v6270_v6, %v6272_v25  ;;  %v1816_v5 = vadd.s32 1, %v6273_v20  ;;  %v1889_v56 = vshrl.u32 %v8543_v21, %v1877_v35  ;;  %v1891_v29 = vshll.u32 %v8543_v21, %v1876_v59 }
 0x26a   : > { %v1881_v43 = vor.u32 %v1880_v26, %v1879_v61  ;;  %v1884_v63 = vor.u32 %v1883_v50, %v1882_v45  ;;  %v1887_v31 = vor.u32 %v1886_v48, %v1885_v46  ;;  %v1892_v23 = vshrl.u32 %v8555_v44, %v1877_v35  ;;  %v4982_v61 = vld [vmem:[%s8510_s6 + $0x10] sm:$0xff]  }
 0x26b   : > { %v1817_v9 = vsel %vm1815_vm0, %v1816_v5, %v6273_v20  ;;  %v1890_v33 = vor.u32 %v1889_v56, %v1888_v37  ;;  %v1910_v11 = vshll.u32 %v1870_v17, 8  ;;  %v1813_v54 = vmul.u32 %v1806_v58, %v1797_v36  ;;  %4745 = vmatprep.subr.bf16.mxu1 %v4982_v61 }
 0x26c   : > { %v1893_v42 = vor.u32 %v1892_v23, %v1891_v29  ;;  %vm1894_vm2 = vcmp.lt.s32.totalorder %v1875_v52, 1  ;;  %vm1897_vm6 = vcmp.lt.s32.totalorder %v1875_v52, 4  ;;  %vm1896_vm3 = vcmp.lt.s32.totalorder %v1875_v52, 3  ;;  %4746 = vmatpush3.bf16.msra.mxu1 %v4982_v61 }
 0x26d   : > { %v1902_v60 = vsel %vm1894_vm2, %v1881_v43, %v1884_v63  ;;  %v1903_v62 = vsel %vm1897_vm6, %v1890_v33, 920167782  ;;  %v1906_v49 = vsel %vm1894_vm2, %v1884_v63, %v1887_v31  ;;  %v1818_v1 = vadd.s32 %v1817_v9, %v1813_v54 }
 0x26e   : > { %vm1895_vm4 = vcmp.lt.s32.totalorder %v1875_v52, 2  ;;  %v1904_v10 = vsel %vm1896_vm3, %v1887_v31, %v1903_v62  ;;  %v1907_v15 = vsel %vm1897_vm6, %v1893_v42, 1326507024  ;;  %v1535_v28 = vmul.f32 %v6226_v14, %v6250_v3 }
 0x26f   : > { %v1905_v19 = vsel %vm1895_vm4, %v1902_v60, %v1904_v10  ;;  %v1908_v4 = vsel %vm1896_vm3, %v1890_v33, %v1907_v15  ;;  %v1554_v12 = vshrl.u32 %v1553_v18, 23  ;;  %v1819_v30 = vadd.s32 536870912, %v1818_v1 }
 0x270   : > { %v1909_v58 = vsel %vm1895_vm4, %v1906_v49, %v1908_v4  ;;  %v6304_v38 = vmul.u32.u64.low %v1910_v11, %v1905_v19  ;;  %v6305_v55 = vmul.u32.u64.high %v1910_v11, %v1905_v19, %v6304_v38  ;;  %v1899_v47 = vsel %vm1897_vm6, %v1887_v31, 2102212464  ;;  %v4983_v31 = vld [vmem:[%s8510_s6 + $0x18] sm:$0xff]  }
 0x271   : > { %v6308_v22 = vmul.u32.u64.low %v1910_v11, %v1909_v58  ;;  %v6309_v39 = vmul.u32.u64.high %v1910_v11, %v1909_v58, %v6308_v22  ;;  %v4575_v59 = vadd.s32 4294967169, %v1554_v12  ;;  %v6313_v34 = vadd.f32 %v6232_v51, %v1535_v28  ;;  %4747 = vmatprep.subr.bf16.mxu1 %v4983_v31 }
 0x272   : > { %v1878_v13 = vshrl.u32 %v8535_v8, %v1877_v35  ;;  %v6316_v3 = vshrl.u32 %v1819_v30, 30  ;;  %v1900_v41 = vsel %vm1896_vm3, %v1884_v63, %v1899_v47  ;;  %v1920_v17 = vadd.s32 1, %v6305_v55  ;;  %4748 = vmatpush3.bf16.msra.mxu1 %v4983_v31 }
 0x273   : > { %v1560_v20 = vadd.s32 1, %v4575_v59  ;;  %v1657_v36 = vand.u32 2139095040, %v6313_v34  ;;  %vm1919_vm5 = vc.u32 %v6309_v39, %v6304_v38  ;;  %v8532_v48 = vand.u32 2147483647, %v6277_v16 }
 0x274   : > { %v1898_v24 = vsel %vm1894_vm2, %v1878_v13, %v1881_v43  ;;  %v1821_v35 = vshll.u32 %v6316_v3, 30  ;;  %v1921_v37 = vsel %vm1919_vm5, %v1920_v17, %v6305_v55  ;;  %v6371_v17 = vadd.s32 %v6272_v25, %v6270_v6 }
 0x275   : > { %v1901_v45 = vsel %vm1895_vm4, %v1898_v24, %v1900_v41  ;;  %vm1561_vm9 = vcmp.gt.s32.totalorder %v1560_v20, 0  ;;  %v1658_v5 = vshrl.u32 %v1657_v36, 23  ;;  %v1557_v60 = vand.u32 8388607, %v8532_v48 }
 0x276   : > { %v1917_v43 = vmul.u32 %v1910_v11, %v1901_v45  ;;  %v6339_v23 = vsub.s32 %v1818_v1, %v1821_v35  ;;  %v1562_v18 = vsel %vm1561_vm9, %v1560_v20, 0 }
 0x277   : > { %v4579_v42 = vadd.s32 4294967169, %v1658_v5  ;;  %v6352_v1 = vand.u32 31, %v1562_v18  ;;  %v1558_v28 = vor.u32 8388608, %v1557_v60  ;;  %v6364_v24 = vshrl.u32 %v1562_v18, 5 }
 0x278   : > { %v1922_v33 = vadd.s32 %v1921_v37, %v1917_v43  ;;  %v1824_v49 = vsub.s32 0, %v6339_v23 }
 0x279   : > { %v1664_v19 = vadd.s32 1, %v4579_v42  ;;  %v6358_v22 = vsub.s32 32, %v6352_v1  ;;  %v6362_v13 = vshll.u32 %v1558_v28, 8  ;;  %v1567_v6 = vshll.u32 %v8535_v8, %v6352_v1 }
 0x27a   : > { %v1923_v10 = vadd.s32 536870912, %v1922_v33  ;;  %v4584_v55 = vmin.u32 %v1824_v49, %v6339_v23  ;;  %v1570_v25 = vshll.u32 %v8554_v32, %v6352_v1  ;;  %vm1582_vm5 = vcmp.lt.s32.totalorder %v6364_v24, 1 }
 0x27b   : > { %vm1665_vm7 = vcmp.gt.s32.totalorder %v1664_v19, 0  ;;  %v1568_v35 = vshrl.u32 %v8554_v32, %v6358_v22  ;;  %v6381_v5 = vshrl.u32 %v8535_v8, %v6358_v22  ;;  %v1574_v42 = vshrl.u32 %v8556_v2, %v6358_v22 }
 0x27c   : > { %v4743_v46 = vpop.f32.mrb[4].mxu0  ;;  %v6360_v30 = vshrl.u32 %v1923_v10, 30  ;;  %v1826_v36 = vclz %v4584_v55  ;;  %vm1585_vm9 = vcmp.lt.s32.totalorder %v6364_v24, 4 }
 0x27d   : > { %v1528_v26 = vadd.f32 %v4743_v46, %v6223_v57  ;;  %v1519_v50 = vpop.f32.mrb[5].mxu0  ;;  %v6376_v46 = vsel %vm1665_vm7, %v1664_v19, 0  ;;  %v6394_v18 = vor.u32 %v1568_v35, %v1567_v6 }
 0x27e   : > { %v1520_v56 = vadd.f32 %v6223_v57, %v1519_v50  ;;  %v4744_v29 = vpop.f32.mrb[6].mxu0  ;;  %8578 = vst [vmem:[#allocation5_spill] sm:$0xff] %v6360_v30  ;;  %v1925_v45 = vshll.u32 %v6360_v30, 30  ;;  %v6392_v31 = vadd.s32 4294967294, %v1826_v36 }
 0x27f   : > { %v1540_v63 = vmul.f32 %v6226_v14, %v1528_v26  ;;  %v6334_v52 = vpop.f32.mrb[7].mxu0  ;;  %v1531_v50 = vadd.f32 %v4744_v29, %v6223_v57  ;;  %v1573_v29 = vshll.u32 %v8553_v27, %v6352_v1 }
 0x280   : > { %v1538_v9 = vmul.f32 %v6226_v14, %v1520_v56  ;;  %v6398_v60 = vsub.s32 %v1922_v33, %v1925_v45  ;;  %vm4586_vm15 = vcmp.lt.s32.totalorder %v6392_v31, 0 }
 0x281   : > { %v6343_v54 = vadd.f32 %v6232_v51, %v1540_v63  ;;  %v1571_v63 = vshrl.u32 %v8553_v27, %v6358_v22  ;;  %v1541_v10 = vmul.f32 %v6226_v14, %v1531_v50 }
 0x282   : > { %v6346_v11 = vadd.f32 %v6232_v51, %v1538_v9  ;;  %v1928_v48 = vsub.s32 0, %v6398_v60 }
 0x283   : > { %v2177_v62 = vand.u32 2139095040, %v6343_v54  ;;  %v8531_v12 = vand.u32 2147483647, %v6343_v54 }
 0x284   : > { %v1969_v4 = vand.u32 2139095040, %v6346_v11  ;;  %v8530_v43 = vand.u32 2147483647, %v6346_v11 }
 0x285   : > { %v2178_v15 = vshrl.u32 %v2177_v62, 23  ;;  %v2181_v41 = vand.u32 8388607, %v8531_v12 }
 0x286   : > { %v1970_v47 = vshrl.u32 %v1969_v4, 23  ;;  %v1973_v33 = vand.u32 8388607, %v8530_v43 }
 0x287   : > { %v4599_v58 = vadd.s32 4294967169, %v2178_v15  ;;  %v2182_v56 = vor.u32 8388608, %v2181_v41 }
 0x288   : > { %v4591_v26 = vadd.s32 4294967169, %v1970_v47 }
 0x289   : > { %v2184_v59 = vadd.s32 1, %v4599_v58 }
 0x28a   : > { %v1976_v49 = vadd.s32 1, %v4591_v26 }
 0x28b   : > { %vm2185_vm10 = vcmp.gt.s32.totalorder %v2184_v59, 0 }
 0x28c   : > { %v2186_v61 = vsel %vm2185_vm10, %v2184_v59, 0  ;;  %v6407_v59 = vshll.u32 %v2182_v56, 8  ;;  %vm1977_vm1 = vcmp.gt.s32.totalorder %v1976_v49, 0 }
 0x28d   : > { %v2188_v37 = vand.u32 31, %v2186_v61  ;;  %v2187_v62 = vshrl.u32 %v2186_v61, 5 }
 0x28f   : > { %v2189_v9 = vsub.s32 32, %v2188_v37  ;;  %v2191_v15 = vshll.u32 %v8535_v8, %v2188_v37  ;;  %v2194_v4 = vshll.u32 %v8554_v32, %v2188_v37  ;;  %v2197_v58 = vshll.u32 %v8553_v27, %v2188_v37 }
 0x290   : > { %v2200_v36 = vshll.u32 %v8556_v2, %v2188_v37  ;;  %v2203_v45 = vshll.u32 %v8543_v21, %v2188_v37  ;;  %vm2206_vm8 = vcmp.lt.s32.totalorder %v2187_v62, 1  ;;  %vm2209_vm12 = vcmp.lt.s32.totalorder %v2187_v62, 4 }
 0x291   : > { %v2192_v19 = vshrl.u32 %v8554_v32, %v2189_v9  ;;  %v2195_v28 = vshrl.u32 %v8553_v27, %v2189_v9  ;;  %v2198_v55 = vshrl.u32 %v8556_v2, %v2189_v9  ;;  %v2201_v61 = vshrl.u32 %v8543_v21, %v2189_v9 }
 0x292   : > { %v2204_v26 = vshrl.u32 %v8555_v44, %v2189_v9  ;;  %v2190_v50 = vshrl.u32 %v8535_v8, %v2189_v9  ;;  %vm2207_vm13 = vcmp.lt.s32.totalorder %v2187_v62, 2  ;;  %vm2208_vm14 = vcmp.lt.s32.totalorder %v2187_v62, 3 }
 0x293   : > { %v2193_v47 = vor.u32 %v2192_v19, %v2191_v15  ;;  %v2196_v41 = vor.u32 %v2195_v28, %v2194_v4  ;;  %v2199_v35 = vor.u32 %v2198_v55, %v2197_v58  ;;  %v2202_v6 = vor.u32 %v2201_v61, %v2200_v36 }
 0x294   : > { %v2205_v56 = vor.u32 %v2204_v26, %v2203_v45  ;;  %v1978_v37 = vsel %vm1977_vm1, %v1976_v49, 0  ;;  %v1974_v61 = vor.u32 8388608, %v1973_v33  ;;  %v6435_v33 = vadd.s32 %v6304_v38, %v6309_v39 }
 0x295   : > { %v2211_v43 = vsel %vm2209_vm12, %v2199_v35, 2102212464  ;;  %v2214_v15 = vsel %vm2206_vm8, %v2193_v47, %v2196_v41  ;;  %v2210_v19 = vsel %vm2206_vm8, %v2190_v50, %v2193_v47  ;;  %v2215_v4 = vsel %vm2209_vm12, %v2202_v6, 920167782 }
 0x296   : > { %v2218_v28 = vsel %vm2206_vm8, %v2196_v41, %v2199_v35  ;;  %v2212_v12 = vsel %vm2208_vm14, %v2196_v41, %v2211_v43  ;;  %v2216_v58 = vsel %vm2208_vm14, %v2199_v35, %v2215_v4  ;;  %v2219_v55 = vsel %vm2209_vm12, %v2205_v56, 1326507024 }
 0x297   : > { %v2217_v9 = vsel %vm2207_vm13, %v2214_v15, %v2216_v58  ;;  %v2220_v36 = vsel %vm2208_vm14, %v2202_v6, %v2219_v55  ;;  %v6426_v47 = vadd.f32 %v6232_v51, %v1541_v10  ;;  %v2213_v43 = vsel %vm2207_vm13, %v2210_v19, %v2212_v12 }
 0x298   : > { %v2221_v45 = vsel %vm2207_vm13, %v2218_v28, %v2220_v36  ;;  %v6421_v26 = vmul.u32.u64.low %v6407_v59, %v2217_v9  ;;  %v6422_v0 = vmul.u32.u64.high %v6407_v59, %v2217_v9, %v6421_v26  ;;  %v1980_v35 = vand.u32 31, %v1978_v37 }
 0x299   : > { %8579 = vst [vmem:[#allocation6_spill] sm:$0xff] %v6426_v47  ;;  %v6430_v49 = vmul.u32.u64.low %v6407_v59, %v2221_v45  ;;  %v6431_v41 = vmul.u32.u64.high %v6407_v59, %v2221_v45, %v6430_v49  ;;  %v6437_v50 = vor.u32 %v1571_v63, %v1570_v25  ;;  %v6439_v6 = vor.u32 %v1574_v42, %v1573_v29 }
 0x29a   : > { %v1576_v56 = vshll.u32 %v8556_v2, %v6352_v1  ;;  %v6444_v10 = vmin.u32 %v1928_v48, %v6398_v60  ;;  %v1981_v12 = vsub.s32 32, %v1980_v35  ;;  %v6446_v62 = vshll.u32 %v1974_v61, 8 }
 0x29b   : > { %v1577_v15 = vshrl.u32 %v8543_v21, %v6358_v22  ;;  %v2229_v19 = vmul.u32 %v6407_v59, %v2213_v43  ;;  %v1979_v38 = vshrl.u32 %v1978_v37, 5  ;;  %v1983_v39 = vshll.u32 %v8535_v8, %v1980_v35 }
 0x29c   : > { %v2281_v25 = vand.u32 2139095040, %v6426_v47  ;;  %v2232_v63 = vadd.s32 1, %v6422_v0  ;;  %v1984_v48 = vshrl.u32 %v8554_v32, %v1981_v12  ;;  %v1986_v29 = vshll.u32 %v8554_v32, %v1980_v35 }
 0x29d   : > { %v1989_v42 = vshll.u32 %v8553_v27, %v1980_v35  ;;  %v1987_v4 = vshrl.u32 %v8553_v27, %v1981_v12  ;;  %v1990_v28 = vshrl.u32 %v8556_v2, %v1981_v12  ;;  %v1992_v59 = vshll.u32 %v8556_v2, %v1980_v35 }
 0x29e   : > { %v1993_v58 = vshrl.u32 %v8543_v21, %v1981_v12  ;;  %vm2231_vm0 = vc.u32 %v6431_v41, %v6421_v26  ;;  %v1985_v55 = vor.u32 %v1984_v48, %v1983_v39  ;;  %v1995_v37 = vshll.u32 %v8543_v21, %v1980_v35 }
 0x29f   : > { %v1996_v9 = vshrl.u32 %v8555_v44, %v1981_v12  ;;  %v1988_v36 = vor.u32 %v1987_v4, %v1986_v29  ;;  %v1991_v61 = vor.u32 %v1990_v28, %v1989_v42  ;;  %v2282_v43 = vshrl.u32 %v2281_v25, 23 }
 0x2a0   : > { %v1994_v45 = vor.u32 %v1993_v58, %v1992_v59  ;;  %vm1998_vm2 = vcmp.lt.s32.totalorder %v1979_v38, 1  ;;  %vm2000_vm6 = vcmp.lt.s32.totalorder %v1979_v38, 3  ;;  %vm2001_vm3 = vcmp.lt.s32.totalorder %v1979_v38, 4 }
 0x2a1   : > { %v1997_v49 = vor.u32 %v1996_v9, %v1995_v37  ;;  %v2233_v53 = vsel %vm2231_vm0, %v2232_v63, %v6422_v0  ;;  %v2006_v20 = vsel %vm1998_vm2, %v1985_v55, %v1988_v36  ;;  %v2010_v30 = vsel %vm1998_vm2, %v1988_v36, %v1991_v61 }
 0x2a2   : > { %v2007_v8 = vsel %vm2001_vm3, %v1994_v45, 920167782  ;;  %vm1999_vm4 = vcmp.lt.s32.totalorder %v1979_v38, 2  ;;  %v2003_v39 = vsel %vm2001_vm3, %v1991_v61, 2102212464  ;;  %v4603_v28 = vadd.s32 4294967169, %v2282_v43 }
 0x2a3   : > { %v2008_v35 = vsel %vm2000_vm6, %v1991_v61, %v2007_v8  ;;  %v2011_v48 = vsel %vm2001_vm3, %v1997_v49, 1326507024  ;;  %v8580_v29 = vmov 683565275   ;;  %v6473_v59 = vadd.s32 %v2233_v53, %v2229_v19 }
 0x2a4   : > { %v1982_v42 = vshrl.u32 %v8580_v29, %v1981_v12  ;;  %v2009_v25 = vsel %vm1999_vm4, %v2006_v20, %v2008_v35  ;;  %v2012_v4 = vsel %vm2000_vm6, %v1994_v45, %v2011_v48  ;;  %v2004_v8 = vsel %vm2000_vm6, %v1988_v36, %v2003_v39 }
 0x2a5   : > { %v2013_v0 = vsel %vm1999_vm4, %v2010_v30, %v2012_v4  ;;  %v6477_v63 = vmul.u32.u64.low %v6446_v62, %v2009_v25  ;;  %v6478_v58 = vmul.u32.u64.high %v6446_v62, %v2009_v25, %v6477_v63  ;;  %v2288_v20 = vadd.s32 1, %v4603_v28 }
 0x2a6   : > { %v2002_v37 = vsel %vm1998_vm2, %v1982_v42, %v1985_v55  ;;  %v6484_v12 = vmul.u32.u64.low %v6446_v62, %v2013_v0  ;;  %v6485_v9 = vmul.u32.u64.high %v6446_v62, %v2013_v0, %v6484_v12  ;;  %v1579_v53 = vshll.u32 %v8543_v21, %v6352_v1 }
 0x2a7   : > { %v1580_v30 = vshrl.u32 %v8555_v44, %v6358_v22  ;;  %v6495_v19 = vsel %vm4586_vm15, 0, %v6392_v31  ;;  %v8539_v55 = vand.u32 2147483647, %v6426_v47  ;;  %v6498_v36 = vor.u32 %v1577_v15, %v1576_v56 }
 0x2a8   : > { %v2235_v61 = vadd.s32 536870912, %v6473_v59  ;;  %v2005_v1 = vsel %vm1999_vm4, %v2002_v37, %v2004_v8  ;;  %v2024_v45 = vadd.s32 1, %v6478_v58  ;;  %vm2289_vm7 = vcmp.gt.s32.totalorder %v2288_v20, 0 }
 0x2a9   : > { %v1930_v22 = vclz %v6444_v10  ;;  %vm2023_vm10 = vc.u32 %v6485_v9, %v6477_v63  ;;  %v2290_v31 = vsel %vm2289_vm7, %v2288_v20, 0  ;;  %v1523_v43 = vadd.f32 %v6223_v57, %v6334_v52 }
 0x2aa   : > { %v2025_v56 = vsel %vm2023_vm10, %v2024_v45, %v6478_v58  ;;  %v2292_v15 = vand.u32 31, %v2290_v31  ;;  %v1581_v49 = vor.u32 %v1580_v30, %v1579_v53  ;;  %v6514_v38 = vsel %vm1582_vm5, %v6381_v5, %v6394_v18 }
 0x2ab   : > { %v1830_v39 = vsub.s32 32, %v6495_v19  ;;  %v2021_v10 = vmul.u32 %v6446_v62, %v2005_v1  ;;  %v6521_v35 = vsel %vm1585_vm9, %v6439_v6, 2102212464  ;;  %v6527_v57 = vsel %vm1582_vm5, %v6394_v18, %v6437_v50 }
 0x2ac   : > { %v1834_v52 = vsub.s32 4294967266, %v6495_v19  ;;  %v6530_v48 = vshrl.u32 %v2235_v61, 30  ;;  %v2285_v5 = vand.u32 8388607, %v8539_v55  ;;  %v2293_v42 = vsub.s32 32, %v2292_v15 }
 0x2ad   : > { %v4589_v62 = vadd.s32 4294967294, %v1930_v22  ;;  %v6534_v25 = vadd.s32 %v2025_v56, %v2021_v10  ;;  %v2295_v4 = vshll.u32 %v8580_v29, %v2292_v15  ;;  %v1539_v28 = vmul.f32 %v6226_v14, %v1523_v43 }
 0x2ae   : > { %v2296_v0 = vshrl.u32 %v8554_v32, %v2293_v42  ;;  %v2298_v18 = vshll.u32 %v8554_v32, %v2292_v15  ;;  %v2299_v58 = vshrl.u32 %v8553_v27, %v2293_v42  ;;  %v2301_v37 = vshll.u32 %v8553_v27, %v2292_v15 }
 0x2af   : > { %v2302_v8 = vshrl.u32 %v8556_v2, %v2293_v42  ;;  %v2304_v12 = vshll.u32 %v8556_v2, %v2292_v15  ;;  %v2305_v20 = vshrl.u32 %v8543_v21, %v2293_v42  ;;  %v2308_v53 = vshrl.u32 %v8555_v44, %v2293_v42 }
 0x2b0   : > { %v2237_v30 = vshll.u32 %v6530_v48, 30  ;;  %v2286_v61 = vor.u32 8388608, %v2285_v5  ;;  %v2291_v14 = vshrl.u32 %v2290_v31, 5  ;;  %v2307_v1 = vshll.u32 %v8543_v21, %v2292_v15 }
 0x2b1   : > { %v2297_v45 = vor.u32 %v2296_v0, %v2295_v4  ;;  %v2300_v22 = vor.u32 %v2299_v58, %v2298_v18  ;;  %v2303_v43 = vor.u32 %v2302_v8, %v2301_v37  ;;  %v2306_v56 = vor.u32 %v2305_v20, %v2304_v12 }
 0x2b2   : > { %v1832_v10 = vshrl.u32 %v6371_v17, %v1830_v39  ;;  %v2027_v55 = vadd.s32 536870912, %v6534_v25  ;;  %vm1584_vm1 = vcmp.lt.s32.totalorder %v6364_v24, 3  ;;  %v1591_v47 = vsel %vm1585_vm9, %v6498_v36, 920167782 }
 0x2b3   : > { %v1595_v5 = vsel %vm1585_vm9, %v1581_v49, 1326507024  ;;  %v1835_v31 = vadd.s32 127, %v1834_v52  ;;  %vm4590_vm8 = vcmp.lt.s32.totalorder %v4589_v62, 0  ;;  %v2309_v15 = vor.u32 %v2308_v53, %v2307_v1 }
 0x2b4   : > { %v6557_v4 = vadd.f32 %v6232_v51, %v1539_v28  ;;  %v6560_v0 = vsub.s32 %v6473_v59, %v2237_v30  ;;  %vm2310_vm12 = vcmp.lt.s32.totalorder %v2291_v14, 1  ;;  %vm2313_vm13 = vcmp.lt.s32.totalorder %v2291_v14, 4 }
 0x2b5   : > { %v2326_v17 = vshll.u32 %v2286_v61, 8  ;;  %vm2312_vm14 = vcmp.lt.s32.totalorder %v2291_v14, 3  ;;  %v2315_v39 = vsel %vm2313_vm13, %v2303_v43, 2102212464  ;;  %v2318_v18 = vsel %vm2310_vm12, %v2297_v45, %v2300_v22 }
 0x2b6   : > { %v2319_v58 = vsel %vm2313_vm13, %v2306_v56, 920167782  ;;  %v6563_v37 = vshrl.u32 %v2027_v55, 30  ;;  %v2294_v49 = vshrl.u32 %v8580_v29, %v2293_v42  ;;  %vm2311_vm15 = vcmp.lt.s32.totalorder %v2291_v14, 2 }
 0x2b7   : > { %v2320_v52 = vsel %vm2312_vm14, %v2303_v43, %v2319_v58  ;;  %vm1583_vm0 = vcmp.lt.s32.totalorder %v6364_v24, 2  ;;  %v2322_v59 = vsel %vm2310_vm12, %v2300_v22, %v2303_v43  ;;  %v2323_v28 = vsel %vm2313_vm13, %v2309_v15, 1326507024 }
 0x2b8   : > { %v2321_v51 = vsel %vm2311_vm15, %v2318_v18, %v2320_v52  ;;  %v2073_v8 = vand.u32 2139095040, %v6557_v4  ;;  %v1836_v12 = vshll.u32 %v1835_v31, 23  ;;  %v2314_v20 = vsel %vm2310_vm12, %v2294_v49, %v2297_v45 }
 0x2b9   : > { %v2316_v55 = vsel %vm2312_vm14, %v2300_v22, %v2315_v39  ;;  %v2324_v53 = vsel %vm2312_vm14, %v2306_v56, %v2323_v28  ;;  %v1933_v42 = vsel %vm4590_vm8, 0, %v4589_v62  ;;  %v2240_v43 = vsub.s32 0, %v6560_v0 }
 0x2ba   : > { %v2325_v30 = vsel %vm2311_vm15, %v2322_v59, %v2324_v53  ;;  %v6576_v61 = vmul.u32.u64.low %v2326_v17, %v2321_v51  ;;  %v6577_v1 = vmul.u32.u64.high %v2326_v17, %v2321_v51, %v6576_v61  ;;  %v2029_v15 = vshll.u32 %v6563_v37, 30 }
 0x2bb   : > { %v6582_v18 = vmul.u32.u64.low %v2326_v17, %v2325_v30  ;;  %v6583_v31 = vmul.u32.u64.high %v2326_v17, %v2325_v30, %v6582_v18  ;;  %v1831_v45 = vshll.u32 %v6339_v23, %v6495_v19  ;;  %v2317_v22 = vsel %vm2311_vm15, %v2314_v20, %v2316_v55 }
 0x2bc   : > { %v2074_v56 = vshrl.u32 %v2073_v8, 23  ;;  %v1592_v62 = vsel %vm1584_vm1, %v6439_v6, %v1591_v47  ;;  %v1837_v39 = vor.u32 4788187, %v1836_v12  ;;  %v1934_v58 = vsub.s32 32, %v1933_v42 }
 0x2bd   : > { %v1594_v49 = vsel %vm1582_vm5, %v6437_v50, %v6439_v6  ;;  %v1596_v52 = vsel %vm1584_vm1, %v6498_v36, %v1595_v5  ;;  %v1833_v51 = vor.u32 %v1832_v10, %v1831_v45  ;;  %v1938_v23 = vsub.s32 4294967266, %v1933_v42 }
 0x2be   : > { %v2336_v19 = vadd.s32 1, %v6577_v1  ;;  %v4595_v14 = vadd.s32 4294967169, %v2074_v56  ;;  %v4600_v59 = vmin.u32 %v2240_v43, %v6560_v0  ;;  %v6601_v47 = vsub.s32 %v6534_v25, %v2029_v15 }
 0x2bf   : > { %v2333_v28 = vmul.u32 %v2326_v17, %v2317_v22  ;;  %vm2335_vm2 = vc.u32 %v6583_v31, %v6576_v61  ;;  %v8542_v8 = vand.u32 2147483647, %v6557_v4  ;;  %v1588_v36 = vsel %vm1584_vm1, %v6437_v50, %v6521_v35 }
 0x2c0   : > { %v2337_v6 = vsel %vm2335_vm2, %v2336_v19, %v6577_v1  ;;  %v1593_v10 = vsel %vm1583_vm0, %v6527_v57, %v1592_v62  ;;  %v1838_v5 = vand.u32 2147483647, %v1837_v39  ;;  %v1936_v25 = vshrl.u32 %v6435_v33, %v1934_v58 }
 0x2c1   : > { %v2338_v17 = vadd.s32 %v2337_v6, %v2333_v28  ;;  %v2080_v12 = vadd.s32 1, %v4595_v14  ;;  %v1840_v20 = vcvt.s32.f32 %v1833_v51  ;;  %v1935_v55 = vshll.u32 %v6398_v60, %v1933_v42 }
 0x2c2   : > { %v6616_v53 = vadd.s32 127, %v1938_v23  ;;  %v1597_v30 = vsel %vm1583_vm0, %v1594_v49, %v1596_v52  ;;  %v2242_v1 = vclz %v4600_v59  ;;  %v2032_v50 = vsub.s32 0, %v6601_v47 }
 0x2c3   : > { %v2339_v35 = vadd.s32 536870912, %v2338_v17  ;;  %vm2081_vm6 = vcmp.gt.s32.totalorder %v2080_v12, 0  ;;  %v6622_v57 = vand.u32 31, %v6376_v46  ;;  %v2077_v33 = vand.u32 8388607, %v8542_v8 }
 0x2c4   : > { %v2082_v43 = vsel %vm2081_vm6, %v2080_v12, 0  ;;  %v6629_v60 = vsel %vm1583_vm0, %v6514_v38, %v1588_v36  ;;  %v6631_v42 = vmul.f32 %v1840_v20, %v1838_v5  ;;  %v6633_v15 = vor.u32 %v1936_v25, %v1935_v55 }
 0x2c5   : > { %v6635_v18 = vshrl.u32 %v2339_v35, 30  ;;  %v2084_v45 = vand.u32 31, %v2082_v43  ;;  %v6638_v22 = vmul.u32.u64.low %v6362_v13, %v1597_v30  ;;  %v6639_v56 = vmul.u32.u64.high %v6362_v13, %v1597_v30, %v6638_v22 }
 0x2c6   : > { %v6642_v62 = vmul.u32.u64.low %v6362_v13, %v1593_v10  ;;  %v6643_v39 = vmul.u32.u64.high %v6362_v13, %v1593_v10, %v6642_v62  ;;  %v1940_v24 = vshll.u32 %v6616_v53, 23  ;;  %v4601_v38 = vadd.s32 4294967294, %v2242_v1 }
 0x2c7   : > { %v4592_v58 = vmin.u32 %v2032_v50, %v6601_v47  ;;  %v2085_v49 = vsub.s32 32, %v2084_v45  ;;  %v2341_v52 = vshll.u32 %v6635_v18, 30  ;;  %v2078_v51 = vor.u32 8388608, %v2077_v33 }
 0x2c8   : > { %v2083_v23 = vshrl.u32 %v2082_v43, 5  ;;  %v2087_v19 = vshll.u32 %v8580_v29, %v2084_v45  ;;  %v2090_v59 = vshll.u32 %v8554_v32, %v2084_v45  ;;  %v2093_v6 = vshll.u32 %v8553_v27, %v2084_v45 }
 0x2c9   : > { %v2088_v14 = vshrl.u32 %v8554_v32, %v2085_v49  ;;  %v2091_v28 = vshrl.u32 %v8553_v27, %v2085_v49  ;;  %v2094_v36 = vshrl.u32 %v8556_v2, %v2085_v49  ;;  %v2096_v10 = vshll.u32 %v8556_v2, %v2084_v45 }
 0x2ca   : > { %v2097_v5 = vshrl.u32 %v8543_v21, %v2085_v49  ;;  %v2100_v25 = vshrl.u32 %v8555_v44, %v2085_v49  ;;  %v2099_v55 = vshll.u32 %v8543_v21, %v2084_v45  ;;  %v1605_v53 = vmul.u32 %v6362_v13, %v6629_v60 }
 0x2cb   : > { %v2089_v12 = vor.u32 %v2088_v14, %v2087_v19  ;;  %v2092_v20 = vor.u32 %v2091_v28, %v2090_v59  ;;  %vm4602_vm3 = vcmp.lt.s32.totalorder %v4601_v38, 0  ;;  %v6661_v30 = vsub.s32 %v2338_v17, %v2341_v52 }
 0x2cc   : > { %v2095_v1 = vor.u32 %v2094_v36, %v2093_v6  ;;  %v2098_v50 = vor.u32 %v2097_v5, %v2096_v10  ;;  %v2034_v35 = vclz %v4592_v58  ;;  %v2101_v33 = vor.u32 %v2100_v25, %v2099_v55 }
 0x2cd   : > { %vm2102_vm4 = vcmp.lt.s32.totalorder %v2083_v23, 1  ;;  %v2118_v43 = vshll.u32 %v2078_v51, 8  ;;  %vm2105_vm5 = vcmp.lt.s32.totalorder %v2083_v23, 4  ;;  %vm1607_vm9 = vc.u32 %v6639_v56, %v6642_v62 }
 0x2ce   : > { %v2110_v22 = vsel %vm2102_vm4, %v2089_v12, %v2092_v20  ;;  %v1608_v19 = vadd.s32 1, %v6643_v39  ;;  %v2086_v45 = vshrl.u32 %v8580_v29, %v2085_v49  ;;  %vm2104_vm7 = vcmp.lt.s32.totalorder %v2083_v23, 3 }
 0x2cf   : > { %v2107_v13 = vsel %vm2105_vm5, %v2095_v1, 2102212464  ;;  %v2111_v60 = vsel %vm2105_vm5, %v2098_v50, 920167782  ;;  %v2344_v17 = vsub.s32 0, %v6661_v30  ;;  %vm2103_vm10 = vcmp.lt.s32.totalorder %v2083_v23, 2 }
 0x2d0   : > { %v2112_v52 = vsel %vm2104_vm7, %v2095_v1, %v2111_v60  ;;  %v2114_v58 = vsel %vm2102_vm4, %v2092_v20, %v2095_v1  ;;  %v6669_v14 = vsel %vm4602_vm3, 0, %v4601_v38  ;;  %v2106_v51 = vsel %vm2102_vm4, %v2086_v45, %v2089_v12 }
 0x2d1   : > { %v2113_v59 = vsel %vm2103_vm10, %v2110_v22, %v2112_v52  ;;  %v2115_v28 = vsel %vm2105_vm5, %v2101_v33, 1326507024  ;;  %v2108_v6 = vsel %vm2104_vm7, %v2092_v20, %v2107_v13  ;;  %v6676_v49 = vor.u32 4788187, %v1940_v24 }
 0x2d2   : > { %v2116_v36 = vsel %vm2104_vm7, %v2098_v50, %v2115_v28  ;;  %v6672_v10 = vmul.u32.u64.low %v2118_v43, %v2113_v59  ;;  %v6673_v5 = vmul.u32.u64.high %v2118_v43, %v2113_v59, %v6672_v10  ;;  %v4593_v25 = vadd.s32 4294967294, %v2034_v35 }
 0x2d3   : > { %v2117_v55 = vsel %vm2103_vm10, %v2114_v58, %v2116_v36  ;;  %v1609_v38 = vsel %vm1607_vm9, %v1608_v19, %v6643_v39  ;;  %v4604_v12 = vmin.u32 %v2344_v17, %v6661_v30  ;;  %v6688_v50 = vshrl.u32 %v6376_v46, 5 }
 0x2d4   : > { %v6684_v1 = vmul.u32.u64.low %v2118_v43, %v2117_v55  ;;  %v6685_v33 = vmul.u32.u64.high %v2118_v43, %v2117_v55, %v6684_v1  ;;  %v1610_v20 = vadd.s32 %v1609_v38, %v1605_v53  ;;  %v2246_v24 = vsub.s32 32, %v6669_v14 }
 0x2d5   : > { %v2250_v35 = vsub.s32 4294967266, %v6669_v14  ;;  %v2109_v22 = vsel %vm2103_vm10, %v2106_v51, %v2108_v6  ;;  %v1669_v13 = vsub.s32 32, %v6622_v57  ;;  %v2128_v39 = vadd.s32 1, %v6673_v5 }
 0x2d6   : > { %v1611_v19 = vadd.s32 536870912, %v1610_v20  ;;  %v2230_v46 = vadd.s32 %v6421_v26, %v6431_v41  ;;  %vm4594_vm1 = vcmp.lt.s32.totalorder %v4593_v25, 0  ;;  %v2346_v17 = vclz %v4604_v12 }
 0x2d7   : > { %v2125_v52 = vmul.u32 %v2118_v43, %v2109_v22  ;;  %vm2127_vm8 = vc.u32 %v6685_v33, %v6672_v10  ;;  %v6708_v59 = vadd.s32 127, %v2250_v35  ;;  %v6711_v6 = vsel %vm4594_vm1, 0, %v4593_v25 }
 0x2d8   : > { %v6702_v23 = vshrl.u32 %v1611_v19, 30  ;;  %v6706_v51 = vshrl.u32 %v2230_v46, %v2246_v24  ;;  %v2129_v28 = vsel %vm2127_vm8, %v2128_v39, %v6673_v5  ;;  %v1672_v43 = vshrl.u32 %v8554_v32, %v1669_v13 }
 0x2d9   : > { %v2130_v26 = vadd.s32 %v2129_v28, %v2125_v52  ;;  %v1675_v36 = vshrl.u32 %v8553_v27, %v1669_v13  ;;  %v1678_v55 = vshrl.u32 %v8556_v2, %v1669_v13  ;;  %v1680_v38 = vshll.u32 %v8556_v2, %v6622_v57 }
 0x2da   : > { %v1613_v41 = vshll.u32 %v6702_v23, 30  ;;  %v1681_v12 = vshrl.u32 %v8543_v21, %v1669_v13  ;;  %v4605_v1 = vadd.s32 4294967294, %v2346_v17  ;;  %v1671_v5 = vshll.u32 %v8580_v29, %v6622_v57 }
 0x2db   : > { %v2131_v24 = vadd.s32 536870912, %v2130_v26  ;;  %v1674_v25 = vshll.u32 %v8554_v32, %v6622_v57  ;;  %v1677_v22 = vshll.u32 %v8553_v27, %v6622_v57  ;;  %v1684_v19 = vshrl.u32 %v8555_v44, %v1669_v13 }
 0x2dc   : > { %v6720_v35 = vsub.s32 %v1610_v20, %v1613_v41  ;;  %v1682_v39 = vor.u32 %v1681_v12, %v1680_v38  ;;  %v2252_v46 = vshll.u32 %v6708_v59, 23  ;;  %v8581_v20 = vand.u32 2147483647, %v6313_v34 }
 0x2dd   : > { %v6730_v52 = vshrl.u32 %v2131_v24, 30  ;;  %v1673_v41 = vor.u32 %v1672_v43, %v1671_v5  ;;  %v1676_v8 = vor.u32 %v1675_v36, %v1674_v25  ;;  %v1679_v45 = vor.u32 %v1678_v55, %v1677_v22 }
 0x2de   : > { %v1616_v17 = vsub.s32 0, %v6720_v35  ;;  %v1661_v28 = vand.u32 8388607, %v8581_v20  ;;  %v1683_v58 = vshll.u32 %v8543_v21, %v6622_v57  ;;  %v2042_v53 = vsub.s32 4294967266, %v6711_v6 }
 0x2df   : > { %v2133_v38 = vshll.u32 %v6730_v52, 30  ;;  %vm1689_vm12 = vcmp.lt.s32.totalorder %v6688_v50, 4  ;;  %vm4606_vm13 = vcmp.lt.s32.totalorder %v4605_v1, 0  ;;  %v1670_v59 = vshrl.u32 %v8580_v29, %v1669_v13 }
 0x2e0   : > { %v4576_v12 = vmin.u32 %v1616_v17, %v6720_v35  ;;  %v1685_v24 = vor.u32 %v1684_v19, %v1683_v58  ;;  %v1695_v43 = vsel %vm1689_vm12, %v1682_v39, 920167782  ;;  %vm1686_vm14 = vcmp.lt.s32.totalorder %v6688_v50, 1 }
 0x2e1   : > { %v6744_v36 = vsub.s32 %v2130_v26, %v2133_v38  ;;  %vm1688_vm15 = vcmp.lt.s32.totalorder %v6688_v50, 3  ;;  %v2038_v57 = vsub.s32 32, %v6711_v6  ;;  %v1662_v5 = vor.u32 8388608, %v1661_v28 }
 0x2e2   : > { %v1618_v55 = vclz %v4576_v12  ;;  %v1694_v25 = vsel %vm1686_vm14, %v1673_v41, %v1676_v8  ;;  %v1696_v13 = vsel %vm1688_vm15, %v1679_v45, %v1695_v43  ;;  %v2043_v58 = vadd.s32 127, %v2042_v53 }
 0x2e3   : > { %v6753_v22 = vsel %vm4606_vm13, 0, %v4605_v1  ;;  %v2136_v26 = vsub.s32 0, %v6744_v36  ;;  %vm1687_vm0 = vcmp.lt.s32.totalorder %v6688_v50, 2  ;;  %v1691_v17 = vsel %vm1689_vm12, %v1679_v45, 2102212464 }
 0x2e4   : > { %v4577_v19 = vadd.s32 4294967294, %v1618_v55  ;;  %v1698_v20 = vsel %vm1686_vm14, %v1676_v8, %v1679_v45  ;;  %v1699_v28 = vsel %vm1689_vm12, %v1685_v24, 1326507024  ;;  %v1697_v53 = vsel %vm1687_vm0, %v1694_v25, %v1696_v13 }
 0x2e5   : > { %v4596_v38 = vmin.u32 %v2136_v26, %v6744_v36  ;;  %v1700_v1 = vsel %vm1688_vm15, %v1682_v39, %v1699_v28  ;;  %v2354_v12 = vsub.s32 4294967266, %v6753_v22  ;;  %v1702_v21 = vshll.u32 %v1662_v5, 8 }
 0x2e6   : > { %vm4578_vm2 = vcmp.lt.s32.totalorder %v4577_v19, 0  ;;  %v1701_v55 = vsel %vm1687_vm0, %v1698_v20, %v1700_v1  ;;  %v1690_v24 = vsel %vm1686_vm14, %v1670_v59, %v1673_v41  ;;  %v1692_v26 = vsel %vm1688_vm15, %v1676_v8, %v1691_v17 }
 0x2e7   : > { %v1621_v43 = vsel %vm4578_vm2, 0, %v4577_v19  ;;  %v2138_v45 = vclz %v4596_v38  ;;  %v6775_v44 = vmul.u32.u64.low %v1702_v21, %v1701_v55  ;;  %v6776_v25 = vmul.u32.u64.high %v1702_v21, %v1701_v55, %v6775_v44 }
 0x2e8   : > { %v1626_v60 = vsub.s32 4294967266, %v1621_v43  ;;  %v6778_v13 = vmul.u32.u64.low %v1702_v21, %v1697_v53  ;;  %v6779_v39 = vmul.u32.u64.high %v1702_v21, %v1697_v53, %v6778_v13  ;;  %v8582_v19 = vand.u32 2147483647, %v6676_v49 }
 0x2e9   : > { %v8583_v20 = vcvt.s32.f32 %v6633_v15  ;;  %v8584_v28 = vshll.u32 %v6560_v0, %v6669_v14  ;;  %v2022_v8 = vadd.s32 %v6477_v63, %v6485_v9  ;;  %v4597_v59 = vadd.s32 4294967294, %v2138_v45 }
 0x2ea   : > { %v2253_v44 = vor.u32 4788187, %v2252_v46  ;;  %v2044_v17 = vshll.u32 %v2043_v58, 23  ;;  %v1627_v38 = vadd.s32 127, %v1626_v60  ;;  %v1693_v53 = vsel %vm1687_vm0, %v1690_v24, %v1692_v26 }
 0x2eb   : > { %v6786_v5 = vmul.f32 %v8583_v20, %v8582_v19  ;;  %v2249_v41 = vor.u32 %v6706_v51, %v8584_v28  ;;  %v2039_v15 = vshll.u32 %v6601_v47, %v6711_v6  ;;  %v2040_v49 = vshrl.u32 %v2022_v8, %v2038_v57 }
 0x2ec   : > { %v2355_v1 = vadd.s32 127, %v2354_v12  ;;  %vm4598_vm6 = vcmp.lt.s32.totalorder %v4597_v59, 0  ;;  %vm1760_vm3 = vcmp.lt.s32.totalorder %v6235_v40, 0  ;;  %v1622_v14 = vsub.s32 32, %v1621_v43 }
 0x2ed   : > { %v2141_v0 = vsel %vm4598_vm6, 0, %v4597_v59  ;;  %vm1711_vm4 = vc.u32 %v6776_v25, %v6778_v13  ;;  %v1712_v63 = vadd.s32 1, %v6779_v39  ;;  %v1606_v50 = vadd.s32 %v6642_v62, %v6639_v56 }
 0x2ee   : > { %v2142_v9 = vsub.s32 32, %v2141_v0  ;;  %v2146_v60 = vsub.s32 4294967266, %v2141_v0  ;;  %v1709_v51 = vmul.u32 %v1702_v21, %v1693_v53  ;;  %v2045_v46 = vor.u32 4788187, %v2044_v17 }
 0x2ef   : > { %v2350_v47 = vsub.s32 32, %v6753_v22  ;;  %v1628_v6 = vshll.u32 %v1627_v38, 23  ;;  %v1713_v57 = vsel %vm1711_vm4, %v1712_v63, %v6779_v39  ;;  %v2254_v58 = vand.u32 2147483647, %v2253_v44 }
 0x2f0   : > { %v2126_v12 = vadd.s32 %v6672_v10, %v6685_v33  ;;  %v2147_v55 = vadd.s32 127, %v2146_v60  ;;  %v1714_v45 = vadd.s32 %v1713_v57, %v1709_v51  ;;  %v2041_v24 = vor.u32 %v2040_v49, %v2039_v15 }
 0x2f1   : > { %v2334_v26 = vadd.s32 %v6576_v61, %v6583_v31  ;;  %v2356_v19 = vshll.u32 %v2355_v1, 23  ;;  %v1624_v20 = vshrl.u32 %v1606_v50, %v1622_v14  ;;  %v2256_v56 = vcvt.s32.f32 %v2249_v41 }
 0x2f2   : > { %v2144_v21 = vshrl.u32 %v2126_v12, %v2142_v9  ;;  %v2148_v62 = vshll.u32 %v2147_v55, 23  ;;  %v1715_v28 = vadd.s32 536870912, %v1714_v45  ;;  %v2046_v8 = vand.u32 2147483647, %v2045_v46 }
 0x2f3   : > { %v2352_v59 = vshrl.u32 %v2334_v26, %v2350_v47  ;;  %v1623_v39 = vshll.u32 %v6720_v35, %v1621_v43  ;;  %v1629_v44 = vor.u32 4788187, %v1628_v6  ;;  %v2257_v17 = vmul.f32 %v2256_v56, %v2254_v58 }
 0x2f4   : > { %v2143_v10 = vshll.u32 %v6744_v36, %v2141_v0  ;;  %v2149_v33 = vor.u32 4788187, %v2148_v62  ;;  %v6812_v38 = vshrl.u32 %v1715_v28, 30  ;;  %v2048_v53 = vcvt.s32.f32 %v2041_v24 }
 0x2f5   : > { %v2351_v61 = vshll.u32 %v6661_v30, %v6753_v22  ;;  %v2357_v31 = vor.u32 4788187, %v2356_v19  ;;  %v1625_v41 = vor.u32 %v1624_v20, %v1623_v39  ;;  %v8585_v15 = vxor.u32 2147483648, %v6631_v42 }
 0x2f6   : > { %v1946_v35 = vxor.u32 2147483648, %v6786_v5  ;;  %v2145_v43 = vor.u32 %v2144_v21, %v2143_v10  ;;  %v1717_v36 = vshll.u32 %v6812_v38, 30  ;;  %v8586_v1 = vand.u32 2147483647, %v6235_v40 }
 0x2f7   : > { %v1843_v49 = vsel %vm1760_vm3, %v8585_v15, %v6631_v42  ;;  %v2049_v30 = vmul.f32 %v2048_v53, %v2046_v8  ;;  %v2353_v22 = vor.u32 %v2352_v59, %v2351_v61  ;;  %v1630_v14 = vand.u32 2147483647, %v1629_v44  ;;  %v8601_v53 = vld [vmem:[#allocation6_spill] sm:$0xff] }
 0x2f8   : > { %vm6825_vm5 = vcmp.le.f32.partialorder %v8586_v1, 0.7853982  ;;  %vm1864_vm9 = vcmp.lt.s32.totalorder %v6240_v7, 0  ;;  %v2258_v63 = vxor.u32 2147483648, %v2257_v17  ;;  %v2150_v9 = vand.u32 2147483647, %v2149_v33 }
 0x2f9   : > { %v6830_v60 = vsub.s32 %v1714_v45, %v1717_v36  ;;  %v1846_v42 = vsel %vm6825_vm5, %v6235_v40, %v1843_v49  ;;  %v8589_v50 = vand.u32 2147483647, %v6240_v7  ;;  %v2358_v46 = vand.u32 2147483647, %v2357_v31 }
 0x2fa   : > { %vm1552_vm10 = vcmp.lt.s32.totalorder %v6277_v16, 0  ;;  %v1632_v47 = vcvt.s32.f32 %v1625_v41  ;;  %v1947_v6 = vsel %vm1864_vm9, %v1946_v35, %v6786_v5  ;;  %vm2176_vm1 = vcmp.lt.s32.totalorder %v6343_v54, 0 }
 0x2fb   : > { %vm6837_vm7 = vcmp.le.f32.partialorder %v8589_v50, 0.7853982  ;;  %v2152_v57 = vcvt.s32.f32 %v2145_v43  ;;  %v1720_v58 = vsub.s32 0, %v6830_v60  ;;  %vm1968_vm8 = vcmp.lt.s32.totalorder %v6346_v11, 0 }
 0x2fc   : > { %v2050_v12 = vxor.u32 2147483648, %v2049_v30  ;;  %v2360_v55 = vcvt.s32.f32 %v2353_v22  ;;  %v1633_v45 = vmul.f32 %v1632_v47, %v1630_v14  ;;  %5020 = vcosq.f32 %v1846_v42 }
 0x2fd   : > { %v2259_v24 = vsel %vm2176_vm1, %v2258_v63, %v2257_v17  ;;  %v2153_v26 = vmul.f32 %v2152_v57, %v2150_v9  ;;  %v8592_v19 = vand.u32 2147483647, %v6277_v16  ;;  %v4580_v5 = vmin.u32 %v1720_v58, %v6830_v60  ;;  %v8605_v63 = vld [vmem:[#allocation5_spill] sm:$0xff] }
 0x2fe   : > { %5022 = vsinq.f32 %v1846_v42  ;;  %v1950_v56 = vsel %vm6837_vm7, %v6240_v7, %v1947_v6  ;;  %v2361_v21 = vmul.f32 %v2360_v55, %v2358_v46  ;;  %v1844_v62 = vsub.s32 4, %v6316_v3 }
 0x2ff   : > { %vm6852_vm12 = vcmp.le.f32.partialorder %v8592_v19, 0.7853982  ;;  %v8595_v28 = vand.u32 2147483647, %v6343_v54  ;;  %v8598_v59 = vand.u32 2147483647, %v6346_v11  ;;  %v1722_v17 = vclz %v4580_v5 }
 0x300   : > { %v1636_v44 = vsub.s32 4, %v6702_v23  ;;  %v2051_v33 = vsel %vm1968_vm8, %v2050_v12, %v2049_v30  ;;  %vm2280_vm15 = vcmp.lt.s32.totalorder %v8601_v53, 0  ;;  %v1634_v61 = vxor.u32 2147483648, %v1633_v45 }
 0x301   : > { %vm6863_vm13 = vcmp.le.f32.partialorder %v8595_v28, 0.7853982  ;;  %vm6869_vm14 = vcmp.le.f32.partialorder %v8598_v59, 0.7853982  ;;  %5024 = vcosq.f32 %v1950_v56  ;;  %v8602_v31 = vand.u32 2147483647, %v8601_v53 }
 0x302   : > { %v2262_v10 = vsel %vm6863_vm13, %v6343_v54, %v2259_v24  ;;  %v2154_v15 = vxor.u32 2147483648, %v2153_v26  ;;  %v4581_v49 = vadd.s32 4294967294, %v1722_v17  ;;  %5026 = vsinq.f32 %v1950_v56 }
 0x303   : > { %vm6882_vm0 = vcmp.le.f32.partialorder %v8602_v31, 0.7853982  ;;  %v2362_v35 = vxor.u32 2147483648, %v2361_v21  ;;  %vm2072_vm2 = vcmp.lt.s32.totalorder %v6557_v4, 0  ;;  %v1845_v43 = vsel %vm1760_vm3, %v1844_v62, %v6316_v3 }
 0x304   : > { %5028 = vcosq.f32 %v2262_v10  ;;  %v2054_v36 = vsel %vm6869_vm14, %v6346_v11, %v2051_v33  ;;  %v1637_v1 = vsel %vm1552_vm10, %v1636_v44, %v6702_v23  ;;  %vm4582_vm6 = vcmp.lt.s32.totalorder %v4581_v49, 0 }
 0x305   : > { %v1635_v30 = vsel %vm1552_vm10, %v1634_v61, %v1633_v45  ;;  %v1710_v22 = vadd.s32 %v6778_v13, %v6776_v25  ;;  %v1725_v14 = vsel %vm4582_vm6, 0, %v4581_v49  ;;  %v1948_v9 = vsub.s32 4, %v8605_v63 }
 0x306   : > { %v2155_v3 = vsel %vm2072_vm2, %v2154_v15, %v2153_v26  ;;  %v1726_v42 = vsub.s32 32, %v1725_v14  ;;  %v1730_v50 = vsub.s32 4294967266, %v1725_v14  ;;  %v1847_v46 = vsel %vm6825_vm5, 0, %v1845_v43  ;;  %v5021_v13 = vpop.eup %5020 }
 0x307   : > { %5030 = vsinq.f32 %v2262_v10  ;;  %v2363_v23 = vsel %vm2280_vm15, %v2362_v35, %v2361_v21  ;;  %v8606_v47 = vand.u32 2147483647, %v6557_v4  ;;  %v1639_v25 = vsel %vm6852_vm12, 0, %v1637_v1 }
 0x308   : > { %v1638_v57 = vsel %vm6852_vm12, %v6277_v16, %v1635_v30  ;;  %v1727_v0 = vshll.u32 %v6830_v60, %v1725_v14  ;;  %v1728_v58 = vshrl.u32 %v1710_v22, %v1726_v42  ;;  %v1731_v12 = vadd.s32 127, %v1730_v50  ;;  %v5023_v55 = vpop.eup %5022 }
 0x309   : > { %vm6909_vm3 = vcmp.le.f32.partialorder %v8606_v47, 0.7853982  ;;  %5032 = vcosq.f32 %v2054_v36  ;;  %vm1656_vm4 = vcmp.lt.s32.totalorder %v6313_v34, 0  ;;  %v1851_v24 = vadd.s32 3, %v1847_v46 }
 0x30a   : > { %v2158_v45 = vsel %vm6909_vm3, %v6557_v4, %v2155_v3  ;;  %v1729_v26 = vor.u32 %v1728_v58, %v1727_v0  ;;  %v1732_v19 = vshll.u32 %v1731_v12, 23  ;;  %v1740_v5 = vsub.s32 4, %v6812_v38 }
 0x30b   : > { %v1949_v20 = vsel %vm1864_vm9, %v1948_v9, %v8605_v63  ;;  %v2366_v60 = vsel %vm6882_vm0, %v8601_v53, %v2363_v23  ;;  %5034 = vcosq.f32 %v1638_v57  ;;  %v1643_v56 = vadd.s32 3, %v1639_v25  ;;  %v6931_v62 = vpop.eup %5024 }
 0x30c   : > { %v2156_v21 = vsub.s32 4, %v6730_v52  ;;  %5036 = vcosq.f32 %v2158_v45  ;;  %v1733_v28 = vor.u32 4788187, %v1732_v19  ;;  %v1855_v59 = vxor.u32 2147483648, %v5023_v55  ;;  %v6933_v17 = vpop.eup %5026 }
 0x30d   : > { %v1858_v44 = vxor.u32 2147483648, %v5021_v13  ;;  %5038 = vsinq.f32 %v2158_v45  ;;  %v1852_v10 = vand.u32 3, %v1851_v24  ;;  %v1951_v33 = vsel %vm6837_vm7, 0, %v1949_v20 }
 0x30e   : > { %v2052_v61 = vsub.s32 4, %v6563_v37  ;;  %v6938_v31 = vpop.eup %5028  ;;  %5040 = vsinq.f32 %v1638_v57  ;;  %v1734_v15 = vand.u32 2147483647, %v1733_v28  ;;  %v1736_v49 = vcvt.s32.f32 %v1729_v26 }
 0x30f   : > { %v1741_v35 = vsel %vm1656_vm4, %v1740_v5, %v6812_v38  ;;  %5042 = vsinq.f32 %v2054_v36  ;;  %v8609_v43 = vand.u32 2147483647, %v6313_v34  ;;  %v2157_v51 = vsel %vm2072_vm2, %v2156_v21, %v6730_v52 }
 0x310   : > { %5044 = vcosq.f32 %v2366_v60  ;;  %v6952_v30 = vand.u32 3, %v1643_v56  ;;  %v1737_v22 = vmul.f32 %v1736_v49, %v1734_v15  ;;  %v1955_v14 = vadd.s32 3, %v1951_v33 }
 0x311   : > { %vm6945_vm5 = vcmp.le.f32.partialorder %v8609_v43, 0.7853982  ;;  %v6954_v63 = vpop.eup %5030  ;;  %vm1854_vm9 = vcmp.eq.s32.totalorder %v1852_v10, 0  ;;  %vm1857_vm7 = vcmp.eq.s32.totalorder %v1852_v10, 2  ;;  %v2053_v36 = vsel %vm1968_vm8, %v2052_v61, %v6563_v37 }
 0x312   : > { %v1743_v38 = vsel %vm6945_vm5, 0, %v1741_v35  ;;  %v1738_v9 = vxor.u32 2147483648, %v1737_v22  ;;  %v1856_v3 = vsel %vm1854_vm9, %v5021_v13, %v1855_v59  ;;  %v1859_v42 = vsel %vm1857_vm7, %v1858_v44, %v5023_v55 }
 0x313   : > { %v2159_v52 = vsel %vm6909_vm3, 0, %v2157_v51  ;;  %v6963_v50 = vpop.eup %5032  ;;  %5046 = vsinq.f32 %v2366_v60  ;;  %vm1853_vm10 = vcmp.lt.s32.totalorder %v1852_v10, 2  ;;  %v1747_v23 = vadd.s32 3, %v1743_v38 }
 0x314   : > { %v1739_v46 = vsel %vm1656_vm4, %v1738_v9, %v1737_v22  ;;  %v2055_v47 = vsel %vm6869_vm14, 0, %v2053_v36  ;;  %v2364_v25 = vsub.s32 4, %v6635_v18  ;;  %v1860_v6 = vsel %vm1853_vm10, %v1856_v3, %v1859_v42 }
 0x315   : > { %v5035_v37 = vpop.eup %5034  ;;  %v1742_v13 = vsel %vm6945_vm5, %v6313_v34, %v1739_v46  ;;  %v1956_v57 = vand.u32 3, %v1955_v14  ;;  %v2163_v0 = vadd.s32 3, %v2159_v52  ;;  %vm1646_vm8 = vcmp.eq.s32.totalorder %v6952_v30, 0 }
 0x316   : > { %v5037_v58 = vpop.eup %5036  ;;  %5048 = vcosq.f32 %v1742_v13  ;;  %v1959_v12 = vxor.u32 2147483648, %v6933_v17  ;;  %v2260_v55 = vsub.s32 4, %v6530_v48  ;;  %vm1649_vm12 = vcmp.eq.s32.totalorder %v6952_v30, 2 }
 0x317   : > { %v5039_v39 = vpop.eup %5038  ;;  %5050 = vsinq.f32 %v1742_v13  ;;  %vm1850_vm14 = vweird.f32 %v6235_v40  ;;  %v2059_v45 = vadd.s32 3, %v2055_v47  ;;  %v6978_v26 = vand.u32 3, %v1747_v23 }
 0x318   : > { %v5041_v24 = vpop.eup %5040  ;;  %v6980_v19 = vsel %vm1850_vm14, nan, %v1860_v6  ;;  %v1962_v5 = vxor.u32 2147483648, %v6931_v62  ;;  %v2365_v20 = vsel %vm2280_vm15, %v2364_v25, %v6635_v18  ;;  %vm1645_vm2 = vcmp.lt.s32.totalorder %v6952_v30, 2 }
 0x319   : > { %v5043_v60 = vpop.eup %5042  ;;  %vm1957_vm6 = vcmp.lt.s32.totalorder %v1956_v57, 2  ;;  %vm1958_vm3 = vcmp.eq.s32.totalorder %v1956_v57, 0  ;;  %vm1961_vm4 = vcmp.eq.s32.totalorder %v1956_v57, 2  ;;  %v2164_v56 = vand.u32 3, %v2163_v0 }
 0x31a   : > { %v6987_v40 = vpop.eup %5044  ;;  %v1960_v21 = vsel %vm1958_vm3, %v6931_v62, %v1959_v12  ;;  %v2167_v28 = vxor.u32 2147483648, %v5039_v39  ;;  %v2170_v59 = vxor.u32 2147483648, %v5037_v58  ;;  %v2261_v44 = vsel %vm2176_vm1, %v2260_v55, %v6530_v48 }
 0x31b   : > { %v1647_v10 = vxor.u32 2147483648, %v5041_v24  ;;  %v1650_v33 = vxor.u32 2147483648, %v5035_v37  ;;  %vm1954_vm15 = vweird.f32 %v6240_v7  ;;  %v2060_v18 = vand.u32 3, %v2059_v45 }
 0x31c   : > { %v2367_v61 = vsel %vm6882_vm0, 0, %v2365_v20  ;;  %vm1642_vm5 = vweird.f32 %v6277_v16  ;;  %vm1749_vm9 = vcmp.lt.s32.totalorder %v6978_v26, 2  ;;  %v1963_v62 = vsel %vm1961_vm4, %v1962_v5, %v6933_v17 }
 0x31d   : > { %v2063_v15 = vxor.u32 2147483648, %v5043_v60  ;;  %v2066_v49 = vxor.u32 2147483648, %v6963_v50  ;;  %v5047_v35 = vpop.eup %5046  ;;  %vm1746_vm1 = vweird.f32 %v6313_v34  ;;  %vm1750_vm7 = vcmp.eq.s32.totalorder %v6978_v26, 0 }
 0x31e   : > { %vm2166_vm14 = vcmp.eq.s32.totalorder %v2164_v56, 0  ;;  %vm2169_vm3 = vcmp.eq.s32.totalorder %v2164_v56, 2  ;;  %v2263_v48 = vsel %vm6863_vm13, 0, %v2261_v44  ;;  %vm1753_vm0 = vcmp.eq.s32.totalorder %v6978_v26, 2 }
 0x31f   : > { %v2168_v41 = vsel %vm2166_vm14, %v5037_v58, %v2167_v28  ;;  %v2171_v43 = vsel %vm2169_vm3, %v2170_v59, %v5039_v39  ;;  %v2371_v17 = vadd.s32 3, %v2367_v61  ;;  %v1648_v1 = vsel %vm1646_vm8, %v5035_v37, %v1647_v10  ;;  %v7050_v59 = vld [vmem:[%s6218_s30] ss:$0 sm:$0xff] }
 0x320   : > { %v1651_v51 = vsel %vm1649_vm12, %v1650_v33, %v5041_v24  ;;  %vm2062_vm4 = vcmp.eq.s32.totalorder %v2060_v18, 0  ;;  %vm2065_vm11 = vcmp.eq.s32.totalorder %v2060_v18, 2  ;;  %v5049_v22 = vpop.eup %5048  ;;  %vm2165_vm10 = vcmp.lt.s32.totalorder %v2164_v56, 2 }
 0x321   : > { %v2064_v14 = vsel %vm2062_vm4, %v6963_v50, %v2063_v15  ;;  %v2067_v38 = vsel %vm2065_vm11, %v2066_v49, %v5043_v60  ;;  %v2267_v8 = vadd.s32 3, %v2263_v48  ;;  %v5051_v36 = vpop.eup %5050  ;;  %v1754_v9 = vxor.u32 2147483648, %v5049_v22 }
 0x322   : > { %v1964_v3 = vsel %vm1957_vm6, %v1960_v21, %v1963_v62  ;;  %vm2162_vm13 = vweird.f32 %v6557_v4  ;;  %v2172_v42 = vsel %vm2165_vm10, %v2168_v41, %v2171_v43  ;;  %v1652_v52 = vsel %vm1645_vm2, %v1648_v1, %v1651_v51 }
 0x323   : > { %v1751_v46 = vxor.u32 2147483648, %v5051_v36  ;;  %vm2061_vm8 = vcmp.lt.s32.totalorder %v2060_v18, 2  ;;  %v2372_v23 = vand.u32 3, %v2371_v17  ;;  %v1755_v47 = vsel %vm1753_vm0, %v1754_v9, %v5051_v36  ;;  %v7056_v18 = vld [vmem:[%s5357_s12] ss:$0 sm:$0xff] }
 0x324   : > { %v2068_v50 = vsel %vm2061_vm8, %v2064_v14, %v2067_v38  ;;  %v2375_v25 = vxor.u32 2147483648, %v5047_v35  ;;  %v2378_v37 = vxor.u32 2147483648, %v6987_v40  ;;  %v1965_v4 = vsel %vm1954_vm15, nan, %v1964_v3 }
 0x325   : > { %v1752_v13 = vsel %vm1750_vm7, %v5049_v22, %v1751_v46  ;;  %v2173_v6 = vsel %vm2162_vm13, nan, %v2172_v42  ;;  %v2268_v57 = vand.u32 3, %v2267_v8  ;;  %v1653_v30 = vsel %vm1642_vm5, nan, %v1652_v52 }
 0x326   : > { %v1756_v0 = vsel %vm1749_vm9, %v1752_v13, %v1755_v47  ;;  %v2271_v58 = vxor.u32 2147483648, %v6954_v63  ;;  %v2274_v12 = vxor.u32 2147483648, %v6938_v31  ;;  %vm8612_vm11 = vweird.f32 %v6346_v11 }
 0x327   : > { %v1757_v55 = vsel %vm1746_vm1, nan, %v1756_v0  ;;  %v2069_v39 = vsel %vm8612_vm11, nan, %v2068_v50  ;;  %vm2374_vm12 = vcmp.eq.s32.totalorder %v2372_v23, 0  ;;  %vm2377_vm2 = vcmp.eq.s32.totalorder %v2372_v23, 2 }
 0x328   : > { %v2382_v7 = vpack.c.bf16 %v1757_v55, %v1653_v30  ;;  %v2384_v45 = vpack.c.bf16 %v2173_v6, %v2069_v39  ;;  %v2376_v16 = vsel %vm2374_vm12, %v6987_v40, %v2375_v25  ;;  %v2379_v24 = vsel %vm2377_vm2, %v2378_v37, %v5047_v35 }
 0x329   : > { %v2383_v26 = vpack.c.bf16 %v1965_v4, %v6980_v19  ;;  %vm2270_vm6 = vcmp.eq.s32.totalorder %v2268_v57, 0  ;;  %vm2273_vm15 = vcmp.eq.s32.totalorder %v2268_v57, 2  ;;  %vm8613_vm5 = vcmask 261120  }
 0x32a   : > { %4749 = vmatprep.mubr.msk.bf16.mxu1 %vm8613_vm5, %v2382_v7  ;;  %v2272_v5 = vsel %vm2270_vm6, %v6938_v31, %v2271_v58  ;;  %v2275_v34 = vsel %vm2273_vm15, %v2274_v12, %v6954_v63  ;;  %vm2373_vm9 = vcmp.lt.s32.totalorder %v2372_v23, 2  ;;  %vm8614_vm1 = vmmov %vm8613_vm5  ;;  %vm2269_vm10 = vcmp.lt.s32.totalorder %v2268_v57, 2  ;;  %v7045_v31 = vld [vmem:[%s8511_s7 + $0x1] ss:$0 sm:$0xff] }
 0x32b   : > { %4750 = vmatmul.mubr.msk.bf16.vlgmr.msra.gmra.mrb[0].mxu1 %vm8614_vm1, %v2383_v26  ;;  %v2380_v11 = vsel %vm2373_vm9, %v2376_v16, %v2379_v24  ;;  %vm8615_vm7 = vmmov %vm8614_vm1  ;;  %v2276_v20 = vsel %vm2269_vm10, %v2272_v5, %v2275_v34  ;;  %vm2370_vm14 = vweird.f32 %v8601_v53  ;;  %vm2266_vm3 = vweird.f32 %v6343_v54 }
 0x32c   : > { %4753 = vmatprep.mubr.msk.bf16.mxu1 %vm8615_vm7, %v2384_v45  ;;  %v2381_v19 = vsel %vm2370_vm14, nan, %v2380_v11  ;;  %v2277_v60 = vsel %vm2266_vm3, nan, %v2276_v20  ;;  %vm8616_vm0 = vmmov %vm8614_vm1  ;;  %v8617_v20 = vmov 920167782  }
 0x32d   : > { %v2385_v56 = vpack.c.bf16 %v2381_v19, %v2277_v60 }
 0x333   : > { %4754 = vmatmul.mubr.msk.bf16.gmra.mrb[4].mxu1 %vm8616_vm0, %v2385_v56 }
 0x3fe   : > { %v4751_v63 = vpop.f32.mrb[0].mxu1 }
 0x3ff   : > { %v2466_v40 = vadd.f32 %v4751_v63, %v7045_v31  ;;  %v2457_v21 = vpop.f32.mrb[1].mxu1 }
 0x400   : > { %v2458_v28 = vadd.f32 %v7045_v31, %v2457_v21  ;;  %v4752_v53 = vpop.f32.mrb[2].mxu1 }
 0x401   : > { %v2490_v54 = vmul.f32 %v7050_v59, %v2466_v40  ;;  %v2469_v44 = vadd.f32 %v4752_v53, %v7045_v31  ;;  %v2460_v10 = vpop.f32.mrb[3].mxu1 }
 0x402   : > { %v2488_v33 = vmul.f32 %v7050_v59, %v2458_v28  ;;  %v2461_v51 = vadd.f32 %v7045_v31, %v2460_v10  ;;  %v8618_v28 = vmov 1326507024  }
 0x403   : > { %v7059_v61 = vadd.f32 %v7056_v18, %v2490_v54  ;;  %v2491_v62 = vmul.f32 %v7050_v59, %v2469_v44 }
 0x404   : > { %v7063_v15 = vadd.f32 %v7056_v18, %v2488_v33  ;;  %v2489_v47 = vmul.f32 %v7050_v59, %v2461_v51 }
 0x405   : > { %v2712_v49 = vand.u32 2147483647, %v7059_v61  ;;  %v2715_v35 = vand.u32 2139095040, %v7059_v61  ;;  %v7070_v43 = vadd.f32 %v7056_v18, %v2491_v62  ;;  %vm2714_vm10 = vcmp.lt.s32.totalorder %v7059_v61, 0 }
 0x406   : > { %v2504_v48 = vand.u32 2147483647, %v7063_v15  ;;  %v2507_v41 = vand.u32 2139095040, %v7063_v15  ;;  %v7072_v17 = vpop.f32.mrb[4].mxu1  ;;  %v7089_v58 = vadd.f32 %v7056_v18, %v2489_v47 }
 0x407   : > { %v2716_v1 = vshrl.u32 %v2715_v35, 23  ;;  %v7075_v22 = vpop.f32.mrb[5].mxu1  ;;  %v2719_v14 = vand.u32 8388607, %v2712_v49  ;;  %v2819_v9 = vand.u32 2139095040, %v7070_v43 }
 0x408   : > { %v2508_v38 = vshrl.u32 %v2507_v41, 23  ;;  %v2511_v8 = vand.u32 8388607, %v2504_v48  ;;  %v7082_v3 = vpop.f32.mrb[6].mxu1  ;;  %v2816_v13 = vand.u32 2147483647, %v7070_v43 }
 0x409   : > { %v4627_v36 = vadd.s32 4294967169, %v2716_v1  ;;  %v7084_v52 = vpop.f32.mrb[7].mxu1  ;;  %v2820_v23 = vshrl.u32 %v2819_v9, 23  ;;  %v2720_v50 = vor.u32 8388608, %v2719_v14 }
 0x40a   : > { %v4619_v42 = vadd.s32 4294967169, %v2508_v38  ;;  %v2512_v25 = vor.u32 8388608, %v2511_v8  ;;  %v7097_v39 = vand.u32 8388607, %v2816_v13 }
 0x40b   : > { %v2722_v46 = vadd.s32 1, %v4627_v36  ;;  %v4631_v4 = vadd.s32 4294967169, %v2820_v23  ;;  %v7091_v12 = vshll.u32 %v2720_v50, 8 }
 0x40c   : > { %v2514_v37 = vadd.s32 1, %v4619_v42  ;;  %v7093_v55 = vshll.u32 %v2512_v25, 8 }
 0x40d   : > { %vm2723_vm4 = vcmp.gt.s32.totalorder %v2722_v46, 0  ;;  %v7099_v7 = vadd.s32 1, %v4631_v4 }
 0x40e   : > { %v2724_v6 = vsel %vm2723_vm4, %v2722_v46, 0  ;;  %vm2515_vm13 = vcmp.gt.s32.totalorder %v2514_v37, 0 }
 0x40f   : > { %v2725_v57 = vshrl.u32 %v2724_v6, 5  ;;  %v2726_v30 = vand.u32 31, %v2724_v6  ;;  %v2516_v0 = vsel %vm2515_vm13, %v2514_v37, 0  ;;  %vm2827_vm7 = vcmp.gt.s32.totalorder %v7099_v7, 0 }
 0x410   : > { %v7102_v24 = vshrl.u32 %v2516_v0, 5  ;;  %v2518_v26 = vand.u32 31, %v2516_v0 }
 0x411   : > { %v2727_v45 = vsub.s32 32, %v2726_v30  ;;  %v2729_v16 = vshll.u32 %v8580_v29, %v2726_v30  ;;  %v2732_v5 = vshll.u32 %v8554_v32, %v2726_v30  ;;  %v2735_v34 = vshll.u32 %v8553_v27, %v2726_v30 }
 0x412   : > { %v2738_v11 = vshll.u32 %v8556_v2, %v2726_v30  ;;  %v2741_v19 = vshll.u32 %v8617_v20, %v2726_v30  ;;  %vm2744_vm8 = vcmp.lt.s32.totalorder %v2725_v57, 1  ;;  %vm2745_vm11 = vcmp.lt.s32.totalorder %v2725_v57, 2 }
 0x413   : > { %v2730_v60 = vshrl.u32 %v8554_v32, %v2727_v45  ;;  %v2733_v56 = vshrl.u32 %v8553_v27, %v2727_v45  ;;  %v2736_v63 = vshrl.u32 %v8556_v2, %v2727_v45  ;;  %v2728_v40 = vshrl.u32 %v8580_v29, %v2727_v45 }
 0x414   : > { %v2739_v21 = vshrl.u32 %v8617_v20, %v2727_v45  ;;  %v2742_v53 = vshrl.u32 %v8618_v28, %v2727_v45  ;;  %v2519_v33 = vsub.s32 32, %v2518_v26  ;;  %vm2746_vm12 = vcmp.lt.s32.totalorder %v2725_v57, 3 }
 0x415   : > { %v2731_v54 = vor.u32 %v2730_v60, %v2729_v16  ;;  %v2734_v44 = vor.u32 %v2733_v56, %v2732_v5  ;;  %v2737_v10 = vor.u32 %v2736_v63, %v2735_v34  ;;  %vm2747_vm2 = vcmp.lt.s32.totalorder %v2725_v57, 4 }
 0x416   : > { %v2740_v62 = vor.u32 %v2739_v21, %v2738_v11  ;;  %v2743_v35 = vor.u32 %v2742_v53, %v2741_v19  ;;  %v2521_v9 = vshll.u32 %v8580_v29, %v2518_v26  ;;  %v2522_v23 = vshrl.u32 %v8554_v32, %v2519_v33 }
 0x417   : > { %v2748_v41 = vsel %vm2744_vm8, %v2728_v40, %v2731_v54  ;;  %v2749_v1 = vsel %vm2747_vm2, %v2737_v10, 2102212464  ;;  %v2752_v51 = vsel %vm2744_vm8, %v2731_v54, %v2734_v44  ;;  %v2756_v14 = vsel %vm2744_vm8, %v2734_v44, %v2737_v10 }
 0x418   : > { %v2750_v38 = vsel %vm2746_vm12, %v2734_v44, %v2749_v1  ;;  %v2753_v8 = vsel %vm2747_vm2, %v2740_v62, 920167782  ;;  %v2757_v36 = vsel %vm2747_vm2, %v2743_v35, 1326507024  ;;  %v2524_v47 = vshll.u32 %v8554_v32, %v2518_v26 }
 0x419   : > { %v2754_v42 = vsel %vm2746_vm12, %v2737_v10, %v2753_v8  ;;  %v2758_v46 = vsel %vm2746_vm12, %v2740_v62, %v2757_v36  ;;  %v2751_v50 = vsel %vm2745_vm11, %v2748_v41, %v2750_v38  ;;  %v2525_v4 = vshrl.u32 %v8553_v27, %v2519_v33 }
 0x41a   : > { %v2755_v25 = vsel %vm2745_vm11, %v2752_v51, %v2754_v42  ;;  %v2759_v37 = vsel %vm2745_vm11, %v2756_v14, %v2758_v46  ;;  %v2523_v16 = vor.u32 %v2522_v23, %v2521_v9  ;;  %v2527_v34 = vshll.u32 %v8553_v27, %v2518_v26 }
 0x41b   : > { %v7125_v6 = vmul.u32.u64.low %v7091_v12, %v2759_v37  ;;  %v7126_v30 = vmul.u32.u64.high %v7091_v12, %v2759_v37, %v7125_v6  ;;  %v7129_v0 = vmul.u32.u64.low %v7091_v12, %v2755_v25  ;;  %v7130_v45 = vmul.u32.u64.high %v7091_v12, %v2755_v25, %v7129_v0 }
 0x41c   : > { %v2526_v5 = vor.u32 %v2525_v4, %v2524_v47  ;;  %v2528_v11 = vshrl.u32 %v8556_v2, %v2519_v33  ;;  %v2520_v57 = vshrl.u32 %v8580_v29, %v2519_v33  ;;  %v2530_v19 = vshll.u32 %v8556_v2, %v2518_v26 }
 0x41d   : > { %v2531_v60 = vshrl.u32 %v8617_v20, %v2519_v33  ;;  %v2534_v56 = vshrl.u32 %v8618_v28, %v2519_v33  ;;  %v2767_v63 = vmul.u32 %v7091_v12, %v2751_v50  ;;  %v2533_v21 = vshll.u32 %v8617_v20, %v2518_v26 }
 0x41e   : > { %v2529_v40 = vor.u32 %v2528_v11, %v2527_v34  ;;  %vm2536_vm6 = vcmp.lt.s32.totalorder %v7102_v24, 1  ;;  %vm2769_vm15 = vc.u32 %v7126_v30, %v7129_v0  ;;  %v2770_v53 = vadd.s32 1, %v7130_v45 }
 0x41f   : > { %v2532_v54 = vor.u32 %v2531_v60, %v2530_v19  ;;  %vm2537_vm5 = vcmp.lt.s32.totalorder %v7102_v24, 2  ;;  %v2535_v44 = vor.u32 %v2534_v56, %v2533_v21  ;;  %vm2538_vm9 = vcmp.lt.s32.totalorder %v7102_v24, 3 }
 0x420   : > { %vm2539_vm1 = vcmp.lt.s32.totalorder %v7102_v24, 4  ;;  %v2544_v10 = vsel %vm2536_vm6, %v2523_v16, %v2526_v5  ;;  %v2771_v12 = vsel %vm2769_vm15, %v2770_v53, %v7130_v45  ;;  %v2548_v62 = vsel %vm2536_vm6, %v2526_v5, %v2529_v40 }
 0x421   : > { %v2541_v33 = vsel %vm2539_vm1, %v2529_v40, 2102212464  ;;  %v2545_v26 = vsel %vm2539_vm1, %v2532_v54, 920167782  ;;  %v2772_v35 = vadd.s32 %v2771_v12, %v2767_v63  ;;  %v2540_v41 = vsel %vm2536_vm6, %v2520_v57, %v2523_v16 }
 0x422   : > { %v2546_v1 = vsel %vm2538_vm9, %v2529_v40, %v2545_v26  ;;  %v2549_v51 = vsel %vm2539_vm1, %v2535_v44, 1326507024  ;;  %v2542_v14 = vsel %vm2538_vm9, %v2526_v5, %v2541_v33  ;;  %v2828_v50 = vsel %vm2827_vm7, %v7099_v7, 0 }
 0x423   : > { %v2547_v38 = vsel %vm2537_vm5, %v2544_v10, %v2546_v1  ;;  %v2550_v8 = vsel %vm2538_vm9, %v2532_v54, %v2549_v51  ;;  %v2773_v36 = vadd.s32 536870912, %v2772_v35  ;;  %v2611_v25 = vand.u32 2139095040, %v7089_v58 }
 0x424   : > { %v2551_v9 = vsel %vm2537_vm5, %v2548_v62, %v2550_v8  ;;  %v7155_v42 = vmul.u32.u64.low %v7093_v55, %v2547_v38  ;;  %v7156_v46 = vmul.u32.u64.high %v7093_v55, %v2547_v38, %v7155_v42  ;;  %v2543_v4 = vsel %vm2537_vm5, %v2540_v41, %v2542_v14 }
 0x425   : > { %v7160_v23 = vmul.u32.u64.low %v7093_v55, %v2551_v9  ;;  %v7161_v47 = vmul.u32.u64.high %v7093_v55, %v2551_v9, %v7160_v23  ;;  %v2774_v37 = vshrl.u32 %v2773_v36, 30  ;;  %v2824_v6 = vor.u32 8388608, %v7097_v39 }
 0x426   : > { %v2830_v45 = vand.u32 31, %v2828_v50  ;;  %v2562_v5 = vadd.s32 1, %v7156_v46  ;;  %v2559_v11 = vmul.u32 %v7093_v55, %v2543_v4  ;;  %v2608_v7 = vand.u32 2147483647, %v7089_v58 }
 0x427   : > { %v2775_v16 = vshll.u32 %v2774_v37, 30  ;;  %vm2561_vm14 = vc.u32 %v7161_v47, %v7155_v42  ;;  %v7177_v19 = vshll.u32 %v2824_v6, 8  ;;  %v2612_v39 = vshrl.u32 %v2611_v25, 23 }
 0x428   : > { %v2831_v34 = vsub.s32 32, %v2830_v45  ;;  %v2563_v24 = vsel %vm2561_vm14, %v2562_v5, %v7156_v46  ;;  %v2798_v60 = vsub.s32 4, %v2774_v37  ;;  %v2833_v21 = vshll.u32 %v8580_v29, %v2830_v45 }
 0x429   : > { %v7174_v57 = vsub.s32 %v2772_v35, %v2775_v16  ;;  %v2564_v56 = vadd.s32 %v2563_v24, %v2559_v11  ;;  %v2836_v53 = vshll.u32 %v8554_v32, %v2830_v45  ;;  %v2768_v44 = vadd.s32 %v7129_v0, %v7126_v30 }
 0x42a   : > { %v2834_v63 = vshrl.u32 %v8554_v32, %v2831_v34  ;;  %v2837_v40 = vshrl.u32 %v8553_v27, %v2831_v34  ;;  %v2840_v54 = vshrl.u32 %v8556_v2, %v2831_v34  ;;  %v2829_v12 = vshrl.u32 %v2828_v50, 5 }
 0x42b   : > { %v2778_v55 = vsub.s32 0, %v7174_v57  ;;  %v2565_v10 = vadd.s32 536870912, %v2564_v56  ;;  %v2839_v33 = vshll.u32 %v8553_v27, %v2830_v45  ;;  %v2843_v41 = vshrl.u32 %v8617_v20, %v2831_v34 }
 0x42c   : > { %v2835_v62 = vor.u32 %v2834_v63, %v2833_v21  ;;  %v2838_v35 = vor.u32 %v2837_v40, %v2836_v53  ;;  %v2842_v14 = vshll.u32 %v8556_v2, %v2830_v45  ;;  %v2846_v38 = vshrl.u32 %v8618_v28, %v2831_v34 }
 0x42d   : > { %v4628_v26 = vmin.u32 %v2778_v55, %v7174_v57  ;;  %v7190_v1 = vshrl.u32 %v2565_v10, 30  ;;  %v2841_v51 = vor.u32 %v2840_v54, %v2839_v33  ;;  %v2799_v30 = vsel %vm2714_vm10, %v2798_v60, %v2774_v37 }
 0x42e   : > { %v2845_v0 = vshll.u32 %v8617_v20, %v2830_v45  ;;  %v4623_v36 = vadd.s32 4294967169, %v2612_v39  ;;  %v2832_v46 = vshrl.u32 %v8580_v29, %v2831_v34  ;;  %v2844_v23 = vor.u32 %v2843_v41, %v2842_v14 }
 0x42f   : > { %v2780_v8 = vclz %v4628_v26  ;;  %v2567_v9 = vshll.u32 %v7190_v1, 30  ;;  %vm2848_vm3 = vcmp.lt.s32.totalorder %v2829_v12, 1  ;;  %vm2850_vm0 = vcmp.lt.s32.totalorder %v2829_v12, 3 }
 0x430   : > { %v2847_v25 = vor.u32 %v2846_v38, %v2845_v0  ;;  %vm2851_vm4 = vcmp.lt.s32.totalorder %v2829_v12, 4  ;;  %v2856_v16 = vsel %vm2848_vm3, %v2835_v62, %v2838_v35  ;;  %vm2849_vm8 = vcmp.lt.s32.totalorder %v2829_v12, 2 }
 0x431   : > { %v4629_v50 = vadd.s32 4294967294, %v2780_v8  ;;  %v7199_v4 = vsub.s32 %v2564_v56, %v2567_v9  ;;  %v2853_v6 = vsel %vm2851_vm4, %v2841_v51, 2102212464  ;;  %v2857_v37 = vsel %vm2851_vm4, %v2844_v23, 920167782 }
 0x432   : > { %v2852_v45 = vsel %vm2848_vm3, %v2832_v46, %v2835_v62  ;;  %v2858_v5 = vsel %vm2850_vm0, %v2841_v51, %v2857_v37  ;;  %v2860_v39 = vsel %vm2848_vm3, %v2838_v35, %v2841_v51  ;;  %v2854_v63 = vsel %vm2850_vm0, %v2838_v35, %v2853_v6 }
 0x433   : > { %vm4630_vm13 = vcmp.lt.s32.totalorder %v4629_v50, 0  ;;  %v2570_v11 = vsub.s32 0, %v7199_v4  ;;  %v2859_v24 = vsel %vm2849_vm8, %v2856_v16, %v2858_v5  ;;  %v2861_v40 = vsel %vm2851_vm4, %v2847_v25, 1326507024 }
 0x434   : > { %v2783_v34 = vsel %vm4630_vm13, 0, %v4629_v50  ;;  %v2862_v21 = vsel %vm2850_vm0, %v2844_v23, %v2861_v40  ;;  %v7214_v53 = vmul.u32.u64.low %v7177_v19, %v2859_v24  ;;  %v7215_v54 = vmul.u32.u64.high %v7177_v19, %v2859_v24, %v7214_v53 }
 0x435   : > { %v2784_v60 = vsub.s32 32, %v2783_v34  ;;  %v2788_v56 = vsub.s32 4294967266, %v2783_v34  ;;  %v4620_v55 = vmin.u32 %v2570_v11, %v7199_v4  ;;  %v2785_v10 = vshll.u32 %v7174_v57, %v2783_v34 }
 0x436   : > { %v2863_v62 = vsel %vm2849_vm8, %v2860_v39, %v2862_v21  ;;  %v2618_v14 = vadd.s32 1, %v4623_v36  ;;  %v2855_v0 = vsel %vm2849_vm8, %v2852_v45, %v2854_v63  ;;  %vm7227_vm11 = vcmp.le.f32.partialorder %v2712_v49, 0.7853982 }
 0x437   : > { %v2786_v33 = vshrl.u32 %v2768_v44, %v2784_v60  ;;  %v2789_v26 = vadd.s32 127, %v2788_v56  ;;  %v2572_v41 = vclz %v4620_v55  ;;  %v2874_v57 = vadd.s32 1, %v7215_v54 }
 0x438   : > { %v7221_v35 = vmul.u32.u64.low %v7177_v19, %v2863_v62  ;;  %v7222_v51 = vmul.u32.u64.high %v7177_v19, %v2863_v62, %v7221_v35  ;;  %vm2619_vm12 = vcmp.gt.s32.totalorder %v2618_v14, 0  ;;  %v2801_v46 = vsel %vm7227_vm11, 0, %v2799_v30 }
 0x439   : > { %v2787_v38 = vor.u32 %v2786_v33, %v2785_v10  ;;  %v2790_v8 = vshll.u32 %v2789_v26, 23  ;;  %v2620_v23 = vsel %vm2619_vm12, %v2618_v14, 0  ;;  %v4621_v50 = vadd.s32 4294967294, %v2572_v41 }
 0x43a   : > { %v2871_v36 = vmul.u32 %v7177_v19, %v2855_v0  ;;  %vm2873_vm2 = vc.u32 %v7222_v51, %v7214_v53  ;;  %v2615_v49 = vand.u32 8388607, %v2608_v7  ;;  %v2622_v16 = vand.u32 31, %v2620_v23 }
 0x43b   : > { %v2791_v44 = vor.u32 4788187, %v2790_v8  ;;  %v2794_v25 = vcvt.s32.f32 %v2787_v38  ;;  %v2875_v6 = vsel %vm2873_vm2, %v2874_v57, %v7215_v54  ;;  %v2805_v37 = vadd.s32 3, %v2801_v46 }
 0x43c   : > { %v2876_v45 = vadd.s32 %v2875_v6, %v2871_v36  ;;  %v2623_v34 = vsub.s32 32, %v2622_v16  ;;  %vm4622_vm6 = vcmp.lt.s32.totalorder %v4621_v50, 0  ;;  %v2616_v24 = vor.u32 8388608, %v2615_v49 }
 0x43d   : > { %v2792_v12 = vand.u32 2147483647, %v2791_v44  ;;  %v2482_v19 = vadd.f32 %v7072_v17, %v7045_v31  ;;  %v7242_v39 = vand.u32 3, %v2805_v37  ;;  %v2474_v63 = vadd.f32 %v7045_v31, %v7075_v22 }
 0x43e   : > { %v2877_v30 = vadd.s32 536870912, %v2876_v45  ;;  %v2626_v56 = vshrl.u32 %v8554_v32, %v2623_v34  ;;  %v7251_v55 = vsel %vm4622_vm6, 0, %v4621_v50  ;;  %v2629_v21 = vshrl.u32 %v8553_v27, %v2623_v34 }
 0x43f   : > { %v2795_v5 = vmul.f32 %v2794_v25, %v2792_v12  ;;  %v2632_v54 = vshrl.u32 %v8556_v2, %v2623_v34  ;;  %v2625_v33 = vshll.u32 %v8580_v29, %v2622_v16  ;;  %v2628_v26 = vshll.u32 %v8554_v32, %v2622_v16 }
 0x440   : > { %v7244_v60 = vshrl.u32 %v2877_v30, 30  ;;  %v2631_v22 = vshll.u32 %v8553_v27, %v2622_v16  ;;  %v2634_v62 = vshll.u32 %v8556_v2, %v2622_v16  ;;  %v2635_v41 = vshrl.u32 %v8617_v20, %v2623_v34 }
 0x441   : > { %v2796_v11 = vxor.u32 2147483648, %v2795_v5  ;;  %v2621_v14 = vshrl.u32 %v2620_v23, 5  ;;  %v2627_v38 = vor.u32 %v2626_v56, %v2625_v33  ;;  %v2630_v8 = vor.u32 %v2629_v21, %v2628_v26 }
 0x442   : > { %v2879_v10 = vshll.u32 %v7244_v60, 30  ;;  %v2633_v0 = vor.u32 %v2632_v54, %v2631_v22  ;;  %v2636_v9 = vor.u32 %v2635_v41, %v2634_v62  ;;  %v2638_v57 = vshrl.u32 %v8618_v28, %v2623_v34 }
 0x443   : > { %v2797_v40 = vsel %vm2714_vm10, %v2796_v11, %v2795_v5  ;;  %v7269_v44 = vadd.s32 %v7155_v42, %v7161_v47  ;;  %v2580_v46 = vsub.s32 4294967266, %v7251_v55  ;;  %v2637_v36 = vshll.u32 %v8617_v20, %v2622_v16 }
 0x444   : > { %v2800_v17 = vsel %vm7227_vm11, %v7059_v61, %v2797_v40  ;;  %v7264_v35 = vsub.s32 %v2876_v45, %v2879_v10  ;;  %vm2811_vm15 = vcmp.eq.s32.totalorder %v7242_v39, 2  ;;  %v2624_v23 = vshrl.u32 %v8580_v29, %v2623_v34 }
 0x445   : > { %5052 = vcosq.f32 %v2800_v17  ;;  %v7276_v49 = vshll.u32 %v2616_v24, 8  ;;  %v2494_v12 = vmul.f32 %v7050_v59, %v2482_v19  ;;  %vm2808_vm5 = vcmp.eq.s32.totalorder %v7242_v39, 0 }
 0x446   : > { %5054 = vsinq.f32 %v2800_v17  ;;  %v2882_v50 = vsub.s32 0, %v7264_v35  ;;  %v2639_v42 = vor.u32 %v2638_v57, %v2637_v36  ;;  %vm2640_vm9 = vcmp.lt.s32.totalorder %v2621_v14, 1 }
 0x447   : > { %vm2643_vm1 = vcmp.lt.s32.totalorder %v2621_v14, 4  ;;  %vm2807_vm7 = vcmp.lt.s32.totalorder %v7242_v39, 2  ;;  %vm2642_vm10 = vcmp.lt.s32.totalorder %v2621_v14, 3  ;;  %v2648_v6 = vsel %vm2640_vm9, %v2627_v38, %v2630_v8 }
 0x448   : > { %v4632_v25 = vmin.u32 %v2882_v50, %v7264_v35  ;;  %v2645_v47 = vsel %vm2643_vm1, %v2633_v0, 2102212464  ;;  %v2649_v16 = vsel %vm2643_vm1, %v2636_v9, 920167782  ;;  %vm2804_vm14 = vweird.f32 %v7059_v61 }
 0x449   : > { %v2581_v37 = vadd.s32 127, %v2580_v46  ;;  %v2650_v5 = vsel %vm2642_vm10, %v2633_v0, %v2649_v16  ;;  %v2492_v34 = vmul.f32 %v7050_v59, %v2474_v63  ;;  %v2872_v30 = vadd.s32 %v7214_v53, %v7222_v51 }
 0x44a   : > { %v2884_v45 = vclz %v4632_v25  ;;  %vm2641_vm3 = vcmp.lt.s32.totalorder %v2621_v14, 2  ;;  %v2644_v11 = vsel %vm2640_vm9, %v2624_v23, %v2627_v38  ;;  %v7292_v24 = vadd.f32 %v7056_v18, %v2494_v12 }
 0x44b   : > { %v2646_v56 = vsel %vm2642_vm10, %v2630_v8, %v2645_v47  ;;  %v2651_v40 = vsel %vm2641_vm3, %v2648_v6, %v2650_v5  ;;  %v2652_v21 = vsel %vm2640_vm9, %v2630_v8, %v2633_v0  ;;  %v2576_v17 = vsub.s32 32, %v7251_v55  ;;  %v4984_v0 = vld [vmem:[%s8510_s6 + $0x20] sm:$0xff]  }
 0x44c   : > { %v4633_v19 = vadd.s32 4294967294, %v2884_v45  ;;  %v2653_v63 = vsel %vm2643_vm1, %v2639_v42, 1326507024  ;;  %v7300_v53 = vmul.u32.u64.low %v7276_v49, %v2651_v40  ;;  %v7301_v51 = vmul.u32.u64.high %v7276_v49, %v2651_v40, %v7300_v53  ;;  %4757 = vmatprep.subr.bf16.mxu0 %v4984_v0 }
 0x44d   : > { %v2582_v26 = vshll.u32 %v2581_v37, 23  ;;  %v2654_v22 = vsel %vm2642_vm10, %v2636_v9, %v2653_v63  ;;  %v2647_v38 = vsel %vm2641_vm3, %v2644_v11, %v2646_v56  ;;  %v3128_v36 = vand.u32 2147483647, %v7292_v24  ;;  %4758 = vmatpush3.bf16.msra.mxu0 %v4984_v0 }
 0x44e   : > { %vm4634_vm0 = vcmp.lt.s32.totalorder %v4633_v19, 0  ;;  %v2655_v8 = vsel %vm2641_vm3, %v2652_v21, %v2654_v22  ;;  %v2666_v6 = vadd.s32 1, %v7301_v51  ;;  %v3131_v37 = vand.u32 2139095040, %v7292_v24 }
 0x44f   : > { %v5053_v54 = vpop.eup %5052  ;;  %v2887_v41 = vsel %vm4634_vm0, 0, %v4633_v19  ;;  %v7317_v12 = vmul.u32.u64.low %v7276_v49, %v2655_v8  ;;  %v7318_v14 = vmul.u32.u64.high %v7276_v49, %v2655_v8, %v7317_v12  ;;  %v2578_v45 = vshrl.u32 %v7269_v44, %v2576_v17 }
 0x450   : > { %v5055_v10 = vpop.eup %5054  ;;  %v2812_v33 = vxor.u32 2147483648, %v5053_v54  ;;  %v2888_v46 = vsub.s32 32, %v2887_v41  ;;  %v2892_v50 = vsub.s32 4294967266, %v2887_v41  ;;  %v2889_v23 = vshll.u32 %v7264_v35, %v2887_v41  ;;  %v4985_v35 = vld [vmem:[%s8510_s6 + $0x28] sm:$0xff]  }
 0x451   : > { %v2809_v62 = vxor.u32 2147483648, %v5055_v10  ;;  %v2577_v11 = vshll.u32 %v7199_v4, %v7251_v55  ;;  %v2663_v61 = vmul.u32 %v7276_v49, %v2647_v38  ;;  %vm2665_vm4 = vc.u32 %v7318_v14, %v7300_v53  ;;  %4759 = vmatprep.subr.bf16.mxu0 %v4985_v35 }
 0x452   : > { %v2813_v57 = vsel %vm2811_vm15, %v2812_v33, %v5055_v10  ;;  %v2890_v42 = vshrl.u32 %v2872_v30, %v2888_v46  ;;  %v2893_v47 = vadd.s32 127, %v2892_v50  ;;  %v7333_v30 = vadd.f32 %v7056_v18, %v2492_v34  ;;  %4760 = vmatpush3.bf16.msra.mxu0 %v4985_v35 }
 0x453   : > { %v2810_v9 = vsel %vm2808_vm5, %v5053_v54, %v2809_v62  ;;  %v3132_v19 = vshrl.u32 %v3131_v37, 23  ;;  %v2583_v56 = vor.u32 4788187, %v2582_v26  ;;  %v2667_v21 = vsel %vm2665_vm4, %v2666_v6, %v7301_v51 }
 0x454   : > { %v2814_v25 = vsel %vm2807_vm7, %v2810_v9, %v2813_v57  ;;  %v2891_v5 = vor.u32 %v2890_v42, %v2889_v23  ;;  %v2894_v39 = vshll.u32 %v2893_v47, 23  ;;  %v3135_v44 = vand.u32 8388607, %v3128_v36 }
 0x455   : > { %v7325_v16 = vsel %vm2804_vm14, nan, %v2814_v25  ;;  %v2668_v34 = vadd.s32 %v2667_v21, %v2663_v61  ;;  %v4643_v54 = vadd.s32 4294967169, %v3132_v19  ;;  %v2485_v4 = vadd.f32 %v7082_v3, %v7045_v31 }
 0x456   : > { %v2895_v40 = vor.u32 4788187, %v2894_v39  ;;  %v2579_v55 = vor.u32 %v2578_v45, %v2577_v11  ;;  %v2898_v17 = vcvt.s32.f32 %v2891_v5  ;;  %v2923_v63 = vand.u32 2139095040, %v7333_v30 }
 0x457   : > { %v2669_v10 = vadd.s32 536870912, %v2668_v34  ;;  %v3138_v33 = vadd.s32 1, %v4643_v54  ;;  %v2584_v26 = vand.u32 2147483647, %v2583_v56  ;;  %v2902_v51 = vsub.s32 4, %v7244_v60 }
 0x458   : > { %v2896_v49 = vand.u32 2147483647, %v2895_v40  ;;  %v3136_v62 = vor.u32 8388608, %v3135_v44  ;;  %v8549_v38 = vand.u32 2147483647, %v7333_v30  ;;  %v2495_v8 = vmul.f32 %v7050_v59, %v2485_v4 }
 0x459   : > { %v7347_v41 = vshrl.u32 %v2669_v10, 30  ;;  %vm3139_vm13 = vcmp.gt.s32.totalorder %v3138_v33, 0  ;;  %v2586_v3 = vcvt.s32.f32 %v2579_v55  ;;  %v2924_v46 = vshrl.u32 %v2923_v63, 23 }
 0x45a   : > { %v2899_v22 = vmul.f32 %v2898_v17, %v2896_v49  ;;  %v3140_v57 = vsel %vm3139_vm13, %v3138_v33, 0  ;;  %vm2818_vm8 = vcmp.lt.s32.totalorder %v7070_v43, 0  ;;  %v7356_v25 = vshll.u32 %v3136_v62, 8 }
 0x45b   : > { %v2671_v50 = vshll.u32 %v7347_v41, 30  ;;  %v3142_v9 = vand.u32 31, %v3140_v57  ;;  %v7353_v23 = vmul.f32 %v2586_v3, %v2584_v26  ;;  %v2903_v12 = vsel %vm2818_vm8, %v2902_v51, %v7244_v60 }
 0x45c   : > { %v2900_v0 = vxor.u32 2147483648, %v2899_v22  ;;  %v7362_v6 = vand.u32 8388607, %v8549_v38  ;;  %v7365_v37 = vadd.f32 %v7056_v18, %v2495_v8  ;;  %v3141_v45 = vshrl.u32 %v3140_v57, 5 }
 0x45d   : > { %v7358_v42 = vsub.s32 %v2668_v34, %v2671_v50  ;;  %v3143_v47 = vsub.s32 32, %v3142_v9  ;;  %v3145_v5 = vshll.u32 %v8580_v29, %v3142_v9  ;;  %v4635_v39 = vadd.s32 4294967169, %v2924_v46 }
 0x45e   : > { %v2901_v35 = vsel %vm2818_vm8, %v2900_v0, %v2899_v22  ;;  %v3148_v61 = vshll.u32 %v8554_v32, %v3142_v9  ;;  %v3151_v19 = vshll.u32 %v8553_v27, %v3142_v9  ;;  %vm7374_vm11 = vcmp.le.f32.partialorder %v2816_v13, 0.7853982 }
 0x45f   : > { %v2674_v11 = vsub.s32 0, %v7358_v42  ;;  %v3146_v60 = vshrl.u32 %v8554_v32, %v3143_v47  ;;  %v3149_v18 = vshrl.u32 %v8553_v27, %v3143_v47  ;;  %v3152_v40 = vshrl.u32 %v8556_v2, %v3143_v47 }
 0x460   : > { %v3154_v21 = vshll.u32 %v8556_v2, %v3142_v9  ;;  %v3155_v44 = vshrl.u32 %v8617_v20, %v3143_v47  ;;  %v3157_v4 = vshll.u32 %v8617_v20, %v3142_v9  ;;  %v3158_v55 = vshrl.u32 %v8618_v28, %v3143_v47 }
 0x461   : > { %v4624_v34 = vmin.u32 %v2674_v11, %v7358_v42  ;;  %v3147_v54 = vor.u32 %v3146_v60, %v3145_v5  ;;  %v3150_v49 = vor.u32 %v3149_v18, %v3148_v61  ;;  %v3153_v13 = vor.u32 %v3152_v40, %v3151_v19 }
 0x462   : > { %v3156_v17 = vor.u32 %v3155_v44, %v3154_v21  ;;  %v2930_v63 = vadd.s32 1, %v4635_v39  ;;  %v3159_v33 = vor.u32 %v3158_v55, %v3157_v4  ;;  %vm3160_vm12 = vcmp.lt.s32.totalorder %v3141_v45, 1 }
 0x463   : > { %v2676_v10 = vclz %v4624_v34  ;;  %vm3163_vm2 = vcmp.lt.s32.totalorder %v3141_v45, 4  ;;  %vm3161_vm6 = vcmp.lt.s32.totalorder %v3141_v45, 2  ;;  %vm3162_vm15 = vcmp.lt.s32.totalorder %v3141_v45, 3 }
 0x464   : > { %v3168_v26 = vsel %vm3160_vm12, %v3147_v54, %v3150_v49  ;;  %v3169_v22 = vsel %vm3163_vm2, %v3156_v17, 920167782  ;;  %v3165_v62 = vsel %vm3163_vm2, %v3153_v13, 2102212464  ;;  %v3172_v3 = vsel %vm3160_vm12, %v3150_v49, %v3153_v13 }
 0x465   : > { %v4625_v51 = vadd.s32 4294967294, %v2676_v10  ;;  %v3170_v8 = vsel %vm3162_vm15, %v3153_v13, %v3169_v22  ;;  %v3144_v0 = vshrl.u32 %v8580_v29, %v3143_v47  ;;  %v3173_v46 = vsel %vm3163_vm2, %v3159_v33, 1326507024 }
 0x466   : > { %v3171_v57 = vsel %vm3161_vm6, %v3168_v26, %v3170_v8  ;;  %vm2931_vm5 = vcmp.gt.s32.totalorder %v2930_v63, 0  ;;  %v3174_v50 = vsel %vm3162_vm15, %v3156_v17, %v3173_v46  ;;  %v3166_v60 = vsel %vm3162_vm15, %v3150_v49, %v3165_v62 }
 0x467   : > { %vm4626_vm9 = vcmp.lt.s32.totalorder %v4625_v51, 0  ;;  %v7392_v9 = vmul.u32.u64.low %v7356_v25, %v3171_v57  ;;  %v7393_v5 = vmul.u32.u64.high %v7356_v25, %v3171_v57, %v7392_v9  ;;  %v3164_v11 = vsel %vm3160_vm12, %v3144_v0, %v3147_v54 }
 0x468   : > { %v7396_v39 = vsel %vm4626_vm9, 0, %v4625_v51  ;;  %v3175_v47 = vsel %vm3161_vm6, %v3172_v3, %v3174_v50  ;;  %v2905_v61 = vsel %vm7374_vm11, 0, %v2903_v12  ;;  %v2928_v19 = vor.u32 8388608, %v7362_v6 }
 0x469   : > { %v2932_v18 = vsel %vm2931_vm5, %v2930_v63, 0  ;;  %v3235_v40 = vand.u32 2139095040, %v7365_v37  ;;  %v2904_v21 = vsel %vm7374_vm11, %v7070_v43, %v2901_v35  ;;  %v2684_v54 = vsub.s32 4294967266, %v7396_v39 }
 0x46a   : > { %v7409_v44 = vmul.u32.u64.low %v7356_v25, %v3175_v47  ;;  %v7410_v34 = vmul.u32.u64.high %v7356_v25, %v3175_v47, %v7409_v44  ;;  %v3167_v4 = vsel %vm3161_vm6, %v3164_v11, %v3166_v60  ;;  %v3186_v55 = vadd.s32 1, %v7393_v5 }
 0x46b   : > { %v2588_v12 = vxor.u32 2147483648, %v7353_v23  ;;  %v7416_v6 = vadd.s32 3, %v2905_v61  ;;  %v2680_v49 = vsub.s32 32, %v7396_v39  ;;  %v2934_v13 = vand.u32 31, %v2932_v18 }
 0x46c   : > { %5056 = vcosq.f32 %v2904_v21  ;;  %v2664_v35 = vadd.s32 %v7300_v53, %v7318_v14  ;;  %v7421_v56 = vshll.u32 %v2928_v19, 8  ;;  %v3236_v17 = vshrl.u32 %v3235_v40, 23 }
 0x46d   : > { %5058 = vsinq.f32 %v2904_v21  ;;  %v3183_v45 = vmul.u32 %v7356_v25, %v3167_v4  ;;  %vm3185_vm1 = vc.u32 %v7410_v34, %v7392_v9  ;;  %v2935_v63 = vsub.s32 32, %v2934_v13 }
 0x46e   : > { %v2681_v10 = vshll.u32 %v7358_v42, %v7396_v39  ;;  %v2685_v33 = vadd.s32 127, %v2684_v54  ;;  %v3187_v26 = vsel %vm3185_vm1, %v3186_v55, %v7393_v5  ;;  %v2933_v22 = vshrl.u32 %v2932_v18, 5 }
 0x46f   : > { %v2682_v51 = vshrl.u32 %v2664_v35, %v2680_v49  ;;  %v3188_v62 = vadd.s32 %v3187_v26, %v3183_v45  ;;  %v2937_v53 = vshll.u32 %v8580_v29, %v2934_v13  ;;  %v2938_v14 = vshrl.u32 %v8554_v32, %v2935_v63 }
 0x470   : > { %v2940_v8 = vshll.u32 %v8554_v32, %v2934_v13  ;;  %v2941_v25 = vshrl.u32 %v8553_v27, %v2935_v63  ;;  %v2943_v3 = vshll.u32 %v8553_v27, %v2934_v13  ;;  %v2944_v0 = vshrl.u32 %v8556_v2, %v2935_v63 }
 0x471   : > { %v3189_v57 = vadd.s32 536870912, %v3188_v62  ;;  %v2939_v42 = vor.u32 %v2938_v14, %v2937_v53  ;;  %v2946_v46 = vshll.u32 %v8556_v2, %v2934_v13  ;;  %v2947_v50 = vshrl.u32 %v8617_v20, %v2935_v63 }
 0x472   : > { %v2686_v5 = vshll.u32 %v2685_v33, 23  ;;  %v2942_v39 = vor.u32 %v2941_v25, %v2940_v8  ;;  %v2945_v11 = vor.u32 %v2944_v0, %v2943_v3  ;;  %vm2952_vm7 = vcmp.lt.s32.totalorder %v2933_v22, 1 }
 0x473   : > { %v7437_v60 = vshrl.u32 %v3189_v57, 30  ;;  %v2948_v47 = vor.u32 %v2947_v50, %v2946_v46  ;;  %v2949_v61 = vshll.u32 %v8617_v20, %v2934_v13  ;;  %v2950_v19 = vshrl.u32 %v8618_v28, %v2935_v63 }
 0x474   : > { %v2936_v18 = vshrl.u32 %v8580_v29, %v2935_v63  ;;  %vm2954_vm10 = vcmp.lt.s32.totalorder %v2933_v22, 3  ;;  %vm2955_vm14 = vcmp.lt.s32.totalorder %v2933_v22, 4  ;;  %v2960_v40 = vsel %vm2952_vm7, %v2939_v42, %v2942_v39 }
 0x475   : > { %v3191_v21 = vshll.u32 %v7437_v60, 30  ;;  %v2951_v44 = vor.u32 %v2950_v19, %v2949_v61  ;;  %v2957_v54 = vsel %vm2955_vm14, %v2945_v11, 2102212464  ;;  %v2961_v4 = vsel %vm2955_vm14, %v2948_v47, 920167782 }
 0x476   : > { %v5057_v55 = vpop.eup %5056  ;;  %v2687_v49 = vor.u32 4788187, %v2686_v5  ;;  %vm2953_vm3 = vcmp.lt.s32.totalorder %v2933_v22, 2  ;;  %v2962_v35 = vsel %vm2954_vm10, %v2945_v11, %v2961_v4  ;;  %v2964_v13 = vsel %vm2952_vm7, %v2942_v39, %v2945_v11 }
 0x477   : > { %v5059_v45 = vpop.eup %5058  ;;  %v7446_v33 = vsub.s32 %v3188_v62, %v3191_v21  ;;  %v2956_v63 = vsel %vm2952_vm7, %v2936_v18, %v2939_v42  ;;  %v2963_v26 = vsel %vm2953_vm3, %v2960_v40, %v2962_v35  ;;  %v2965_v53 = vsel %vm2955_vm14, %v2951_v44, 1326507024 }
 0x478   : > { %v2958_v14 = vsel %vm2954_vm10, %v2942_v39, %v2957_v54  ;;  %v2966_v8 = vsel %vm2954_vm10, %v2948_v47, %v2965_v53  ;;  %v7453_v25 = vmul.u32.u64.low %v7421_v56, %v2963_v26  ;;  %v7454_v3 = vmul.u32.u64.high %v7421_v56, %v2963_v26, %v7453_v25 }
 0x479   : > { %vm2506_vm0 = vcmp.lt.s32.totalorder %v7063_v15, 0  ;;  %v2683_v0 = vor.u32 %v2682_v51, %v2681_v10  ;;  %v3194_v62 = vsub.s32 0, %v7446_v33  ;;  %v2967_v57 = vsel %vm2953_vm3, %v2964_v13, %v2966_v8 }
 0x47a   : > { %v2589_v42 = vsel %vm2506_vm0, %v2588_v12, %v7353_v23  ;;  %v7466_v46 = vmul.u32.u64.low %v7421_v56, %v2967_v57  ;;  %v7467_v50 = vmul.u32.u64.high %v7421_v56, %v2967_v57, %v7466_v46  ;;  %v4647_v5 = vadd.s32 4294967169, %v3236_v17 }
 0x47b   : > { %vm7471_vm4 = vcmp.le.f32.partialorder %v2504_v48, 0.7853982  ;;  %v2688_v10 = vand.u32 2147483647, %v2687_v49  ;;  %v2959_v51 = vsel %vm2953_vm3, %v2956_v63, %v2958_v14  ;;  %v7477_v11 = vand.u32 3, %v7416_v6 }
 0x47c   : > { %v2978_v47 = vadd.s32 1, %v7454_v3  ;;  %v8548_v23 = vand.u32 2147483647, %v7365_v37  ;;  %v3242_v12 = vadd.s32 1, %v4647_v5  ;;  %v2592_v17 = vsel %vm7471_vm4, %v7063_v15, %v2589_v42  ;;  %v7509_v46 = vld [vmem:[%s5357_s12] ss:$0 sm:$0xff] }
 0x47d   : > { %v2690_v61 = vcvt.s32.f32 %v2683_v0  ;;  %v4644_v48 = vmin.u32 %v3194_v62, %v7446_v33  ;;  %v2477_v19 = vadd.f32 %v7045_v31, %v7084_v52  ;;  %v2916_v22 = vxor.u32 2147483648, %v5057_v55 }
 0x47e   : > { %v2975_v18 = vmul.u32 %v7421_v56, %v2959_v51  ;;  %vm2977_vm13 = vc.u32 %v7467_v50, %v7453_v25  ;;  %vm3243_vm8 = vcmp.gt.s32.totalorder %v3242_v12, 0  ;;  %v2913_v6 = vxor.u32 2147483648, %v5059_v45 }
 0x47f   : > { %v7490_v40 = vmul.f32 %v2690_v61, %v2688_v10  ;;  %v2979_v21 = vsel %vm2977_vm13, %v2978_v47, %v7454_v3  ;;  %v3244_v44 = vsel %vm3243_vm8, %v3242_v12, 0  ;;  %v3239_v4 = vand.u32 8388607, %v8548_v23 }
 0x480   : > { %v2980_v54 = vadd.s32 %v2979_v21, %v2975_v18  ;;  %v3246_v49 = vand.u32 31, %v3244_v44  ;;  %vm2912_vm11 = vcmp.eq.s32.totalorder %v7477_v11, 0  ;;  %vm2915_vm12 = vcmp.eq.s32.totalorder %v7477_v11, 2 }
 0x481   : > { %v3196_v31 = vclz %v4644_v48  ;;  %5060 = vcosq.f32 %v2592_v17  ;;  %v2493_v35 = vmul.f32 %v7050_v59, %v2477_v19  ;;  %v2914_v13 = vsel %vm2912_vm11, %v5057_v55, %v2913_v6 }
 0x482   : > { %v2981_v52 = vadd.s32 536870912, %v2980_v54  ;;  %v3247_v56 = vsub.s32 32, %v3246_v49  ;;  %5062 = vsinq.f32 %v2592_v17  ;;  %v2917_v63 = vsel %vm2915_vm12, %v2916_v22, %v5059_v45 }
 0x483   : > { %v2692_v26 = vxor.u32 2147483648, %v7490_v40  ;;  %v3240_v14 = vor.u32 8388608, %v3239_v4  ;;  %v4645_v0 = vadd.s32 4294967294, %v3196_v31  ;;  %v3249_v62 = vshll.u32 %v8580_v29, %v3246_v49 }
 0x484   : > { %v7499_v53 = vshrl.u32 %v2981_v52, 30  ;;  %v3250_v8 = vshrl.u32 %v8554_v32, %v3247_v56  ;;  %v3253_v3 = vshrl.u32 %v8553_v27, %v3247_v56  ;;  %v3252_v57 = vshll.u32 %v8554_v32, %v3246_v49 }
 0x485   : > { %v3256_v59 = vshrl.u32 %v8556_v2, %v3247_v56  ;;  %v3245_v55 = vshrl.u32 %v3244_v44, 5  ;;  %v3255_v45 = vshll.u32 %v8553_v27, %v3246_v49  ;;  %v7512_v5 = vadd.f32 %v7509_v46, %v2493_v35 }
 0x486   : > { %v2983_v42 = vshll.u32 %v7499_v53, 30  ;;  %v3251_v10 = vor.u32 %v3250_v8, %v3249_v62  ;;  %v3254_v51 = vor.u32 %v3253_v3, %v3252_v57  ;;  %v3258_v47 = vshll.u32 %v8556_v2, %v3246_v49 }
 0x487   : > { %v3259_v12 = vshrl.u32 %v8617_v20, %v3247_v56  ;;  %vm2610_vm2 = vcmp.lt.s32.totalorder %v7089_v58, 0  ;;  %v3257_v61 = vor.u32 %v3256_v59, %v3255_v45  ;;  %v3261_v48 = vshll.u32 %v8617_v20, %v3246_v49 }
 0x488   : > { %v7517_v17 = vsub.s32 %v2980_v54, %v2983_v42  ;;  %v3262_v19 = vshrl.u32 %v8618_v28, %v3247_v56  ;;  %vm4646_vm6 = vcmp.lt.s32.totalorder %v4645_v0, 0  ;;  %v3280_v18 = vshll.u32 %v3240_v14, 8 }
 0x489   : > { %v3260_v22 = vor.u32 %v3259_v12, %v3258_v47  ;;  %v2590_v6 = vsub.s32 4, %v7190_v1  ;;  %vm3264_vm15 = vcmp.lt.s32.totalorder %v3245_v55, 1  ;;  %v3027_v4 = vand.u32 2139095040, %v7512_v5 }
 0x48a   : > { %v2986_v21 = vsub.s32 0, %v7517_v17  ;;  %v3263_v44 = vor.u32 %v3262_v19, %v3261_v48  ;;  %v3248_v31 = vshrl.u32 %v8580_v29, %v3247_v56  ;;  %vm3266_vm5 = vcmp.lt.s32.totalorder %v3245_v55, 3 }
 0x48b   : > { %vm3267_vm9 = vcmp.lt.s32.totalorder %v3245_v55, 4  ;;  %v3272_v54 = vsel %vm3264_vm15, %v3251_v10, %v3254_v51  ;;  %v7526_v49 = vpop.eup %5060  ;;  %v3276_v8 = vsel %vm3264_vm15, %v3254_v51, %v3257_v61  ;;  %vm3265_vm1 = vcmp.lt.s32.totalorder %v3245_v55, 2 }
 0x48c   : > { %v4636_v52 = vmin.u32 %v2986_v21, %v7517_v17  ;;  %v3269_v35 = vsel %vm3267_vm9, %v3257_v61, 2102212464  ;;  %v3273_v14 = vsel %vm3267_vm9, %v3260_v22, 920167782  ;;  %v7530_v3 = vpop.eup %5062  ;;  %v3277_v57 = vsel %vm3267_vm9, %v3263_v44, 1326507024 }
 0x48d   : > { %v3274_v62 = vsel %vm3266_vm5, %v3257_v61, %v3273_v14  ;;  %v8547_v56 = vand.u32 2147483647, %v7512_v5  ;;  %v7535_v59 = vsel %vm4646_vm6, 0, %v4645_v0  ;;  %v3268_v42 = vsel %vm3264_vm15, %v3248_v31, %v3251_v10 }
 0x48e   : > { %v3275_v45 = vsel %vm3265_vm1, %v3272_v54, %v3274_v62  ;;  %v3278_v47 = vsel %vm3266_vm5, %v3260_v22, %v3277_v57  ;;  %v3270_v12 = vsel %vm3266_vm5, %v3254_v51, %v3269_v35  ;;  %v2988_v61 = vclz %v4636_v52 }
 0x48f   : > { %v3279_v48 = vsel %vm3265_vm1, %v3276_v8, %v3278_v47  ;;  %v7542_v19 = vmul.u32.u64.low %v3280_v18, %v3275_v45  ;;  %v7543_v21 = vmul.u32.u64.high %v3280_v18, %v3275_v45, %v7542_v19  ;;  %v3028_v0 = vshrl.u32 %v3027_v4, 23 }
 0x490   : > { %v7546_v44 = vmul.u32.u64.low %v3280_v18, %v3279_v48  ;;  %v7547_v14 = vmul.u32.u64.high %v3280_v18, %v3279_v48, %v7546_v44  ;;  %vm2911_vm7 = vcmp.lt.s32.totalorder %v7477_v11, 2  ;;  %v2693_v10 = vsel %vm2610_vm2, %v2692_v26, %v7490_v40 }
 0x491   : > { %v2918_v22 = vsel %vm2911_vm7, %v2914_v13, %v2917_v63  ;;  %v3204_v51 = vsub.s32 4294967266, %v7535_v59  ;;  %v3271_v31 = vsel %vm3265_vm1, %v3268_v42, %v3270_v12  ;;  %v4639_v54 = vadd.s32 4294967169, %v3028_v0 }
 0x492   : > { %vm2908_vm10 = vweird.f32 %v7070_v43  ;;  %vm7558_vm14 = vcmp.le.f32.partialorder %v2608_v7, 0.7853982  ;;  %v3290_v11 = vadd.s32 1, %v7543_v21  ;;  %v4637_v13 = vadd.s32 4294967294, %v2988_v61 }
 0x493   : > { %v2696_v40 = vsel %vm7558_vm14, %v7089_v58, %v2693_v10  ;;  %v3031_v63 = vand.u32 8388607, %v8547_v56  ;;  %v2591_v43 = vsel %vm2506_vm0, %v2590_v6, %v7190_v1  ;;  %v7571_v26 = vsel %vm2908_vm10, nan, %v2918_v22 }
 0x494   : > { %v3287_v7 = vmul.u32 %v3280_v18, %v3271_v31  ;;  %vm3289_vm3 = vc.u32 %v7547_v14, %v7542_v19  ;;  %v3034_v55 = vadd.s32 1, %v4639_v54  ;;  %v3184_v4 = vadd.s32 %v7392_v9, %v7410_v34 }
 0x495   : > { %v3200_v35 = vsub.s32 32, %v7535_v59  ;;  %v7578_v8 = vadd.s32 127, %v3204_v51  ;;  %v3291_v62 = vsel %vm3289_vm3, %v3290_v11, %v7543_v21  ;;  %5064 = vcosq.f32 %v2696_v40 }
 0x496   : > { %v3292_v57 = vadd.s32 %v3291_v62, %v3287_v7  ;;  %vm3035_vm13 = vcmp.gt.s32.totalorder %v3034_v55, 0  ;;  %v2593_v1 = vsel %vm7471_vm4, 0, %v2591_v43  ;;  %5066 = vsinq.f32 %v2696_v40 }
 0x497   : > { %vm4638_vm0 = vcmp.lt.s32.totalorder %v4637_v13, 0  ;;  %v3032_v18 = vor.u32 8388608, %v3031_v63  ;;  %v3036_v6 = vsel %vm3035_vm13, %v3034_v55, 0  ;;  %v2601_v9 = vxor.u32 2147483648, %v7530_v3 }
 0x498   : > { %v3293_v42 = vadd.s32 536870912, %v3292_v57  ;;  %v3038_v45 = vand.u32 31, %v3036_v6  ;;  %v2604_v34 = vxor.u32 2147483648, %v7526_v49  ;;  %v7585_v47 = vshrl.u32 %v3184_v4, %v3200_v35 }
 0x499   : > { %v3206_v12 = vshll.u32 %v7578_v8, 23  ;;  %v7590_v48 = vadd.s32 %v7453_v25, %v7467_v50  ;;  %v2597_v39 = vadd.s32 3, %v2593_v1  ;;  %v7592_v21 = vsel %vm4638_vm0, 0, %v4637_v13 }
 0x49a   : > { %v7594_v61 = vshrl.u32 %v3293_v42, 30  ;;  %v3039_v44 = vsub.s32 32, %v3038_v45  ;;  %v2694_v0 = vsub.s32 4, %v7347_v41  ;;  %v3037_v10 = vshrl.u32 %v3036_v6, 5 }
 0x49b   : > { %v3041_v22 = vshll.u32 %v8580_v29, %v3038_v45  ;;  %v3044_v51 = vshll.u32 %v8554_v32, %v3038_v45  ;;  %v7599_v31 = vshll.u32 %v3032_v18, 8  ;;  %v3047_v11 = vshll.u32 %v8553_v27, %v3038_v45 }
 0x49c   : > { %v3295_v54 = vshll.u32 %v7594_v61, 30  ;;  %v3042_v25 = vshrl.u32 %v8554_v32, %v3039_v44  ;;  %v3045_v50 = vshrl.u32 %v8553_v27, %v3039_v44  ;;  %v3048_v40 = vshrl.u32 %v8556_v2, %v3039_v44 }
 0x49d   : > { %v3050_v13 = vshll.u32 %v8556_v2, %v3038_v45  ;;  %v3051_v63 = vshrl.u32 %v8617_v20, %v3039_v44  ;;  %v3054_v43 = vshrl.u32 %v8618_v28, %v3039_v44  ;;  %v3053_v35 = vshll.u32 %v8617_v20, %v3038_v45 }
 0x49e   : > { %v7609_v7 = vsub.s32 %v3292_v57, %v3295_v54  ;;  %v3043_v55 = vor.u32 %v3042_v25, %v3041_v22  ;;  %v3046_v4 = vor.u32 %v3045_v50, %v3044_v51  ;;  %v2996_v62 = vsub.s32 4294967266, %v7592_v21 }
 0x49f   : > { %v3049_v1 = vor.u32 %v3048_v40, %v3047_v11  ;;  %v3052_v18 = vor.u32 %v3051_v63, %v3050_v13  ;;  %v2695_v6 = vsel %vm2610_vm2, %v2694_v0, %v7347_v41  ;;  %v5065_v42 = vpop.eup %5064  ;;  %v3055_v23 = vor.u32 %v3054_v43, %v3053_v35 }
 0x4a0   : > { %v3298_v56 = vsub.s32 0, %v7609_v7  ;;  %vm3056_vm4 = vcmp.lt.s32.totalorder %v3037_v10, 1  ;;  %vm3059_vm8 = vcmp.lt.s32.totalorder %v3037_v10, 4  ;;  %v5067_v57 = vpop.eup %5066  ;;  %v3040_v22 = vshrl.u32 %v8580_v29, %v3039_v44 }
 0x4a1   : > { %v3061_v51 = vsel %vm3059_vm8, %v3049_v1, 2102212464  ;;  %v3064_v45 = vsel %vm3056_vm4, %v3043_v55, %v3046_v4  ;;  %v2598_v54 = vand.u32 3, %v2597_v39  ;;  %vm3058_vm11 = vcmp.lt.s32.totalorder %v3037_v10, 3 }
 0x4a2   : > { %v4648_v25 = vmin.u32 %v3298_v56, %v7609_v7  ;;  %v3065_v50 = vsel %vm3059_vm8, %v3052_v18, 920167782  ;;  %v2697_v41 = vsel %vm7558_vm14, 0, %v2695_v6  ;;  %vm3057_vm12 = vcmp.lt.s32.totalorder %v3037_v10, 2 }
 0x4a3   : > { %v3060_v0 = vsel %vm3056_vm4, %v3040_v22, %v3043_v55  ;;  %v3066_v11 = vsel %vm3058_vm11, %v3049_v1, %v3065_v50  ;;  %v3068_v40 = vsel %vm3056_vm4, %v3046_v4, %v3049_v1  ;;  %v3062_v63 = vsel %vm3058_vm11, %v3046_v4, %v3061_v51 }
 0x4a4   : > { %v3300_v13 = vclz %v4648_v25  ;;  %v3067_v44 = vsel %vm3057_vm12, %v3064_v45, %v3066_v11  ;;  %v3069_v43 = vsel %vm3059_vm8, %v3055_v23, 1326507024  ;;  %vm2600_vm2 = vcmp.eq.s32.totalorder %v2598_v54, 0 }
 0x4a5   : > { %v3070_v35 = vsel %vm3058_vm11, %v3052_v18, %v3069_v43  ;;  %v7626_v39 = vmul.u32.u64.low %v7599_v31, %v3067_v44  ;;  %v7627_v56 = vmul.u32.u64.high %v7599_v31, %v3067_v44, %v7626_v39  ;;  %vm2596_vm6 = vweird.f32 %v7063_v15 }
 0x4a6   : > { %v4649_v38 = vadd.s32 4294967294, %v3300_v13  ;;  %v3071_v52 = vsel %vm3057_vm12, %v3068_v40, %v3070_v35  ;;  %v2602_v55 = vsel %vm2600_vm2, %v7526_v49, %v2601_v9  ;;  %v2701_v1 = vadd.s32 3, %v2697_v41 }
 0x4a7   : > { %v3063_v4 = vsel %vm3057_vm12, %v3060_v0, %v3062_v63  ;;  %v7635_v6 = vmul.u32.u64.low %v7599_v31, %v3071_v52  ;;  %v7636_v23 = vmul.u32.u64.high %v7599_v31, %v3071_v52, %v7635_v6  ;;  %vm2603_vm15 = vcmp.eq.s32.totalorder %v2598_v54, 2 }
 0x4a8   : > { %vm4650_vm5 = vcmp.lt.s32.totalorder %v4649_v38, 0  ;;  %v2605_v18 = vsel %vm2603_vm15, %v2604_v34, %v7530_v3  ;;  %v2702_v22 = vand.u32 3, %v2701_v1  ;;  %v2705_v51 = vxor.u32 2147483648, %v5067_v57 }
 0x4a9   : > { %v2997_v45 = vadd.s32 127, %v2996_v62  ;;  %v3303_v25 = vsel %vm4650_vm5, 0, %v4649_v38  ;;  %v3082_v50 = vadd.s32 1, %v7627_v56  ;;  %v2708_v9 = vxor.u32 2147483648, %v5065_v42 }
 0x4aa   : > { %v2992_v10 = vsub.s32 32, %v7592_v21  ;;  %v3308_v41 = vsub.s32 4294967266, %v3303_v25  ;;  %v3079_v0 = vmul.u32 %v7599_v31, %v3063_v4  ;;  %vm2599_vm9 = vcmp.lt.s32.totalorder %v2598_v54, 2 }
 0x4ab   : > { %v3304_v11 = vsub.s32 32, %v3303_v25  ;;  %vm3081_vm1 = vc.u32 %v7636_v23, %v7626_v39  ;;  %v2606_v40 = vsel %vm2599_vm9, %v2602_v55, %v2605_v18  ;;  %vm2704_vm7 = vcmp.eq.s32.totalorder %v2702_v22, 0 }
 0x4ac   : > { %v3309_v49 = vadd.s32 127, %v3308_v41  ;;  %v3083_v3 = vsel %vm3081_vm1, %v3082_v50, %v7627_v56  ;;  %v2706_v34 = vsel %vm2704_vm7, %v5065_v42, %v2705_v51  ;;  %vm2707_vm10 = vcmp.eq.s32.totalorder %v2702_v22, 2 }
 0x4ad   : > { %v2998_v38 = vshll.u32 %v2997_v45, 23  ;;  %v3084_v62 = vadd.s32 %v3083_v3, %v3079_v0  ;;  %vm2703_vm14 = vcmp.lt.s32.totalorder %v2702_v22, 2  ;;  %v2709_v13 = vsel %vm2707_vm10, %v2708_v9, %v5067_v57 }
 0x4ae   : > { %v3288_v63 = vadd.s32 %v7542_v19, %v7547_v14  ;;  %v3310_v31 = vshll.u32 %v3309_v49, 23  ;;  %vm2700_vm3 = vweird.f32 %v7089_v58  ;;  %v2710_v54 = vsel %vm2703_vm14, %v2706_v34, %v2709_v13 }
 0x4af   : > { %v2994_v44 = vshrl.u32 %v7590_v48, %v2992_v10  ;;  %v3085_v43 = vadd.s32 536870912, %v3084_v62  ;;  %v2607_v35 = vsel %vm2596_vm6, nan, %v2606_v40  ;;  %v2711_v56 = vsel %vm2700_vm3, nan, %v2710_v54 }
 0x4b0   : > { %v3201_v42 = vshll.u32 %v7446_v33, %v7535_v59  ;;  %v3207_v57 = vor.u32 4788187, %v3206_v12  ;;  %v3306_v52 = vshrl.u32 %v3288_v63, %v3304_v11  ;;  %v3336_v55 = vpack.c.bf16 %v2711_v56, %v2607_v35 }
 0x4b1   : > { %v2993_v19 = vshll.u32 %v7517_v17, %v7592_v21  ;;  %v2999_v58 = vor.u32 4788187, %v2998_v38  ;;  %v7659_v14 = vshrl.u32 %v3085_v43, 30  ;;  %v3337_v48 = vpack.c.bf16 %v7571_v26, %v7325_v16 }
 0x4b2   : > { %v3203_v15 = vor.u32 %v7585_v47, %v3201_v42  ;;  %v3305_v1 = vshll.u32 %v7609_v7, %v3303_v25  ;;  %v3311_v4 = vor.u32 4788187, %v3310_v31  ;;  %vm8627_vm13 = vcmask 261120  }
 0x4b3   : > { %4761 = vmatprep.mubr.msk.bf16.mxu0 %vm8627_vm13, %v3336_v55  ;;  %v2995_v33 = vor.u32 %v2994_v44, %v2993_v19  ;;  %v3087_v59 = vshll.u32 %v7659_v14, 30  ;;  %vm8628_vm0 = vmmov %vm8627_vm13  ;;  %v3208_v8 = vand.u32 2147483647, %v3207_v57  ;;  %v3000_v12 = vand.u32 2147483647, %v2999_v58 }
 0x4b4   : > { %4762 = vmatmul.mubr.msk.bf16.vlgmr.msra.gmra.mrb[8].mxu0 %vm8628_vm0, %v3337_v48  ;;  %v3307_v17 = vor.u32 %v3306_v52, %v3305_v1  ;;  %v3210_v6 = vcvt.s32.f32 %v3203_v15  ;;  %v3312_v18 = vand.u32 2147483647, %v3311_v4  ;;  %vm3130_vm4 = vcmp.lt.s32.totalorder %v7292_v24, 0 }
 0x4b5   : > { %v3088_v21 = vsub.s32 %v3084_v62, %v3087_v59  ;;  %v3002_v22 = vcvt.s32.f32 %v2995_v33  ;;  %vm2922_vm11 = vcmp.lt.s32.totalorder %v7333_v30, 0  ;;  %vm3234_vm12 = vcmp.lt.s32.totalorder %v7365_v37, 0 }
 0x4b6   : > { %v3211_v26 = vmul.f32 %v3210_v6, %v3208_v8  ;;  %v3314_v47 = vcvt.s32.f32 %v3307_v17  ;;  %v3080_v49 = vadd.s32 %v7626_v39, %v7636_v23  ;;  %vm7679_vm2 = vcmp.le.f32.partialorder %v3128_v36, 0.7853982 }
 0x4b7   : > { %v3090_v16 = vsub.s32 0, %v3088_v21  ;;  %v3003_v51 = vmul.f32 %v3002_v22, %v3000_v12  ;;  %v8631_v62 = vand.u32 2147483647, %v7333_v30  ;;  %v8634_v44 = vand.u32 2147483647, %v7365_v37 }
 0x4b8   : > { %v3315_v45 = vmul.f32 %v3314_v47, %v3312_v18  ;;  %v3212_v50 = vxor.u32 2147483648, %v3211_v26  ;;  %v3318_v52 = vsub.s32 4, %v7594_v61  ;;  %v3006_v55 = vsub.s32 4, %v7499_v53 }
 0x4b9   : > { %v4640_v7 = vmin.u32 %v3090_v16, %v3088_v21  ;;  %v3004_v9 = vxor.u32 2147483648, %v3003_v51  ;;  %vm7685_vm6 = vcmp.le.f32.partialorder %v8631_v62, 0.7853982  ;;  %vm7699_vm15 = vcmp.le.f32.partialorder %v8634_v44, 0.7853982 }
 0x4ba   : > { %v3316_v41 = vxor.u32 2147483648, %v3315_v45  ;;  %v3213_v0 = vsel %vm3130_vm4, %v3212_v50, %v3211_v26  ;;  %v3214_v48 = vsub.s32 4, %v7437_v60  ;;  %v3110_v1 = vsub.s32 4, %v7659_v14 }
 0x4bb   : > { %v3092_v25 = vclz %v4640_v7  ;;  %v3005_v40 = vsel %vm2922_vm11, %v3004_v9, %v3003_v51  ;;  %v3216_v39 = vsel %vm7679_vm2, %v7292_v24, %v3213_v0  ;;  %v3319_v4 = vsel %vm3234_vm12, %v3318_v52, %v7594_v61 }
 0x4bc   : > { %v3317_v63 = vsel %vm3234_vm12, %v3316_v41, %v3315_v45  ;;  %v3008_v36 = vsel %vm7685_vm6, %v7333_v30, %v3005_v40  ;;  %5068 = vcosq.f32 %v3216_v39  ;;  %v3007_v33 = vsel %vm2922_vm11, %v3006_v55, %v7499_v53 }
 0x4bd   : > { %v4641_v10 = vadd.s32 4294967294, %v3092_v25  ;;  %v3320_v35 = vsel %vm7699_vm15, %v7365_v37, %v3317_v63  ;;  %5070 = vcosq.f32 %v3008_v36  ;;  %v3215_v8 = vsel %vm3130_vm4, %v3214_v48, %v7437_v60 }
 0x4be   : > { %5072 = vcosq.f32 %v3320_v35  ;;  %vm3026_vm5 = vcmp.lt.s32.totalorder %v7512_v5, 0  ;;  %v3321_v17 = vsel %vm7699_vm15, 0, %v3319_v4  ;;  %v8637_v12 = vand.u32 2147483647, %v7512_v5 }
 0x4bf   : > { %vm4642_vm8 = vcmp.lt.s32.totalorder %v4641_v10, 0  ;;  %5074 = vsinq.f32 %v3320_v35  ;;  %v3009_v53 = vsel %vm7685_vm6, 0, %v3007_v33  ;;  %v3111_v6 = vsel %vm3026_vm5, %v3110_v1, %v7659_v14 }
 0x4c0   : > { %v3095_v11 = vsel %vm4642_vm8, 0, %v4641_v10  ;;  %5076 = vsinq.f32 %v3008_v36  ;;  %vm7724_vm9 = vcmp.le.f32.partialorder %v8637_v12, 0.7853982  ;;  %v3217_v22 = vsel %vm7679_vm2, 0, %v3215_v8 }
 0x4c1   : > { %v3096_v3 = vsub.s32 32, %v3095_v11  ;;  %v3100_v34 = vsub.s32 4294967266, %v3095_v11  ;;  %v3097_v23 = vshll.u32 %v3088_v21, %v3095_v11  ;;  %5078 = vsinq.f32 %v3216_v39 }
 0x4c2   : > { %v3325_v26 = vadd.s32 3, %v3321_v17  ;;  %v3013_v51 = vadd.s32 3, %v3009_v53  ;;  %v3113_v7 = vsel %vm7724_vm9, 0, %v3111_v6  ;;  %v3221_v25 = vadd.s32 3, %v3217_v22 }
 0x4c3   : > { %v3098_v31 = vshrl.u32 %v3080_v49, %v3096_v3  ;;  %v3101_v54 = vadd.s32 127, %v3100_v34  ;;  %v3117_v9 = vadd.s32 3, %v3113_v7  ;;  %vm3324_vm6 = vweird.f32 %v7365_v37 }
 0x4c4   : > { %v3326_v10 = vand.u32 3, %v3325_v26  ;;  %v3014_v41 = vand.u32 3, %v3013_v51  ;;  %v3222_v3 = vand.u32 3, %v3221_v25  ;;  %vm3012_vm15 = vweird.f32 %v7333_v30  ;;  %v7747_v30 = vld [vmem:[%s8511_s7 + $0x2] ss:$0 sm:$0xff] }
 0x4c5   : > { %v3099_v56 = vor.u32 %v3098_v31, %v3097_v23  ;;  %v3102_v42 = vshll.u32 %v3101_v54, 23  ;;  %v3118_v62 = vand.u32 3, %v3117_v9 }
 0x4c6   : > { %v5069_v18 = vpop.eup %5068  ;;  %vm3328_vm1 = vcmp.eq.s32.totalorder %v3326_v10, 0  ;;  %vm3331_vm7 = vcmp.eq.s32.totalorder %v3326_v10, 2  ;;  %vm3016_vm10 = vcmp.eq.s32.totalorder %v3014_v41, 0  ;;  %vm3019_vm14 = vcmp.eq.s32.totalorder %v3014_v41, 2 }
 0x4c7   : > { %v3103_v57 = vor.u32 4788187, %v3102_v42  ;;  %v3106_v58 = vcvt.s32.f32 %v3099_v56  ;;  %v5071_v16 = vpop.eup %5070  ;;  %v3228_v38 = vxor.u32 2147483648, %v5069_v18  ;;  %vm3224_vm3 = vcmp.eq.s32.totalorder %v3222_v3, 0 }
 0x4c8   : > { %v5073_v47 = vpop.eup %5072  ;;  %v3020_v49 = vxor.u32 2147483648, %v5071_v16  ;;  %vm3227_vm13 = vcmp.eq.s32.totalorder %v3222_v3, 2  ;;  %vm3327_vm0 = vcmp.lt.s32.totalorder %v3326_v10, 2  ;;  %vm3015_vm4 = vcmp.lt.s32.totalorder %v3014_v41, 2 }
 0x4c9   : > { %v3104_v19 = vand.u32 2147483647, %v3103_v57  ;;  %v5075_v45 = vpop.eup %5074  ;;  %v3332_v11 = vxor.u32 2147483648, %v5073_v47  ;;  %vm3123_vm8 = vcmp.eq.s32.totalorder %v3118_v62, 2  ;;  %vm3120_vm11 = vcmp.eq.s32.totalorder %v3118_v62, 0 }
 0x4ca   : > { %v5077_v14 = vpop.eup %5076  ;;  %v3329_v0 = vxor.u32 2147483648, %v5075_v45  ;;  %vm3223_vm12 = vcmp.lt.s32.totalorder %v3222_v3, 2  ;;  %vm3119_vm2 = vcmp.lt.s32.totalorder %v3118_v62, 2 }
 0x4cb   : > { %v3107_v15 = vmul.f32 %v3106_v58, %v3104_v19  ;;  %v5079_v50 = vpop.eup %5078  ;;  %v3017_v40 = vxor.u32 2147483648, %v5077_v14  ;;  %v3333_v63 = vsel %vm3331_vm7, %v3332_v11, %v5075_v45  ;;  %v3021_v31 = vsel %vm3019_vm14, %v3020_v49, %v5077_v14 }
 0x4cc   : > { %v3225_v34 = vxor.u32 2147483648, %v5079_v50  ;;  %v3330_v13 = vsel %vm3328_vm1, %v5073_v47, %v3329_v0  ;;  %v3229_v43 = vsel %vm3227_vm13, %v3228_v38, %v5079_v50  ;;  %vm8640_vm1 = vcmask 261120  }
 0x4cd   : > { %v3108_v59 = vxor.u32 2147483648, %v3107_v15  ;;  %v3018_v23 = vsel %vm3016_vm10, %v5071_v16, %v3017_v40  ;;  %v3334_v56 = vsel %vm3327_vm0, %v3330_v13, %v3333_v63  ;;  %vm8641_vm7 = vmmov %vm8640_vm1 }
 0x4ce   : > { %v3226_v44 = vsel %vm3224_vm3, %v5069_v18, %v3225_v34  ;;  %v3022_v42 = vsel %vm3015_vm4, %v3018_v23, %v3021_v31  ;;  %v3335_v58 = vsel %vm3324_vm6, nan, %v3334_v56 }
 0x4cf   : > { %v3109_v61 = vsel %vm3026_vm5, %v3108_v59, %v3107_v15  ;;  %v3230_v55 = vsel %vm3223_vm12, %v3226_v44, %v3229_v43  ;;  %vm3116_vm5 = vweird.f32 %v7512_v5  ;;  %v3023_v48 = vsel %vm3012_vm15, nan, %v3022_v42 }
 0x4d0   : > { %v3112_v60 = vsel %vm7724_vm9, %v7512_v5, %v3109_v61  ;;  %vm3220_vm9 = vweird.f32 %v7292_v24  ;;  %v7752_v24 = vld [vmem:[%s6218_s30] ss:$0 sm:$0xff]  ;;  %s4418_s30 = sshll.u32 %s410_s22, 4  ;;  %s8454_s30 = int_to_ptr.vmem [resolvable:$true] %s4418_s30 }
 0x4d1   : > { %5080 = vcosq.f32 %v3112_v60  ;;  %v3231_v4 = vsel %vm3220_vm9, nan, %v3230_v55  ;;  %s5122_s19 = scalar_lea.vmem %s8454_s30, 1024  ;;  %p5129_p1 = scmp.lt.s32.totalorder %s8454_s30, %s5127_s20 }
 0x4d2   : > { %5082 = vsinq.f32 %v3112_v60  ;;  %v3339_v33 = vpack.c.bf16 %v3335_v58, %v3231_v4  ;;  %p5123_p12 = scmp.ne.s32.totalorder %s8454_s30, %s5122_s19  ;;  %p5130_p2 = scmp.lt.s32.totalorder %s5128_s24, %s5122_s19 }
 0x4d4   : > { %p5124_p13 = pnand %p5123_p12, %p5308_p4  ;;  %p5131_p3 = por %p5130_p2, %p5129_p1 }
 0x4d6   : > { %p5125_p0 = pneg %p5124_p13 }
 0x4d8   : > { %p5132_p5 = pnand %p5131_p3, %p5125_p0 }
 0x4db   : > { %v5081_v39 = vpop.eup %5080 }
 0x4dc   : > { %v5083_v54 = vpop.eup %5082  ;;  %v3124_v36 = vxor.u32 2147483648, %v5081_v39 }
 0x4dd   : > { %v3121_v35 = vxor.u32 2147483648, %v5083_v54 }
 0x4de   : > { %v3125_v57 = vsel %vm3123_vm8, %v3124_v36, %v5083_v54 }
 0x4df   : > { %v3122_v52 = vsel %vm3120_vm11, %v5081_v39, %v3121_v35 }
 0x4e0   : > { %v3126_v19 = vsel %vm3119_vm2, %v3122_v52, %v3125_v57 }
 0x4e1   : > { %v3127_v15 = vsel %vm3116_vm5, nan, %v3126_v19 }
 0x4e2   : > { %v3338_v1 = vpack.c.bf16 %v3127_v15, %v3023_v48 }
 0x4e4   : > { %4765 = vmatprep.mubr.msk.bf16.mxu0 %vm8640_vm1, %v3338_v1 }
 0x4e5   : > { %4766 = vmatmul.mubr.msk.bf16.gmra.mrb[12].mxu0 %vm8641_vm7, %v3339_v33 }
 0x587   : > { %v4763_v37 = vpop.f32.mrb[8].mxu0 }
 0x588   : > { %v3420_v5 = vadd.f32 %v4763_v37, %v7747_v30  ;;  %v3411_v59 = vpop.f32.mrb[9].mxu0 }
 0x589   : > { %v3412_v8 = vadd.f32 %v7747_v30, %v3411_v59  ;;  %v4764_v17 = vpop.f32.mrb[10].mxu0 }
 0x58a   : > { %v3444_v12 = vmul.f32 %v7752_v24, %v3420_v5  ;;  %v3423_v21 = vadd.f32 %v4764_v17, %v7747_v30  ;;  %v3414_v61 = vpop.f32.mrb[11].mxu0 }
 0x58b   : > { %v3442_v53 = vmul.f32 %v7752_v24, %v3412_v8  ;;  %v3415_v45 = vadd.f32 %v7747_v30, %v3414_v61 }
 0x58c   : > { %v7758_v6 = vadd.f32 %v7509_v46, %v3444_v12  ;;  %v3445_v18 = vmul.f32 %v7752_v24, %v3423_v21 }
 0x58d   : > { %v7762_v60 = vadd.f32 %v7509_v46, %v3442_v53  ;;  %v3443_v40 = vmul.f32 %v7752_v24, %v3415_v45 }
 0x58e   : > { %v3666_v22 = vand.u32 2147483647, %v7758_v6  ;;  %v3669_v16 = vand.u32 2139095040, %v7758_v6  ;;  %v7769_v51 = vadd.f32 %v7509_v46, %v3445_v18  ;;  %vm3668_vm9 = vcmp.lt.s32.totalorder %v7758_v6, 0 }
 0x58f   : > { %v3458_v26 = vand.u32 2147483647, %v7762_v60  ;;  %v3461_v47 = vand.u32 2139095040, %v7762_v60  ;;  %v7780_v31 = vadd.f32 %v7509_v46, %v3443_v40 }
 0x590   : > { %v3670_v7 = vshrl.u32 %v3669_v16, 23  ;;  %v3673_v25 = vand.u32 8388607, %v3666_v22  ;;  %v3773_v10 = vand.u32 2139095040, %v7769_v51  ;;  %v3770_v38 = vand.u32 2147483647, %v7769_v51 }
 0x591   : > { %v3462_v14 = vshrl.u32 %v3461_v47, 23  ;;  %v3465_v50 = vand.u32 8388607, %v3458_v26 }
 0x592   : > { %v4671_v9 = vadd.s32 4294967169, %v3670_v7  ;;  %v3774_v11 = vshrl.u32 %v3773_v10, 23  ;;  %v3674_v49 = vor.u32 8388608, %v3673_v25  ;;  %v7788_v44 = vand.u32 8388607, %v3770_v38 }
 0x593   : > { %v4663_v41 = vadd.s32 4294967169, %v3462_v14  ;;  %v3466_v3 = vor.u32 8388608, %v3465_v50 }
 0x594   : > { %v3676_v0 = vadd.s32 1, %v4671_v9  ;;  %v4675_v62 = vadd.s32 4294967169, %v3774_v11  ;;  %v7782_v54 = vshll.u32 %v3674_v49, 8 }
 0x595   : > { %v3468_v34 = vadd.s32 1, %v4663_v41  ;;  %v7784_v36 = vshll.u32 %v3466_v3, 8 }
 0x596   : > { %vm3677_vm10 = vcmp.gt.s32.totalorder %v3676_v0, 0  ;;  %v7790_v43 = vadd.s32 1, %v4675_v62 }
 0x597   : > { %v3678_v13 = vsel %vm3677_vm10, %v3676_v0, 0  ;;  %vm3469_vm14 = vcmp.gt.s32.totalorder %v3468_v34, 0 }
 0x598   : > { %v3679_v63 = vshrl.u32 %v3678_v13, 5  ;;  %v3680_v39 = vand.u32 31, %v3678_v13  ;;  %v3470_v23 = vsel %vm3469_vm14, %v3468_v34, 0  ;;  %vm3781_vm15 = vcmp.gt.s32.totalorder %v7790_v43, 0 }
 0x599   : > { %v7793_v42 = vshrl.u32 %v3470_v23, 5  ;;  %v3472_v57 = vand.u32 31, %v3470_v23 }
 0x59a   : > { %v3681_v35 = vsub.s32 32, %v3680_v39  ;;  %v3683_v56 = vshll.u32 %v8580_v29, %v3680_v39  ;;  %v3686_v52 = vshll.u32 %v8554_v32, %v3680_v39  ;;  %v3689_v46 = vshll.u32 %v8553_v27, %v3680_v39 }
 0x59b   : > { %v3692_v55 = vshll.u32 %v8556_v2, %v3680_v39  ;;  %v3695_v19 = vshll.u32 %v8617_v20, %v3680_v39  ;;  %vm3698_vm3 = vcmp.lt.s32.totalorder %v3679_v63, 1  ;;  %vm3699_vm13 = vcmp.lt.s32.totalorder %v3679_v63, 2 }
 0x59c   : > { %v3684_v58 = vshrl.u32 %v8554_v32, %v3681_v35  ;;  %v3687_v48 = vshrl.u32 %v8553_v27, %v3681_v35  ;;  %v3690_v15 = vshrl.u32 %v8556_v2, %v3681_v35  ;;  %v3682_v1 = vshrl.u32 %v8580_v29, %v3681_v35 }
 0x59d   : > { %v3693_v4 = vshrl.u32 %v8617_v20, %v3681_v35  ;;  %v3696_v33 = vshrl.u32 %v8618_v28, %v3681_v35  ;;  %v3473_v8 = vsub.s32 32, %v3472_v57  ;;  %vm3700_vm0 = vcmp.lt.s32.totalorder %v3679_v63, 3 }
 0x59e   : > { %v3685_v37 = vor.u32 %v3684_v58, %v3683_v56  ;;  %v3688_v5 = vor.u32 %v3687_v48, %v3686_v52  ;;  %v3691_v59 = vor.u32 %v3690_v15, %v3689_v46  ;;  %vm3701_vm4 = vcmp.lt.s32.totalorder %v3679_v63, 4 }
 0x59f   : > { %v3694_v17 = vor.u32 %v3693_v4, %v3692_v55  ;;  %v3697_v12 = vor.u32 %v3696_v33, %v3695_v19  ;;  %v3475_v45 = vshll.u32 %v8580_v29, %v3472_v57  ;;  %v3476_v50 = vshrl.u32 %v8554_v32, %v3473_v8 }
 0x5a0   : > { %v3702_v21 = vsel %vm3698_vm3, %v3682_v1, %v3685_v37  ;;  %v3703_v61 = vsel %vm3701_vm4, %v3691_v59, 2102212464  ;;  %v3706_v53 = vsel %vm3698_vm3, %v3685_v37, %v3688_v5  ;;  %v3710_v18 = vsel %vm3698_vm3, %v3688_v5, %v3691_v59 }
 0x5a1   : > { %v3704_v16 = vsel %vm3700_vm0, %v3688_v5, %v3703_v61  ;;  %v3707_v47 = vsel %vm3701_vm4, %v3694_v17, 920167782  ;;  %v3711_v7 = vsel %vm3701_vm4, %v3697_v12, 1326507024  ;;  %v3478_v9 = vshll.u32 %v8554_v32, %v3472_v57 }
 0x5a2   : > { %v3708_v25 = vsel %vm3700_vm0, %v3691_v59, %v3707_v47  ;;  %v3712_v14 = vsel %vm3700_vm0, %v3694_v17, %v3711_v7  ;;  %v3705_v10 = vsel %vm3699_vm13, %v3702_v21, %v3704_v16  ;;  %v3479_v11 = vshrl.u32 %v8553_v27, %v3473_v8 }
 0x5a3   : > { %v3709_v41 = vsel %vm3699_vm13, %v3706_v53, %v3708_v25  ;;  %v3713_v0 = vsel %vm3699_vm13, %v3710_v18, %v3712_v14  ;;  %v3477_v62 = vor.u32 %v3476_v50, %v3475_v45  ;;  %v3481_v39 = vshll.u32 %v8553_v27, %v3472_v57 }
 0x5a4   : > { %v7816_v40 = vmul.u32.u64.low %v7782_v54, %v3713_v0  ;;  %v7817_v49 = vmul.u32.u64.high %v7782_v54, %v3713_v0, %v7816_v40  ;;  %v7820_v3 = vmul.u32.u64.low %v7782_v54, %v3709_v41  ;;  %v7821_v34 = vmul.u32.u64.high %v7782_v54, %v3709_v41, %v7820_v3 }
 0x5a5   : > { %v3480_v13 = vor.u32 %v3479_v11, %v3478_v9  ;;  %v3482_v23 = vshrl.u32 %v8556_v2, %v3473_v8  ;;  %v3474_v63 = vshrl.u32 %v8580_v29, %v3473_v8  ;;  %v3484_v35 = vshll.u32 %v8556_v2, %v3472_v57 }
 0x5a6   : > { %v3485_v56 = vshrl.u32 %v8617_v20, %v3473_v8  ;;  %v3488_v52 = vshrl.u32 %v8618_v28, %v3473_v8  ;;  %v3721_v46 = vmul.u32 %v7782_v54, %v3705_v10  ;;  %v3487_v19 = vshll.u32 %v8617_v20, %v3472_v57 }
 0x5a7   : > { %v3483_v55 = vor.u32 %v3482_v23, %v3481_v39  ;;  %vm3490_vm8 = vcmp.lt.s32.totalorder %v7793_v42, 1  ;;  %vm3723_vm11 = vc.u32 %v7817_v49, %v7820_v3  ;;  %v3724_v58 = vadd.s32 1, %v7821_v34 }
 0x5a8   : > { %v3486_v48 = vor.u32 %v3485_v56, %v3484_v35  ;;  %vm3491_vm12 = vcmp.lt.s32.totalorder %v7793_v42, 2  ;;  %v3489_v15 = vor.u32 %v3488_v52, %v3487_v19  ;;  %vm3492_vm2 = vcmp.lt.s32.totalorder %v7793_v42, 3 }
 0x5a9   : > { %vm3493_vm6 = vcmp.lt.s32.totalorder %v7793_v42, 4  ;;  %v3498_v1 = vsel %vm3490_vm8, %v3477_v62, %v3480_v13  ;;  %v3725_v54 = vsel %vm3723_vm11, %v3724_v58, %v7821_v34  ;;  %v3502_v33 = vsel %vm3490_vm8, %v3480_v13, %v3483_v55 }
 0x5aa   : > { %v3495_v4 = vsel %vm3493_vm6, %v3483_v55, 2102212464  ;;  %v3499_v57 = vsel %vm3493_vm6, %v3486_v48, 920167782  ;;  %v3726_v37 = vadd.s32 %v3725_v54, %v3721_v46  ;;  %v3494_v5 = vsel %vm3490_vm8, %v3474_v63, %v3477_v62 }
 0x5ab   : > { %v3500_v59 = vsel %vm3492_vm2, %v3483_v55, %v3499_v57  ;;  %v3503_v8 = vsel %vm3493_vm6, %v3489_v15, 1326507024  ;;  %v3496_v17 = vsel %vm3492_vm2, %v3480_v13, %v3495_v4  ;;  %v3782_v45 = vsel %vm3781_vm15, %v7790_v43, 0 }
 0x5ac   : > { %v3501_v12 = vsel %vm3491_vm12, %v3498_v1, %v3500_v59  ;;  %v3504_v21 = vsel %vm3492_vm2, %v3486_v48, %v3503_v8  ;;  %v3727_v61 = vadd.s32 536870912, %v3726_v37  ;;  %v3497_v14 = vsel %vm3491_vm12, %v3494_v5, %v3496_v17 }
 0x5ad   : > { %v3505_v53 = vsel %vm3491_vm12, %v3502_v33, %v3504_v21  ;;  %v7846_v18 = vmul.u32.u64.low %v7784_v36, %v3501_v12  ;;  %v7847_v16 = vmul.u32.u64.high %v7784_v36, %v3501_v12, %v7846_v18  ;;  %v3778_v50 = vor.u32 8388608, %v7788_v44 }
 0x5ae   : > { %v7851_v47 = vmul.u32.u64.low %v7784_v36, %v3505_v53  ;;  %v7852_v7 = vmul.u32.u64.high %v7784_v36, %v3505_v53, %v7851_v47  ;;  %v7855_v25 = vshrl.u32 %v3727_v61, 30  ;;  %v3784_v9 = vand.u32 31, %v3782_v45 }
 0x5af   : > { %v3565_v10 = vand.u32 2139095040, %v7780_v31  ;;  %v3516_v0 = vadd.s32 1, %v7847_v16  ;;  %v3513_v40 = vmul.u32 %v7784_v36, %v3497_v14  ;;  %v7869_v34 = vshll.u32 %v3778_v50, 8 }
 0x5b0   : > { %v3729_v41 = vshll.u32 %v7855_v25, 30  ;;  %v3785_v11 = vsub.s32 32, %v3784_v9  ;;  %vm3515_vm5 = vc.u32 %v7852_v7, %v7846_v18  ;;  %v3787_v63 = vshll.u32 %v8580_v29, %v3784_v9 }
 0x5b1   : > { %v3517_v42 = vsel %vm3515_vm5, %v3516_v0, %v7847_v16  ;;  %v3566_v39 = vshrl.u32 %v3565_v10, 23  ;;  %v3790_v36 = vshll.u32 %v8554_v32, %v3784_v9  ;;  %v3722_v56 = vadd.s32 %v7820_v3, %v7817_v49 }
 0x5b2   : > { %v7866_v43 = vsub.s32 %v3726_v37, %v3729_v41  ;;  %v3518_v44 = vadd.s32 %v3517_v42, %v3513_v40  ;;  %v3788_v62 = vshrl.u32 %v8554_v32, %v3785_v11  ;;  %v3791_v13 = vshrl.u32 %v8553_v27, %v3785_v11 }
 0x5b3   : > { %v3794_v35 = vshrl.u32 %v8556_v2, %v3785_v11  ;;  %v3783_v46 = vshrl.u32 %v3782_v45, 5  ;;  %v3793_v55 = vshll.u32 %v8553_v27, %v3784_v9  ;;  %v3797_v15 = vshrl.u32 %v8617_v20, %v3785_v11 }
 0x5b4   : > { %v3732_v23 = vsub.s32 0, %v7866_v43  ;;  %v3519_v52 = vadd.s32 536870912, %v3518_v44  ;;  %v3789_v58 = vor.u32 %v3788_v62, %v3787_v63  ;;  %v3792_v48 = vor.u32 %v3791_v13, %v3790_v36 }
 0x5b5   : > { %v3795_v54 = vor.u32 %v3794_v35, %v3793_v55  ;;  %v3796_v4 = vshll.u32 %v8556_v2, %v3784_v9  ;;  %v3800_v57 = vshrl.u32 %v8618_v28, %v3785_v11  ;;  %v3752_v3 = vsub.s32 4, %v7855_v25 }
 0x5b6   : > { %v4672_v19 = vmin.u32 %v3732_v23, %v7866_v43  ;;  %v7882_v1 = vshrl.u32 %v3519_v52, 30  ;;  %v3799_v33 = vshll.u32 %v8617_v20, %v3784_v9  ;;  %v4667_v37 = vadd.s32 4294967169, %v3566_v39 }
 0x5b7   : > { %v3786_v8 = vshrl.u32 %v8580_v29, %v3785_v11  ;;  %v3798_v17 = vor.u32 %v3797_v15, %v3796_v4  ;;  %vm3802_vm1 = vcmp.lt.s32.totalorder %v3783_v46, 1  ;;  %vm3804_vm7 = vcmp.lt.s32.totalorder %v3783_v46, 3 }
 0x5b8   : > { %v3734_v49 = vclz %v4672_v19  ;;  %v7889_v5 = vpop.f32.mrb[12].mxu0  ;;  %v3521_v59 = vshll.u32 %v7882_v1, 30  ;;  %v3801_v61 = vor.u32 %v3800_v57, %v3799_v33  ;;  %vm3805_vm10 = vcmp.lt.s32.totalorder %v3783_v46, 4 }
 0x5b9   : > { %v7893_v12 = vpop.f32.mrb[13].mxu0  ;;  %v3807_v47 = vsel %vm3805_vm10, %v3795_v54, 2102212464  ;;  %v3810_v45 = vsel %vm3802_vm1, %v3789_v58, %v3792_v48  ;;  %v3811_v14 = vsel %vm3805_vm10, %v3798_v17, 920167782  ;;  %vm3803_vm3 = vcmp.lt.s32.totalorder %v3783_v46, 2 }
 0x5ba   : > { %v4673_v21 = vadd.s32 4294967294, %v3734_v49  ;;  %v7895_v53 = vpop.f32.mrb[14].mxu0  ;;  %v7897_v16 = vsub.s32 %v3518_v44, %v3521_v59  ;;  %v3806_v9 = vsel %vm3802_vm1, %v3786_v8, %v3789_v58  ;;  %v3812_v10 = vsel %vm3804_vm7, %v3795_v54, %v3811_v14 }
 0x5bb   : > { %v7902_v50 = vpop.f32.mrb[15].mxu0  ;;  %v3813_v11 = vsel %vm3803_vm3, %v3810_v45, %v3812_v10  ;;  %v3814_v40 = vsel %vm3802_vm1, %v3792_v48, %v3795_v54  ;;  %v3808_v62 = vsel %vm3804_vm7, %v3792_v48, %v3807_v47  ;;  %v3815_v13 = vsel %vm3805_vm10, %v3801_v61, 1326507024 }
 0x5bc   : > { %vm4674_vm14 = vcmp.lt.s32.totalorder %v4673_v21, 0  ;;  %v3524_v0 = vsub.s32 0, %v7897_v16  ;;  %v3816_v23 = vsel %vm3804_vm7, %v3798_v17, %v3815_v13  ;;  %v3753_v58 = vsel %vm3668_vm9, %v3752_v3, %v7855_v25 }
 0x5bd   : > { %v3737_v41 = vsel %vm4674_vm14, 0, %v4673_v21  ;;  %v7914_v63 = vmul.u32.u64.low %v7869_v34, %v3813_v11  ;;  %v7915_v36 = vmul.u32.u64.high %v7869_v34, %v3813_v11, %v7914_v63  ;;  %v3817_v19 = vsel %vm3803_vm3, %v3814_v40, %v3816_v23 }
 0x5be   : > { %v3738_v42 = vsub.s32 32, %v3737_v41  ;;  %v3742_v44 = vsub.s32 4294967266, %v3737_v41  ;;  %v4664_v39 = vmin.u32 %v3524_v0, %v7897_v16  ;;  %v3739_v35 = vshll.u32 %v7866_v43, %v3737_v41 }
 0x5bf   : > { %v7924_v48 = vmul.u32.u64.low %v7869_v34, %v3817_v19  ;;  %v7925_v15 = vmul.u32.u64.high %v7869_v34, %v3817_v19, %v7924_v48  ;;  %v3572_v54 = vadd.s32 1, %v4667_v37  ;;  %v3809_v49 = vsel %vm3803_vm3, %v3806_v9, %v3808_v62 }
 0x5c0   : > { %v3740_v52 = vshrl.u32 %v3722_v56, %v3738_v42  ;;  %v3743_v55 = vadd.s32 127, %v3742_v44  ;;  %vm7930_vm13 = vcmp.le.f32.partialorder %v3666_v22, 0.7853982  ;;  %v3526_v56 = vclz %v4664_v39 }
 0x5c1   : > { %v3828_v33 = vadd.s32 1, %v7915_v36  ;;  %vm3573_vm0 = vcmp.gt.s32.totalorder %v3572_v54, 0  ;;  %v3755_v3 = vsel %vm7930_vm13, 0, %v3753_v58  ;;  %v3825_v37 = vmul.u32 %v7869_v34, %v3809_v49 }
 0x5c2   : > { %v3741_v4 = vor.u32 %v3740_v52, %v3739_v35  ;;  %v3744_v57 = vshll.u32 %v3743_v55, 23  ;;  %v3574_v59 = vsel %vm3573_vm0, %v3572_v54, 0  ;;  %vm3827_vm4 = vc.u32 %v7925_v15, %v7914_v63 }
 0x5c3   : > { %v3562_v46 = vand.u32 2147483647, %v7780_v31  ;;  %v3829_v17 = vsel %vm3827_vm4, %v3828_v33, %v7915_v36  ;;  %v3576_v21 = vand.u32 31, %v3574_v59  ;;  %v3759_v61 = vadd.s32 3, %v3755_v3 }
 0x5c4   : > { %v3745_v25 = vor.u32 4788187, %v3744_v57  ;;  %v3748_v8 = vcvt.s32.f32 %v3741_v4  ;;  %v4665_v47 = vadd.s32 4294967294, %v3526_v56  ;;  %v3830_v45 = vadd.s32 %v3829_v17, %v3825_v37 }
 0x5c5   : > { %v3577_v9 = vsub.s32 32, %v3576_v21  ;;  %v3569_v34 = vand.u32 8388607, %v3562_v46  ;;  %v7944_v0 = vand.u32 3, %v3759_v61  ;;  %v3575_v44 = vshrl.u32 %v3574_v59, 5 }
 0x5c6   : > { %v3746_v22 = vand.u32 2147483647, %v3745_v25  ;;  %v3831_v10 = vadd.s32 536870912, %v3830_v45  ;;  %vm4666_vm8 = vcmp.lt.s32.totalorder %v4665_v47, 0  ;;  %v3579_v36 = vshll.u32 %v8580_v29, %v3576_v21 }
 0x5c7   : > { %v3586_v40 = vshrl.u32 %v8556_v2, %v3577_v9  ;;  %v3580_v62 = vshrl.u32 %v8554_v32, %v3577_v9  ;;  %v3583_v13 = vshrl.u32 %v8553_v27, %v3577_v9  ;;  %v3585_v35 = vshll.u32 %v8553_v27, %v3576_v21 }
 0x5c8   : > { %v3749_v14 = vmul.f32 %v3748_v8, %v3746_v22  ;;  %v7946_v11 = vshrl.u32 %v3831_v10, 30  ;;  %v3582_v52 = vshll.u32 %v8554_v32, %v3576_v21  ;;  %v3588_v55 = vshll.u32 %v8556_v2, %v3576_v21 }
 0x5c9   : > { %v3589_v19 = vshrl.u32 %v8617_v20, %v3577_v9  ;;  %v7963_v58 = vsel %vm4666_vm8, 0, %v4665_v47  ;;  %v3587_v54 = vor.u32 %v3586_v40, %v3585_v35  ;;  %v3581_v4 = vor.u32 %v3580_v62, %v3579_v36 }
 0x5ca   : > { %v3750_v41 = vxor.u32 2147483648, %v3749_v14  ;;  %v3833_v23 = vshll.u32 %v7946_v11, 30  ;;  %v3584_v57 = vor.u32 %v3583_v13, %v3582_v52  ;;  %v3592_v43 = vshrl.u32 %v8618_v28, %v3577_v9 }
 0x5cb   : > { %v3590_v49 = vor.u32 %v3589_v19, %v3588_v55  ;;  %v3570_v33 = vor.u32 8388608, %v3569_v34  ;;  %vm3765_vm11 = vcmp.eq.s32.totalorder %v7944_v0, 2  ;;  %v3534_v25 = vsub.s32 4294967266, %v7963_v58 }
 0x5cc   : > { %v3751_v42 = vsel %vm3668_vm9, %v3750_v41, %v3749_v14  ;;  %v7965_v48 = vsub.s32 %v3830_v45, %v3833_v23  ;;  %v3591_v3 = vshll.u32 %v8617_v20, %v3576_v21  ;;  %vm3597_vm12 = vcmp.lt.s32.totalorder %v3575_v44, 4 }
 0x5cd   : > { %v3754_v39 = vsel %vm7930_vm13, %v7758_v6, %v3751_v42  ;;  %v3436_v59 = vadd.f32 %v7889_v5, %v7747_v30  ;;  %vm3762_vm2 = vcmp.eq.s32.totalorder %v7944_v0, 0  ;;  %v3578_v22 = vshrl.u32 %v8580_v29, %v3577_v9 }
 0x5ce   : > { %5084 = vcosq.f32 %v3754_v39  ;;  %v3836_v56 = vsub.s32 0, %v7965_v48  ;;  %vm3594_vm6 = vcmp.lt.s32.totalorder %v3575_v44, 1  ;;  %v3599_v8 = vsel %vm3597_vm12, %v3587_v54, 2102212464 }
 0x5cf   : > { %5086 = vsinq.f32 %v3754_v39  ;;  %vm3761_vm15 = vcmp.lt.s32.totalorder %v7944_v0, 2  ;;  %v3593_v17 = vor.u32 %v3592_v43, %v3591_v3  ;;  %vm3596_vm5 = vcmp.lt.s32.totalorder %v3575_v44, 3  ;;  %v4986_v43 = vld [vmem:[%s8512_s8] sm:$0xff]  }
 0x5d0   : > { %v4676_v37 = vmin.u32 %v3836_v56, %v7965_v48  ;;  %v3602_v61 = vsel %vm3594_vm6, %v3581_v4, %v3584_v57  ;;  %v3603_v21 = vsel %vm3597_vm12, %v3590_v49, 920167782  ;;  %vm3758_vm9 = vweird.f32 %v7758_v6  ;;  %4769 = vmatprep.subr.bf16.mxu1 %v4986_v43 }
 0x5d1   : > { %v3604_v47 = vsel %vm3596_vm5, %v3587_v54, %v3603_v21  ;;  %v3610_v45 = vshll.u32 %v3570_v33, 8  ;;  %v3428_v14 = vadd.f32 %v7747_v30, %v7893_v12  ;;  %vm3595_vm1 = vcmp.lt.s32.totalorder %v3575_v44, 2  ;;  %4770 = vmatpush3.bf16.msra.mxu1 %v4986_v43 }
 0x5d2   : > { %v3838_v5 = vclz %v4676_v37  ;;  %v3598_v9 = vsel %vm3594_vm6, %v3578_v22, %v3581_v4  ;;  %v3600_v10 = vsel %vm3596_vm5, %v3584_v57, %v3599_v8  ;;  %v3448_v41 = vmul.f32 %v7752_v24, %v3436_v59 }
 0x5d3   : > { %v3826_v34 = vadd.s32 %v7914_v63, %v7925_v15  ;;  %v3605_v42 = vsel %vm3595_vm1, %v3602_v61, %v3604_v47  ;;  %v3606_v62 = vsel %vm3594_vm6, %v3584_v57, %v3587_v54  ;;  %v3535_v39 = vadd.s32 127, %v3534_v25  ;;  %v8001_v54 = vld [vmem:[%s5357_s12] ss:$0 sm:$0xff]  ;;  %v4987_v47 = vld [vmem:[%s8512_s8 + $0x8] sm:$0xff]  }
 0x5d4   : > { %v4677_v40 = vadd.s32 4294967294, %v3838_v5  ;;  %v3607_v12 = vsel %vm3597_vm12, %v3593_v17, 1326507024  ;;  %v7993_v23 = vmul.u32.u64.low %v3610_v45, %v3605_v42  ;;  %v7994_v36 = vmul.u32.u64.high %v3610_v45, %v3605_v42, %v7993_v23  ;;  %4771 = vmatprep.subr.bf16.mxu1 %v4987_v47 }
 0x5d5   : > { %v3601_v55 = vsel %vm3595_vm1, %v3598_v9, %v3600_v10  ;;  %v3608_v63 = vsel %vm3596_vm5, %v3590_v49, %v3607_v12  ;;  %v8004_v57 = vadd.f32 %v8001_v54, %v3448_v41  ;;  %v3446_v5 = vmul.f32 %v7752_v24, %v3428_v14  ;;  %4772 = vmatpush3.bf16.msra.mxu1 %v4987_v47 }
 0x5d6   : > { %vm4678_vm7 = vcmp.lt.s32.totalorder %v4677_v40, 0  ;;  %v3609_v4 = vsel %vm3595_vm1, %v3606_v62, %v3608_v63  ;;  %v3620_v37 = vadd.s32 1, %v7994_v36  ;;  %v3530_v0 = vsub.s32 32, %v7963_v58 }
 0x5d7   : > { %v3841_v19 = vsel %vm4678_vm7, 0, %v4677_v40  ;;  %v8014_v3 = vmul.u32.u64.low %v3610_v45, %v3609_v4  ;;  %v8015_v59 = vmul.u32.u64.high %v3610_v45, %v3609_v4, %v8014_v3  ;;  %v4082_v61 = vand.u32 2147483647, %v8004_v57 }
 0x5d8   : > { %v5085_v13 = vpop.eup %5084  ;;  %v3842_v33 = vsub.s32 32, %v3841_v19  ;;  %v3843_v25 = vshll.u32 %v7965_v48, %v3841_v19  ;;  %v3846_v49 = vsub.s32 4294967266, %v3841_v19  ;;  %v4085_v21 = vand.u32 2139095040, %v8004_v57 }
 0x5d9   : > { %v5087_v35 = vpop.eup %5086  ;;  %v3766_v52 = vxor.u32 2147483648, %v5085_v13  ;;  %v3617_v41 = vmul.u32 %v3610_v45, %v3601_v55  ;;  %vm3619_vm10 = vc.u32 %v8015_v59, %v7993_v23  ;;  %v8034_v6 = vadd.f32 %v8001_v54, %v3446_v5 }
 0x5da   : > { %v3763_v15 = vxor.u32 2147483648, %v5087_v35  ;;  %v3844_v8 = vshrl.u32 %v3826_v34, %v3842_v33  ;;  %v3847_v17 = vadd.s32 127, %v3846_v49  ;;  %v4086_v34 = vshrl.u32 %v4085_v21, 23 }
 0x5db   : > { %v3767_v56 = vsel %vm3765_vm11, %v3766_v52, %v5087_v35  ;;  %v3536_v40 = vshll.u32 %v3535_v39, 23  ;;  %v3621_v14 = vsel %vm3619_vm10, %v3620_v37, %v7994_v36  ;;  %v4089_v62 = vand.u32 8388607, %v4082_v61 }
 0x5dc   : > { %v3764_v44 = vsel %vm3762_vm2, %v5085_v13, %v3763_v15  ;;  %v3845_v9 = vor.u32 %v3844_v8, %v3843_v25  ;;  %v3848_v10 = vshll.u32 %v3847_v17, 23  ;;  %v3856_v13 = vsub.s32 4, %v7946_v11 }
 0x5dd   : > { %v3768_v22 = vsel %vm3761_vm15, %v3764_v44, %v3767_v56  ;;  %v3622_v12 = vadd.s32 %v3621_v14, %v3617_v41  ;;  %v4687_v45 = vadd.s32 4294967169, %v4086_v34  ;;  %v3514_v35 = vadd.s32 %v7846_v18, %v7852_v7 }
 0x5de   : > { %v8023_v48 = vsel %vm3758_vm9, nan, %v3768_v22  ;;  %v3849_v42 = vor.u32 4788187, %v3848_v10  ;;  %v3852_v55 = vcvt.s32.f32 %v3845_v9  ;;  %v3877_v63 = vand.u32 2139095040, %v8034_v6 }
 0x5df   : > { %vm3772_vm14 = vcmp.lt.s32.totalorder %v7769_v51, 0  ;;  %v3623_v39 = vadd.s32 536870912, %v3622_v12  ;;  %v4092_v15 = vadd.s32 1, %v4687_v45  ;;  %v3532_v36 = vshrl.u32 %v3514_v35, %v3530_v0 }
 0x5e0   : > { %v3850_v52 = vand.u32 2147483647, %v3849_v42  ;;  %v8044_v19 = vor.u32 4788187, %v3536_v40  ;;  %v4090_v43 = vor.u32 8388608, %v4089_v62  ;;  %v8049_v56 = vsel %vm3772_vm14, %v3856_v13, %v7946_v11 }
 0x5e1   : > { %v8051_v33 = vshrl.u32 %v3623_v39, 30  ;;  %vm4093_vm3 = vcmp.gt.s32.totalorder %v4092_v15, 0  ;;  %v3874_v18 = vand.u32 2147483647, %v8034_v6  ;;  %v3531_v7 = vshll.u32 %v7897_v16, %v7963_v58 }
 0x5e2   : > { %v3853_v4 = vmul.f32 %v3852_v55, %v3850_v52  ;;  %v4094_v49 = vsel %vm4093_vm3, %v4092_v15, 0  ;;  %v3878_v44 = vshrl.u32 %v3877_v63, 23  ;;  %vm8058_vm13 = vcmp.le.f32.partialorder %v3770_v38, 0.7853982 }
 0x5e3   : > { %v3625_v11 = vshll.u32 %v8051_v33, 30  ;;  %v4096_v37 = vand.u32 31, %v4094_v49  ;;  %v8063_v22 = vor.u32 %v3532_v36, %v3531_v7  ;;  %v3538_v8 = vand.u32 2147483647, %v8044_v19 }
 0x5e4   : > { %v3854_v25 = vxor.u32 2147483648, %v3853_v4  ;;  %v3859_v16 = vsel %vm8058_vm13, 0, %v8049_v56  ;;  %v8069_v58 = vshll.u32 %v4090_v43, 8  ;;  %v8075_v38 = vand.u32 8388607, %v3874_v18 }
 0x5e5   : > { %v8071_v17 = vsub.s32 %v3622_v12, %v3625_v11  ;;  %v4097_v21 = vsub.s32 32, %v4096_v37  ;;  %v3439_v5 = vadd.f32 %v7895_v53, %v7747_v30  ;;  %v4095_v0 = vshrl.u32 %v4094_v49, 5 }
 0x5e6   : > { %v3855_v47 = vsel %vm3772_vm14, %v3854_v25, %v3853_v4  ;;  %v4099_v9 = vshll.u32 %v8580_v29, %v4096_v37  ;;  %v4679_v10 = vadd.s32 4294967169, %v3878_v44  ;;  %v4102_v40 = vshll.u32 %v8554_v32, %v4096_v37 }
 0x5e7   : > { %v3628_v41 = vsub.s32 0, %v8071_v17  ;;  %v4100_v34 = vshrl.u32 %v8554_v32, %v4097_v21  ;;  %v4105_v42 = vshll.u32 %v8553_v27, %v4096_v37  ;;  %v4103_v14 = vshrl.u32 %v8553_v27, %v4097_v21 }
 0x5e8   : > { %v4106_v62 = vshrl.u32 %v8556_v2, %v4097_v21  ;;  %v4108_v53 = vshll.u32 %v8556_v2, %v4096_v37  ;;  %v4109_v13 = vshrl.u32 %v8617_v20, %v4097_v21  ;;  %v4111_v35 = vshll.u32 %v8617_v20, %v4096_v37 }
 0x5e9   : > { %v4668_v12 = vmin.u32 %v3628_v41, %v8071_v17  ;;  %v4101_v45 = vor.u32 %v4100_v34, %v4099_v9  ;;  %v4112_v52 = vshrl.u32 %v8618_v28, %v4097_v21  ;;  %v4104_v55 = vor.u32 %v4103_v14, %v4102_v40 }
 0x5ea   : > { %v4107_v63 = vor.u32 %v4106_v62, %v4105_v42  ;;  %v4110_v39 = vor.u32 %v4109_v13, %v4108_v53  ;;  %v3884_v15 = vadd.s32 1, %v4679_v10  ;;  %vm4114_vm0 = vcmp.lt.s32.totalorder %v4095_v0, 1 }
 0x5eb   : > { %v3630_v36 = vclz %v4668_v12  ;;  %v4113_v19 = vor.u32 %v4112_v52, %v4111_v35  ;;  %vm4117_vm4 = vcmp.lt.s32.totalorder %v4095_v0, 4  ;;  %vm4115_vm8 = vcmp.lt.s32.totalorder %v4095_v0, 2 }
 0x5ec   : > { %vm4116_vm11 = vcmp.lt.s32.totalorder %v4095_v0, 3  ;;  %v4122_v4 = vsel %vm4114_vm0, %v4101_v45, %v4104_v55  ;;  %v4123_v43 = vsel %vm4117_vm4, %v4110_v39, 920167782  ;;  %v4119_v7 = vsel %vm4117_vm4, %v4107_v63, 2102212464 }
 0x5ed   : > { %v4669_v56 = vadd.s32 4294967294, %v3630_v36  ;;  %v4124_v25 = vsel %vm4116_vm11, %v4107_v63, %v4123_v43  ;;  %v4126_v49 = vsel %vm4114_vm0, %v4104_v55, %v4107_v63  ;;  %v4098_v44 = vshrl.u32 %v8580_v29, %v4097_v21 }
 0x5ee   : > { %v4125_v11 = vsel %vm4115_vm8, %v4122_v4, %v4124_v25  ;;  %v4127_v37 = vsel %vm4117_vm4, %v4113_v19, 1326507024  ;;  %vm3885_vm12 = vcmp.gt.s32.totalorder %v3884_v15, 0  ;;  %v4120_v42 = vsel %vm4116_vm11, %v4104_v55, %v4119_v7 }
 0x5ef   : > { %vm4670_vm2 = vcmp.lt.s32.totalorder %v4669_v56, 0  ;;  %v4128_v9 = vsel %vm4116_vm11, %v4110_v39, %v4127_v37  ;;  %v8100_v10 = vmul.u32.u64.low %v8069_v58, %v4125_v11  ;;  %v8101_v41 = vmul.u32.u64.high %v8069_v58, %v4125_v11, %v8100_v10 }
 0x5f0   : > { %v3633_v34 = vsel %vm4670_vm2, 0, %v4669_v56  ;;  %v4118_v40 = vsel %vm4114_vm0, %v4098_v44, %v4101_v45  ;;  %v4129_v14 = vsel %vm4115_vm8, %v4126_v49, %v4128_v9  ;;  %v3882_v62 = vor.u32 8388608, %v8075_v38 }
 0x5f1   : > { %v3638_v21 = vsub.s32 4294967266, %v3633_v34  ;;  %v3886_v53 = vsel %vm3885_vm12, %v3884_v15, 0  ;;  %v3449_v13 = vmul.f32 %v7752_v24, %v3439_v5  ;;  %v3540_v12 = vcvt.s32.f32 %v8063_v22 }
 0x5f2   : > { %v3858_v35 = vsel %vm8058_vm13, %v7769_v51, %v3855_v47  ;;  %v8114_v52 = vmul.u32.u64.low %v8069_v58, %v4129_v14  ;;  %v8115_v63 = vmul.u32.u64.high %v8069_v58, %v4129_v14, %v8114_v52  ;;  %v3634_v45 = vsub.s32 32, %v3633_v34 }
 0x5f3   : > { %v4121_v55 = vsel %vm4115_vm8, %v4118_v40, %v4120_v42  ;;  %v4140_v39 = vadd.s32 1, %v8101_v41  ;;  %v8119_v36 = vmul.f32 %v3540_v12, %v3538_v8  ;;  %v8121_v38 = vadd.s32 3, %v3859_v16 }
 0x5f4   : > { %v3639_v5 = vadd.s32 127, %v3638_v21  ;;  %v3888_v15 = vand.u32 31, %v3886_v53  ;;  %5088 = vcosq.f32 %v3858_v35  ;;  %v3618_v3 = vadd.s32 %v7993_v23, %v8015_v59 }
 0x5f5   : > { %v8125_v22 = vshll.u32 %v3882_v62, 8  ;;  %v8128_v47 = vadd.f32 %v8001_v54, %v3449_v13  ;;  %5090 = vsinq.f32 %v3858_v35  ;;  %v4137_v0 = vmul.u32 %v8069_v58, %v4121_v55 }
 0x5f6   : > { %vm4139_vm6 = vc.u32 %v8115_v63, %v8100_v10  ;;  %v3889_v8 = vsub.s32 32, %v3888_v15  ;;  %v3635_v16 = vshll.u32 %v8071_v17, %v3633_v34  ;;  %v3636_v19 = vshrl.u32 %v3618_v3, %v3634_v45 }
 0x5f7   : > { %v4141_v4 = vsel %vm4139_vm6, %v4140_v39, %v8101_v41  ;;  %v3887_v43 = vshrl.u32 %v3886_v53, 5  ;;  %v3640_v56 = vshll.u32 %v3639_v5, 23  ;;  %v3891_v59 = vshll.u32 %v8580_v29, %v3888_v15 }
 0x5f8   : > { %v4142_v23 = vadd.s32 %v4141_v4, %v4137_v0  ;;  %v3892_v7 = vshrl.u32 %v8554_v32, %v3889_v8  ;;  %v3894_v25 = vshll.u32 %v8554_v32, %v3888_v15  ;;  %v3895_v58 = vshrl.u32 %v8553_v27, %v3889_v8 }
 0x5f9   : > { %v3897_v49 = vshll.u32 %v8553_v27, %v3888_v15  ;;  %v3898_v44 = vshrl.u32 %v8556_v2, %v3889_v8  ;;  %v3900_v37 = vshll.u32 %v8556_v2, %v3888_v15  ;;  %v3901_v9 = vshrl.u32 %v8617_v20, %v3889_v8 }
 0x5fa   : > { %v4143_v11 = vadd.s32 536870912, %v4142_v23  ;;  %v3893_v17 = vor.u32 %v3892_v7, %v3891_v59  ;;  %v3896_v41 = vor.u32 %v3895_v58, %v3894_v25  ;;  %vm3906_vm15 = vcmp.lt.s32.totalorder %v3887_v43, 1 }
 0x5fb   : > { %v3899_v34 = vor.u32 %v3898_v44, %v3897_v49  ;;  %vm3908_vm5 = vcmp.lt.s32.totalorder %v3887_v43, 3  ;;  %v3902_v42 = vor.u32 %v3901_v9, %v3900_v37  ;;  %v3903_v14 = vshll.u32 %v8617_v20, %v3888_v15 }
 0x5fc   : > { %v8143_v40 = vshrl.u32 %v4143_v11, 30  ;;  %v3904_v21 = vshrl.u32 %v8618_v28, %v3889_v8  ;;  %v3641_v62 = vor.u32 4788187, %v3640_v56  ;;  %v3890_v53 = vshrl.u32 %v8580_v29, %v3889_v8 }
 0x5fd   : > { %vm3909_vm9 = vcmp.lt.s32.totalorder %v3887_v43, 4  ;;  %v3914_v13 = vsel %vm3906_vm15, %v3893_v17, %v3896_v41  ;;  %v3637_v39 = vor.u32 %v3636_v19, %v3635_v16  ;;  %vm3907_vm1 = vcmp.lt.s32.totalorder %v3887_v43, 2 }
 0x5fe   : > { %v4145_v12 = vshll.u32 %v8143_v40, 30  ;;  %v3905_v35 = vor.u32 %v3904_v21, %v3903_v14  ;;  %v3911_v52 = vsel %vm3909_vm9, %v3899_v34, 2102212464  ;;  %v3915_v45 = vsel %vm3909_vm9, %v3902_v42, 920167782  ;;  %v5089_v55 = vpop.eup %5088 }
 0x5ff   : > { %v3916_v5 = vsel %vm3908_vm5, %v3899_v34, %v3915_v45  ;;  %v3918_v15 = vsel %vm3906_vm15, %v3896_v41, %v3899_v34  ;;  %v5091_v3 = vpop.eup %5090  ;;  %v3910_v8 = vsel %vm3906_vm15, %v3890_v53, %v3893_v17  ;;  %v3912_v59 = vsel %vm3908_vm5, %v3896_v41, %v3911_v52 }
 0x600   : > { %v8152_v0 = vsub.s32 %v4142_v23, %v4145_v12  ;;  %v3917_v4 = vsel %vm3907_vm1, %v3914_v13, %v3916_v5  ;;  %v3919_v56 = vsel %vm3909_vm9, %v3905_v35, 1326507024  ;;  %v3542_v19 = vxor.u32 2147483648, %v8119_v36 }
 0x601   : > { %v3920_v7 = vsel %vm3908_vm5, %v3902_v42, %v3919_v56  ;;  %v8159_v25 = vmul.u32.u64.low %v8125_v22, %v3917_v4  ;;  %v8160_v16 = vmul.u32.u64.high %v8125_v22, %v3917_v4, %v8159_v25  ;;  %v3642_v58 = vand.u32 2147483647, %v3641_v62 }
 0x602   : > { %v3921_v23 = vsel %vm3907_vm1, %v3918_v15, %v3920_v7  ;;  %v4189_v11 = vand.u32 2139095040, %v8128_v47  ;;  %v3431_v17 = vadd.f32 %v7747_v30, %v7902_v50  ;;  %v3644_v37 = vcvt.s32.f32 %v3637_v39 }
 0x603   : > { %v8166_v49 = vmul.u32.u64.low %v8125_v22, %v3921_v23  ;;  %v8167_v44 = vmul.u32.u64.high %v8125_v22, %v3921_v23, %v8166_v49  ;;  %v4148_v9 = vsub.s32 0, %v8152_v0  ;;  %v3913_v41 = vsel %vm3907_vm1, %v3910_v8, %v3912_v59 }
 0x604   : > { %vm3460_vm7 = vcmp.lt.s32.totalorder %v7762_v60, 0  ;;  %v3864_v34 = vand.u32 3, %v8121_v38  ;;  %v3932_v42 = vadd.s32 1, %v8160_v16  ;;  %v4190_v14 = vshrl.u32 %v4189_v11, 23 }
 0x605   : > { %v3543_v21 = vsel %vm3460_vm7, %v3542_v19, %v8119_v36  ;;  %v3867_v62 = vxor.u32 2147483648, %v5091_v3  ;;  %v3870_v53 = vxor.u32 2147483648, %v5089_v55  ;;  %v3645_v13 = vmul.f32 %v3644_v37, %v3642_v58 }
 0x606   : > { %v3929_v30 = vmul.u32 %v8125_v22, %v3913_v41  ;;  %vm3931_vm10 = vc.u32 %v8167_v44, %v8159_v25  ;;  %v4691_v50 = vadd.s32 4294967169, %v4190_v14  ;;  %v3447_v43 = vmul.f32 %v7752_v24, %v3431_v17 }
 0x607   : > { %vm8186_vm14 = vcmp.le.f32.partialorder %v3458_v26, 0.7853982  ;;  %v4688_v12 = vmin.u32 %v4148_v9, %v8152_v0  ;;  %v3933_v36 = vsel %vm3931_vm10, %v3932_v42, %v8160_v16  ;;  %v4186_v35 = vand.u32 2147483647, %v8128_v47 }
 0x608   : > { %vm3866_vm3 = vcmp.eq.s32.totalorder %v3864_v34, 0  ;;  %vm3869_vm13 = vcmp.eq.s32.totalorder %v3864_v34, 2  ;;  %v3934_v22 = vadd.s32 %v3933_v36, %v3929_v30  ;;  %v4196_v52 = vadd.s32 1, %v4691_v50 }
 0x609   : > { %v3546_v24 = vsel %vm8186_vm14, %v7762_v60, %v3543_v21  ;;  %v3868_v45 = vsel %vm3866_vm3, %v5089_v55, %v3867_v62  ;;  %v3871_v39 = vsel %vm3869_vm13, %v3870_v53, %v5091_v3  ;;  %v3646_v26 = vxor.u32 2147483648, %v3645_v13 }
 0x60a   : > { %v3935_v5 = vadd.s32 536870912, %v3934_v22  ;;  %vm4197_vm0 = vcmp.gt.s32.totalorder %v4196_v52, 0  ;;  %v8197_v15 = vadd.f32 %v8001_v54, %v3447_v43  ;;  %v4150_v8 = vclz %v4688_v12 }
 0x60b   : > { %v4193_v4 = vand.u32 8388607, %v4186_v35  ;;  %v4198_v56 = vsel %vm4197_vm0, %v4196_v52, 0  ;;  %5092 = vcosq.f32 %v3546_v24  ;;  %vm3865_vm4 = vcmp.lt.s32.totalorder %v3864_v34, 2 }
 0x60c   : > { %v8201_v59 = vshrl.u32 %v3935_v5, 30  ;;  %v4200_v7 = vand.u32 31, %v4198_v56  ;;  %5094 = vsinq.f32 %v3546_v24  ;;  %v3872_v16 = vsel %vm3865_vm4, %v3868_v45, %v3871_v39 }
 0x60d   : > { %vm3564_vm8 = vcmp.lt.s32.totalorder %v7780_v31, 0  ;;  %v3544_v55 = vsub.s32 4, %v7882_v1  ;;  %v3981_v58 = vand.u32 2139095040, %v8197_v15  ;;  %v4689_v23 = vadd.s32 4294967294, %v4150_v8 }
 0x60e   : > { %v3647_v54 = vsel %vm3564_vm8, %v3646_v26, %v3645_v13  ;;  %v3937_v3 = vshll.u32 %v8201_v59, 30  ;;  %v4201_v19 = vsub.s32 32, %v4200_v7  ;;  %v4194_v49 = vor.u32 8388608, %v4193_v4 }
 0x60f   : > { %v4199_v11 = vshrl.u32 %v4198_v56, 5  ;;  %v4203_v17 = vshll.u32 %v8580_v29, %v4200_v7  ;;  %v4206_v41 = vshll.u32 %v8554_v32, %v4200_v7  ;;  %vm8217_vm11 = vcmp.le.f32.partialorder %v3562_v46, 0.7853982 }
 0x610   : > { %v8210_v37 = vsub.s32 %v3934_v22, %v3937_v3  ;;  %v4204_v9 = vshrl.u32 %v8554_v32, %v4201_v19  ;;  %v4207_v34 = vshrl.u32 %v8553_v27, %v4201_v19  ;;  %v4209_v14 = vshll.u32 %v8553_v27, %v4200_v7 }
 0x611   : > { %v4210_v21 = vshrl.u32 %v8556_v2, %v4201_v19  ;;  %v4212_v62 = vshll.u32 %v8556_v2, %v4200_v7  ;;  %v4213_v53 = vshrl.u32 %v8617_v20, %v4201_v19  ;;  %v3982_v43 = vshrl.u32 %v3981_v58, 23 }
 0x612   : > { %v3940_v13 = vsub.s32 0, %v8210_v37  ;;  %v4205_v30 = vor.u32 %v4204_v9, %v4203_v17  ;;  %v4208_v50 = vor.u32 %v4207_v34, %v4206_v41  ;;  %v4215_v46 = vshll.u32 %v8617_v20, %v4200_v7 }
 0x613   : > { %v4211_v12 = vor.u32 %v4210_v21, %v4209_v14  ;;  %v4214_v36 = vor.u32 %v4213_v53, %v4212_v62  ;;  %v4216_v22 = vshrl.u32 %v8618_v28, %v4201_v19  ;;  %vm4690_vm12 = vcmp.lt.s32.totalorder %v4689_v23, 0 }
 0x614   : > { %v4680_v52 = vmin.u32 %v3940_v13, %v8210_v37  ;;  %v4234_v24 = vshll.u32 %v4194_v49, 8  ;;  %v3545_v45 = vsel %vm3460_vm7, %v3544_v55, %v7882_v1  ;;  %v4202_v39 = vshrl.u32 %v8580_v29, %v4201_v19 }
 0x615   : > { %v4217_v26 = vor.u32 %v4216_v22, %v4215_v46  ;;  %vm4218_vm2 = vcmp.lt.s32.totalorder %v4199_v11, 1  ;;  %vm4221_vm6 = vcmp.lt.s32.totalorder %v4199_v11, 4  ;;  %v8233_v5 = vpop.eup %5092  ;;  %vm4220_vm15 = vcmp.lt.s32.totalorder %v4199_v11, 3 }
 0x616   : > { %v4223_v8 = vsel %vm4221_vm6, %v4211_v12, 2102212464  ;;  %v4226_v4 = vsel %vm4218_vm2, %v4205_v30, %v4208_v50  ;;  %v4227_v56 = vsel %vm4221_vm6, %v4214_v36, 920167782  ;;  %v8235_v7 = vpop.eup %5094  ;;  %vm4219_vm5 = vcmp.lt.s32.totalorder %v4199_v11, 2 }
 0x617   : > { %v4228_v3 = vsel %vm4220_vm15, %v4211_v12, %v4227_v56  ;;  %v4230_v58 = vsel %vm4218_vm2, %v4208_v50, %v4211_v12  ;;  %v4683_v49 = vadd.s32 4294967169, %v3982_v43  ;;  %v3942_v17 = vclz %v4680_v52 }
 0x618   : > { %v4222_v9 = vsel %vm4218_vm2, %v4202_v39, %v4205_v30  ;;  %v4229_v1 = vsel %vm4219_vm5, %v4226_v4, %v4228_v3  ;;  %v4231_v55 = vsel %vm4221_vm6, %v4217_v26, 1326507024  ;;  %v4224_v19 = vsel %vm4220_vm15, %v4208_v50, %v4223_v8 }
 0x619   : > { %v4232_v41 = vsel %vm4220_vm15, %v4214_v36, %v4231_v55  ;;  %v8238_v34 = vmul.u32.u64.low %v4234_v24, %v4229_v1  ;;  %v8239_v14 = vmul.u32.u64.high %v4234_v24, %v4229_v1, %v8238_v34  ;;  %vm3862_vm9 = vweird.f32 %v7769_v51 }
 0x61a   : > { %v3650_v21 = vsel %vm8217_vm11, %v7780_v31, %v3647_v54  ;;  %v4233_v62 = vsel %vm4219_vm5, %v4230_v58, %v4232_v41  ;;  %v8248_v53 = vsel %vm4690_vm12, 0, %v4689_v23  ;;  %v3547_v50 = vsel %vm8186_vm14, 0, %v3545_v45 }
 0x61b   : > { %v8250_v13 = vmul.u32.u64.low %v4234_v24, %v4233_v62  ;;  %v8251_v30 = vmul.u32.u64.high %v4234_v24, %v4233_v62, %v8250_v13  ;;  %v8255_v43 = vsel %vm3862_vm9, nan, %v3872_v16  ;;  %v4225_v12 = vsel %vm4219_vm5, %v4222_v9, %v4224_v19 }
 0x61c   : > { %v4138_v51 = vadd.s32 %v8100_v10, %v8115_v63  ;;  %v4681_v36 = vadd.s32 4294967294, %v3942_v17  ;;  %v4244_v54 = vadd.s32 1, %v8239_v14  ;;  %v3988_v46 = vadd.s32 1, %v4683_v49 }
 0x61d   : > { %5096 = vcosq.f32 %v3650_v21  ;;  %v4154_v23 = vsub.s32 32, %v8248_v53  ;;  %v3978_v22 = vand.u32 2147483647, %v8197_v15  ;;  %v3551_v52 = vadd.s32 3, %v3547_v50 }
 0x61e   : > { %v4158_v38 = vsub.s32 4294967266, %v8248_v53  ;;  %v4241_v45 = vmul.u32 %v4234_v24, %v4225_v12  ;;  %vm4243_vm1 = vc.u32 %v8251_v30, %v8238_v34  ;;  %vm3989_vm7 = vcmp.gt.s32.totalorder %v3988_v46, 0 }
 0x61f   : > { %5098 = vsinq.f32 %v3650_v21  ;;  %v4245_v10 = vsel %vm4243_vm1, %v4244_v54, %v8239_v14  ;;  %v3990_v63 = vsel %vm3989_vm7, %v3988_v46, 0  ;;  %v3555_v16 = vxor.u32 2147483648, %v8235_v7 }
 0x620   : > { %v8270_v11 = vadd.s32 %v8159_v25, %v8167_v44  ;;  %vm4682_vm10 = vcmp.lt.s32.totalorder %v4681_v36, 0  ;;  %v4246_v39 = vadd.s32 %v4245_v10, %v4241_v45  ;;  %v3992_v26 = vand.u32 31, %v3990_v63 }
 0x621   : > { %v4155_v24 = vshll.u32 %v8152_v0, %v8248_v53  ;;  %v3985_v8 = vand.u32 8388607, %v3978_v22  ;;  %v8276_v4 = vand.u32 3, %v3551_v52  ;;  %v3558_v56 = vxor.u32 2147483648, %v8233_v5 }
 0x622   : > { %v8279_v3 = vshrl.u32 %v4138_v51, %v4154_v23  ;;  %v8281_v58 = vadd.s32 127, %v4158_v38  ;;  %v4247_v49 = vadd.s32 536870912, %v4246_v39  ;;  %v3993_v25 = vsub.s32 32, %v3992_v26 }
 0x623   : > { %v8283_v44 = vsel %vm4682_vm10, 0, %v4681_v36  ;;  %v3991_v17 = vshrl.u32 %v3990_v63, 5  ;;  %v3995_v9 = vshll.u32 %v8580_v29, %v3992_v26  ;;  %v3998_v1 = vshll.u32 %v8554_v32, %v3992_v26 }
 0x624   : > { %v8287_v55 = vshrl.u32 %v4247_v49, 30  ;;  %v3996_v19 = vshrl.u32 %v8554_v32, %v3993_v25  ;;  %v3999_v41 = vshrl.u32 %v8553_v27, %v3993_v25  ;;  %v4001_v14 = vshll.u32 %v8553_v27, %v3992_v26 }
 0x625   : > { %v4002_v21 = vshrl.u32 %v8556_v2, %v3993_v25  ;;  %v4004_v62 = vshll.u32 %v8556_v2, %v3992_v26  ;;  %v4005_v13 = vshrl.u32 %v8617_v20, %v3993_v25  ;;  %v4008_v50 = vshrl.u32 %v8618_v28, %v3993_v25 }
 0x626   : > { %v4249_v12 = vshll.u32 %v8287_v55, 30  ;;  %v3997_v51 = vor.u32 %v3996_v19, %v3995_v9  ;;  %v4000_v36 = vor.u32 %v3999_v41, %v3998_v1  ;;  %v4007_v54 = vshll.u32 %v8617_v20, %v3992_v26 }
 0x627   : > { %v8298_v46 = vpop.eup %5096  ;;  %v4160_v32 = vshll.u32 %v8281_v58, 23  ;;  %v3986_v23 = vor.u32 8388608, %v3985_v8  ;;  %v4003_v27 = vor.u32 %v4002_v21, %v4001_v14  ;;  %v4006_v52 = vor.u32 %v4005_v13, %v4004_v62 }
 0x628   : > { %v3950_v38 = vsub.s32 4294967266, %v8283_v44  ;;  %v8302_v2 = vsub.s32 %v4246_v39, %v4249_v12  ;;  %v4009_v45 = vor.u32 %v4008_v50, %v4007_v54  ;;  %vm4010_vm14 = vcmp.lt.s32.totalorder %v3991_v17, 1 }
 0x629   : > { %v5099_v28 = vpop.eup %5098  ;;  %v3994_v10 = vshrl.u32 %v8580_v29, %v3993_v25  ;;  %vm4013_vm3 = vcmp.lt.s32.totalorder %v3991_v17, 4  ;;  %v4018_v63 = vsel %vm4010_vm14, %v3997_v51, %v4000_v36  ;;  %v3648_v20 = vsub.s32 4, %v8051_v33 }
 0x62a   : > { %v4252_v26 = vsub.s32 0, %v8302_v2  ;;  %vm4012_vm13 = vcmp.lt.s32.totalorder %v3991_v17, 3  ;;  %v4015_v49 = vsel %vm4013_vm3, %v4003_v27, 2102212464  ;;  %v4019_v8 = vsel %vm4013_vm3, %v4006_v52, 920167782 }
 0x62b   : > { %vm4011_vm0 = vcmp.lt.s32.totalorder %v3991_v17, 2  ;;  %v4020_v9 = vsel %vm4012_vm13, %v4003_v27, %v4019_v8  ;;  %v4022_v1 = vsel %vm4010_vm14, %v4000_v36, %v4003_v27  ;;  %v4026_v19 = vshll.u32 %v3986_v23, 8 }
 0x62c   : > { %v4692_v39 = vmin.u32 %v4252_v26, %v8302_v2  ;;  %v4014_v41 = vsel %vm4010_vm14, %v3994_v10, %v3997_v51  ;;  %v4021_v14 = vsel %vm4011_vm0, %v4018_v63, %v4020_v9  ;;  %v4023_v21 = vsel %vm4013_vm3, %v4009_v45, 1326507024 }
 0x62d   : > { %vm3553_vm4 = vcmp.lt.s32.totalorder %v8276_v4, 2  ;;  %v4016_v29 = vsel %vm4012_vm13, %v4000_v36, %v4015_v49  ;;  %v4024_v25 = vsel %vm4012_vm13, %v4006_v52, %v4023_v21  ;;  %vm3554_vm12 = vcmp.eq.s32.totalorder %v8276_v4, 0 }
 0x62e   : > { %v8310_v62 = vmul.u32.u64.low %v4026_v19, %v4021_v14  ;;  %v8311_v13 = vmul.u32.u64.high %v4026_v19, %v4021_v14, %v8310_v62  ;;  %v4254_v50 = vclz %v4692_v39  ;;  %v4025_v12 = vsel %vm4011_vm0, %v4022_v1, %v4024_v25 }
 0x62f   : > { %v3649_v51 = vsel %vm3564_vm8, %v3648_v20, %v8051_v33  ;;  %v3951_v54 = vadd.s32 127, %v3950_v38  ;;  %v8319_v23 = vmul.u32.u64.low %v4026_v19, %v4025_v12  ;;  %v8320_v27 = vmul.u32.u64.high %v4026_v19, %v4025_v12, %v8319_v23 }
 0x630   : > { %vm3550_vm2 = vweird.f32 %v7762_v60  ;;  %v3651_v36 = vsel %vm8217_vm11, 0, %v3649_v51  ;;  %vm3654_vm6 = vweird.f32 %v7780_v31  ;;  %v4693_v52 = vadd.s32 4294967294, %v4254_v50 }
 0x631   : > { %v4017_v45 = vsel %vm4011_vm0, %v4014_v41, %v4016_v29  ;;  %vm3557_vm15 = vcmp.eq.s32.totalorder %v8276_v4, 2  ;;  %v3655_v10 = vadd.s32 3, %v3651_v36  ;;  %v3946_v63 = vsub.s32 32, %v8283_v44 }
 0x632   : > { %v4036_v33 = vadd.s32 1, %v8311_v13  ;;  %v3556_v38 = vsel %vm3554_vm12, %v8233_v5, %v3555_v16  ;;  %v3559_v42 = vsel %vm3557_vm15, %v3558_v56, %v8235_v7  ;;  %vm4694_vm8 = vcmp.lt.s32.totalorder %v4693_v52, 0 }
 0x633   : > { %v3656_v20 = vand.u32 3, %v3655_v10  ;;  %v3659_v26 = vxor.u32 2147483648, %v5099_v28  ;;  %v3662_v17 = vxor.u32 2147483648, %v8298_v46  ;;  %v4242_v49 = vadd.s32 %v8238_v34, %v8251_v30 }
 0x634   : > { %v4257_v8 = vsel %vm4694_vm8, 0, %v4693_v52  ;;  %v4033_v9 = vmul.u32 %v4026_v19, %v4017_v45  ;;  %vm4035_vm11 = vc.u32 %v8320_v27, %v8310_v62  ;;  %v3952_v1 = vshll.u32 %v3951_v54, 23 }
 0x635   : > { %v4258_v39 = vsub.s32 32, %v4257_v8  ;;  %v4262_v16 = vsub.s32 4294967266, %v4257_v8  ;;  %v4037_v41 = vsel %vm4035_vm11, %v4036_v33, %v8311_v13  ;;  %v3560_v7 = vsel %vm3553_vm4, %v3556_v38, %v3559_v42 }
 0x636   : > { %v4038_v5 = vadd.s32 %v4037_v41, %v4033_v9  ;;  %vm3658_vm5 = vcmp.eq.s32.totalorder %v3656_v20, 0  ;;  %vm3661_vm9 = vcmp.eq.s32.totalorder %v3656_v20, 2  ;;  %vm3657_vm1 = vcmp.lt.s32.totalorder %v3656_v20, 2 }
 0x637   : > { %v4263_v56 = vadd.s32 127, %v4262_v16  ;;  %v3660_v34 = vsel %vm3658_vm5, %v8298_v46, %v3659_v26  ;;  %v3663_v30 = vsel %vm3661_vm9, %v3662_v17, %v5099_v28  ;;  %v4161_v19 = vor.u32 4788187, %v4160_v32 }
 0x638   : > { %v3948_v14 = vshrl.u32 %v8270_v11, %v3946_v63  ;;  %v4039_v21 = vadd.s32 536870912, %v4038_v5  ;;  %v3664_v29 = vsel %vm3657_vm1, %v3660_v34, %v3663_v30  ;;  %v4260_v25 = vshrl.u32 %v4242_v49, %v4258_v39 }
 0x639   : > { %v4264_v13 = vshll.u32 %v4263_v56, 23  ;;  %v3561_v4 = vsel %vm3550_vm2, nan, %v3560_v7  ;;  %v3665_v50 = vsel %vm3654_vm6, nan, %v3664_v29  ;;  %v3947_v12 = vshll.u32 %v8210_v37, %v8283_v44 }
 0x63a   : > { %v3953_v46 = vor.u32 4788187, %v3952_v1  ;;  %v8354_v28 = vshrl.u32 %v4039_v21, 30  ;;  %v4290_v58 = vpack.c.bf16 %v3665_v50, %v3561_v4  ;;  %v4157_v11 = vor.u32 %v8279_v3, %v4155_v24 }
 0x63b   : > { %v4259_v32 = vshll.u32 %v8302_v2, %v4257_v8  ;;  %v4265_v51 = vor.u32 4788187, %v4264_v13  ;;  %v4291_v60 = vpack.c.bf16 %v8255_v43, %v8023_v48  ;;  %v3949_v31 = vor.u32 %v3948_v14, %v3947_v12 }
 0x63c   : > { %v4041_v54 = vshll.u32 %v8354_v28, 30  ;;  %vm8650_vm7 = vcmask 261120   ;;  %v4162_v37 = vand.u32 2147483647, %v4161_v19  ;;  %v3954_v23 = vand.u32 2147483647, %v3953_v46 }
 0x63d   : > { %4773 = vmatprep.mubr.msk.bf16.mxu1 %vm8650_vm7, %v4290_v58  ;;  %v4261_v44 = vor.u32 %v4260_v25, %v4259_v32  ;;  %vm8651_vm10 = vmmov %vm8650_vm7  ;;  %v4164_v0 = vcvt.s32.f32 %v4157_v11  ;;  %v4266_v53 = vand.u32 2147483647, %v4265_v51  ;;  %v3956_v24 = vcvt.s32.f32 %v3949_v31 }
 0x63e   : > { %4774 = vmatmul.mubr.msk.bf16.vlgmr.msra.gmra.mrb[8].mxu1 %vm8651_vm10, %v4291_v60  ;;  %v4042_v36 = vsub.s32 %v4038_v5, %v4041_v54  ;;  %vm4084_vm14 = vcmp.lt.s32.totalorder %v8004_v57, 0  ;;  %vm3876_vm13 = vcmp.lt.s32.totalorder %v8034_v6, 0  ;;  %vm4188_vm0 = vcmp.lt.s32.totalorder %v8128_v47, 0 }
 0x63f   : > { %v4165_v2 = vmul.f32 %v4164_v0, %v4162_v37  ;;  %v4268_v52 = vcvt.s32.f32 %v4261_v44  ;;  %v3957_v45 = vmul.f32 %v3956_v24, %v3954_v23  ;;  %v4034_v49 = vadd.s32 %v8310_v62, %v8320_v27 }
 0x640   : > { %v4044_v3 = vsub.s32 0, %v4042_v36  ;;  %vm8377_vm4 = vcmp.le.f32.partialorder %v4082_v61, 0.7853982  ;;  %vm8383_vm12 = vcmp.le.f32.partialorder %v3874_v18, 0.7853982  ;;  %v4272_v19 = vsub.s32 4, %v8287_v55 }
 0x641   : > { %v4269_v48 = vmul.f32 %v4268_v52, %v4266_v53  ;;  %v4166_v63 = vxor.u32 2147483648, %v4165_v2  ;;  %v3958_v33 = vxor.u32 2147483648, %v3957_v45  ;;  %vm8397_vm2 = vcmp.le.f32.partialorder %v4186_v35, 0.7853982 }
 0x642   : > { %v4684_v10 = vmin.u32 %v4044_v3, %v4042_v36  ;;  %v3960_v14 = vsub.s32 4, %v8201_v59  ;;  %v4168_v29 = vsub.s32 4, %v8143_v40  ;;  %v4064_v13 = vsub.s32 4, %v8354_v28 }
 0x643   : > { %v4270_v42 = vxor.u32 2147483648, %v4269_v48  ;;  %v4167_v20 = vsel %vm4084_vm14, %v4166_v63, %v4165_v2  ;;  %v3959_v17 = vsel %vm3876_vm13, %v3958_v33, %v3957_v45  ;;  %v4273_v4 = vsel %vm4188_vm0, %v4272_v19, %v8287_v55 }
 0x644   : > { %v4046_v43 = vclz %v4684_v10  ;;  %v4170_v62 = vsel %vm8377_vm4, %v8004_v57, %v4167_v20  ;;  %v3962_v61 = vsel %vm8383_vm12, %v8034_v6, %v3959_v17  ;;  %v3961_v50 = vsel %vm3876_vm13, %v3960_v14, %v8201_v59 }
 0x645   : > { %v4271_v16 = vsel %vm4188_vm0, %v4270_v42, %v4269_v48  ;;  %5100 = vcosq.f32 %v4170_v62  ;;  %v4169_v46 = vsel %vm4084_vm14, %v4168_v29, %v8143_v40  ;;  %vm3980_vm6 = vcmp.lt.s32.totalorder %v8197_v15, 0 }
 0x646   : > { %v4685_v38 = vadd.s32 4294967294, %v4046_v43  ;;  %v4274_v7 = vsel %vm8397_vm2, %v8128_v47, %v4271_v16  ;;  %5102 = vcosq.f32 %v3962_v61  ;;  %v4275_v58 = vsel %vm8397_vm2, 0, %v4273_v4 }
 0x647   : > { %5104 = vcosq.f32 %v4274_v7  ;;  %vm8422_vm15 = vcmp.le.f32.partialorder %v3978_v22, 0.7853982  ;;  %v3963_v59 = vsel %vm8383_vm12, 0, %v3961_v50  ;;  %v4065_v32 = vsel %vm3980_vm6, %v4064_v13, %v8354_v28 }
 0x648   : > { %vm4686_vm3 = vcmp.lt.s32.totalorder %v4685_v38, 0  ;;  %5106 = vsinq.f32 %v4274_v7  ;;  %v4171_v60 = vsel %vm8377_vm4, 0, %v4169_v46  ;;  %v4279_v22 = vadd.s32 3, %v4275_v58 }
 0x649   : > { %v4049_v26 = vsel %vm4686_vm3, 0, %v4685_v38  ;;  %5108 = vsinq.f32 %v3962_v61  ;;  %v3967_v37 = vadd.s32 3, %v3963_v59  ;;  %v4067_v44 = vsel %vm8422_vm15, 0, %v4065_v32 }
 0x64a   : > { %v4050_v8 = vsub.s32 32, %v4049_v26  ;;  %v4054_v9 = vsub.s32 4294967266, %v4049_v26  ;;  %v4051_v27 = vshll.u32 %v4042_v36, %v4049_v26  ;;  %5110 = vsinq.f32 %v4170_v62 }
 0x64b   : > { %v4175_v36 = vadd.s32 3, %v4171_v60  ;;  %v4071_v53 = vadd.s32 3, %v4067_v44  ;;  %v4280_v24 = vand.u32 3, %v4279_v22  ;;  %v3968_v3 = vand.u32 3, %v3967_v37 }
 0x64c   : > { %v4052_v41 = vshrl.u32 %v4034_v49, %v4050_v8  ;;  %v4055_v5 = vadd.s32 127, %v4054_v9  ;;  %vm4278_vm12 = vweird.f32 %v8128_v47  ;;  %vm3966_vm2 = vweird.f32 %v8034_v6  ;;  %v4695_v6 = vld [vmem:[%s8513_s9] ss:$0 sm:$0xff] }
 0x64d   : > { %v4176_v48 = vand.u32 3, %v4175_v36  ;;  %v4072_v33 = vand.u32 3, %v4071_v53  ;;  %vm4282_vm8 = vcmp.eq.s32.totalorder %v4280_v24, 0  ;;  %vm4285_vm11 = vcmp.eq.s32.totalorder %v4280_v24, 2 }
 0x64e   : > { %v4053_v56 = vor.u32 %v4052_v41, %v4051_v27  ;;  %v4056_v34 = vshll.u32 %v4055_v5, 23  ;;  %vm3970_vm5 = vcmp.eq.s32.totalorder %v3968_v3, 0  ;;  %vm3973_vm9 = vcmp.eq.s32.totalorder %v3968_v3, 2 }
 0x64f   : > { %v5101_v51 = vpop.eup %5100  ;;  %vm4178_vm1 = vcmp.eq.s32.totalorder %v4176_v48, 0  ;;  %vm4181_vm7 = vcmp.eq.s32.totalorder %v4176_v48, 2  ;;  %vm4281_vm10 = vcmp.lt.s32.totalorder %v4280_v24, 2  ;;  %vm3969_vm14 = vcmp.lt.s32.totalorder %v3968_v3, 2 }
 0x650   : > { %v4057_v30 = vor.u32 4788187, %v4056_v34  ;;  %v4060_v35 = vcvt.s32.f32 %v4053_v56  ;;  %v5103_v31 = vpop.eup %5102  ;;  %v4182_v63 = vxor.u32 2147483648, %v5101_v51  ;;  %vm4077_vm3 = vcmp.eq.s32.totalorder %v4072_v33, 2 }
 0x651   : > { %v5105_v54 = vpop.eup %5104  ;;  %v3974_v10 = vxor.u32 2147483648, %v5103_v31  ;;  %vm4074_vm13 = vcmp.eq.s32.totalorder %v4072_v33, 0  ;;  %vm4177_vm0 = vcmp.lt.s32.totalorder %v4176_v48, 2  ;;  %vm4073_vm4 = vcmp.lt.s32.totalorder %v4072_v33, 2 }
 0x652   : > { %v4058_v21 = vand.u32 2147483647, %v4057_v30  ;;  %v5107_v23 = vpop.eup %5106  ;;  %v4286_v52 = vxor.u32 2147483648, %v5105_v54 }
 0x653   : > { %v5109_v28 = vpop.eup %5108  ;;  %v4283_v2 = vxor.u32 2147483648, %v5107_v23 }
 0x654   : > { %v4061_v25 = vmul.f32 %v4060_v35, %v4058_v21  ;;  %v5111_v0 = vpop.eup %5110  ;;  %v3971_v45 = vxor.u32 2147483648, %v5109_v28  ;;  %v4287_v42 = vsel %vm4285_vm11, %v4286_v52, %v5107_v23  ;;  %v3975_v17 = vsel %vm3973_vm9, %v3974_v10, %v5109_v28 }
 0x655   : > { %v4179_v43 = vxor.u32 2147483648, %v5111_v0  ;;  %v4284_v38 = vsel %vm4282_vm8, %v5105_v54, %v4283_v2  ;;  %v4183_v1 = vsel %vm4181_vm7, %v4182_v63, %v5111_v0  ;;  %vm8660_vm8 = vcmask 261120  }
 0x656   : > { %v4062_v12 = vxor.u32 2147483648, %v4061_v25  ;;  %v3972_v26 = vsel %vm3970_vm5, %v5103_v31, %v3971_v45  ;;  %v4288_v16 = vsel %vm4281_vm10, %v4284_v38, %v4287_v42  ;;  %vm8661_vm11 = vmmov %vm8660_vm8 }
 0x657   : > { %v4180_v9 = vsel %vm4178_vm1, %v5101_v51, %v4179_v43  ;;  %v3976_v62 = vsel %vm3969_vm14, %v3972_v26, %v3975_v17  ;;  %v4289_v18 = vsel %vm4278_vm12, nan, %v4288_v16 }
 0x658   : > { %v4063_v55 = vsel %vm3980_vm6, %v4062_v12, %v4061_v25  ;;  %v4184_v5 = vsel %vm4177_vm0, %v4180_v9, %v4183_v1  ;;  %vm4070_vm6 = vweird.f32 %v8197_v15  ;;  %v3977_v7 = vsel %vm3966_vm2, nan, %v3976_v62 }
 0x659   : > { %v4066_v40 = vsel %vm8422_vm15, %v8197_v15, %v4063_v55  ;;  %vm4174_vm15 = vweird.f32 %v8004_v57 }
 0x65a   : > { %5112 = vcosq.f32 %v4066_v40  ;;  %v4185_v30 = vsel %vm4174_vm15, nan, %v4184_v5 }
 0x65b   : > { %5114 = vsinq.f32 %v4066_v40  ;;  %v4293_v19 = vpack.c.bf16 %v4289_v18, %v4185_v30 }
 0x664   : > { %v5113_v20 = vpop.eup %5112 }
 0x665   : > { %v5115_v49 = vpop.eup %5114  ;;  %v4078_v8 = vxor.u32 2147483648, %v5113_v20 }
 0x666   : > { %v4075_v39 = vxor.u32 2147483648, %v5115_v49 }
 0x667   : > { %v4079_v27 = vsel %vm4077_vm3, %v4078_v8, %v5115_v49 }
 0x668   : > { %v4076_v41 = vsel %vm4074_vm13, %v5113_v20, %v4075_v39 }
 0x669   : > { %v4080_v61 = vsel %vm4073_vm4, %v4076_v41, %v4079_v27 }
 0x66a   : > { %v4081_v56 = vsel %vm4070_vm6, nan, %v4080_v61 }
 0x66b   : > { %v4292_v34 = vpack.c.bf16 %v4081_v56, %v3977_v7 }
 0x66d   : > { %4777 = vmatprep.mubr.msk.bf16.mxu1 %vm8660_vm8, %v4292_v34 }
 0x66e   : > { %4778 = vmatmul.mubr.msk.bf16.gmra.mrb[12].mxu1 %vm8661_vm11, %v4293_v19 }
 0x711   : > { %v4775_v47 = vpop.f32.mrb[8].mxu1 }
 0x712   : > { %v4372_v15 = vadd.f32 %v4775_v47, %v4695_v6  ;;  %v4363_v14 = vpop.f32.mrb[9].mxu1 }
 0x713   : > { %v4364_v21 = vadd.f32 %v4695_v6, %v4363_v14  ;;  %v4776_v57 = vpop.f32.mrb[10].mxu1 }
 0x714   : > { %4396 = vst [vmem:[%s410_s22 + $0x10] sm:$0xff] %v4372_v15  ;;  %v4375_v35 = vadd.f32 %v4776_v57, %v4695_v6  ;;  %v4366_v29 = vpop.f32.mrb[11].mxu1 }
 0x715   : > { %4394 = vst [vmem:[%s410_s22] sm:$0xff] %v4364_v21  ;;  %v4367_v25 = vadd.f32 %v4695_v6, %v4366_v29 }
 0x716   : > { %4397 = vst [vmem:[%s410_s22 + $0x18] sm:$0xff] %v4375_v35 }
 0x717   : > { %4395 = vst [vmem:[%s410_s22 + $0x8] sm:$0xff] %v4367_v25 }
 0x741   : > { %v4779_v13 = vpop.f32.mrb[12].mxu1 }
 0x742   : > { %v4388_v4 = vadd.f32 %v4779_v13, %v4695_v6  ;;  %v4379_v50 = vpop.f32.mrb[13].mxu1 }
 0x743   : > { %v4380_v12 = vadd.f32 %v4695_v6, %v4379_v50  ;;  %v4780_v46 = vpop.f32.mrb[14].mxu1 }
 0x744   : > { %4400 = vst [vmem:[%s410_s22 + $0x30] sm:$0xff] %v4388_v4  ;;  %v4391_v58 = vadd.f32 %v4780_v46, %v4695_v6  ;;  %v4382_v11 = vpop.f32.mrb[15].mxu1 }
 0x745   : > { %4398 = vst [vmem:[%s410_s22 + $0x20] sm:$0xff] %v4380_v12  ;;  %v4383_v55 = vadd.f32 %v4695_v6, %v4382_v11 }
 0x746   : > { %4401 = vst [vmem:[%s410_s22 + $0x38] sm:$0xff] %v4391_v58 }
 0x747   : > { %4399 = vst [vmem:[%s410_s22 + $0x28] sm:$0xff] %v4383_v55 }
 0x748   : > { %5135 = shalt.err (!%p5132_p5)
}
 0x749   : > { %s5136_s11 = scalar_lea.hbm %s8452_s29, 1024  ;;  %s5140_s12 = scalar_lea.hbm %s8514_s10, 2048 }
 0x74a   : > { %p5137_p6 = scmp.ne.s32.totalorder %s8452_s29, %s5136_s11  ;;  %p5141_p10 = scmp.lt.u32.totalorder %s8452_s29, %s8514_s10 }
 0x74b   : > { %p5142_p11 = scmp.lt.u32.totalorder %s5140_s12, %s5136_s11  ;;  %p5144_p13 = scmp.lt.u32.totalorder %s5136_s11, %s8452_s29 }
 0x74c   : > { %p5138_p7 = pnand %p5137_p6, %p5308_p4 }
 0x74d   : > { %p5143_p12 = por %p5142_p11, %p5141_p10 }
 0x74e   : > { %p5139_p9 = pneg %p5138_p7 }
 0x74f   : > { %p5145_p0 = por %p5144_p13, %p5143_p12 }
 0x751   : > { %p5146_p1 = pnand %p5145_p0, %p5139_p9 }
 0x753   : > { %5149 = shalt.err (!%p5146_p1)
}
 0x754   : > { %s5211_s19 = smov 128   ;;  %s5212_s24 = smov 8  }
 0x755   : > { %4909 = dma.vmem_to_hbm [thread:$0]  (%p5308_p4), %s8454_s30, 1024, %s8452_s29, %s8458_s16, %s5211_s19, %s5211_s19, %s5212_s24  }
 0x756 PF: > { %p4915_p2 = scmp.ge.s32.totalorder %s5200_s18, 2  ;;  %s4433_s22 = sand.u32 1, %s5180_s13  }
 0x757   : > { %s4434_s11 = scalar_lea.sflag [#allocation3], %s4433_s22 }
 0x758   : > { %p4912_p3 = pnand %p4915_p2, %p5315_p8 }
 0x75a   : > { %5175 = dma.done.wait (!%p4912_p3), %s4434_s11, 1024  }
 0x75b   : > { %5177 = vsyncadd (!%p4912_p3), %s4434_s11, 4294966272  ;;  %s23_s18 = sadd.s32 1, %s5200_s18   ;;  %s8662_s13 = smov %s5184_s14 }
 0x75c   : > { %p20_p5 = scmp.ge.s32.totalorder %s23_s18, 4   ;;  %s8663_s14 = smov %s5188_s15 }
 0x75d   : > { %s8664_s15 = smov %s5321_s26  ;;  %s8665_s16 = smov %s5196_s17 }
 0x75e   : > { %s8666_s17 = smov %s8668_s21  ;;  %22 = sbr.rel (!%p20_p5) target bundleno = 4 (0x4), region = 108 }
 0x765   :  { %4439 = vsyncpa [#allocation3], 1 }
 0x766   :  { %4441 = vsyncpa [#allocation3 + $0x1], 1 }

</bundles_post_ra>
